<compile_context>
chip_gen: v5e
topology: v5e:2x2
jax: 0.10.0
libtpu: 0.0.40
codegen_flags: <defaults>
</compile_context>

<pallas_src>
import functools
import math

import jax
import jax.numpy as jnp
from jax.experimental import pallas as pl
from jax.experimental.pallas import tpu as pltpu

EPS = 1e-5
NEG_INF = -1e30


def _pick_tile(n, target, align):
  """Largest tile t <= target with n % t == 0 and t % align == 0; falls back to n."""
  if n <= target:
    return n
  for t in range(target, align - 1, -1):
    if n % t == 0 and t % align == 0:
      return t
  return n


def _rmsnorm(v, g):
  ms = jnp.mean(v * v, axis=-1, keepdims=True)
  return g * (v * jax.lax.rsqrt(ms + EPS))


def _resident_spec(shape, single_buffer):
  """Weight stays in VMEM for the whole grid (block index constant).

  With single_buffer=True the spec asks for a single pipeline buffer
  (pl.Buffered(1)) since the block is never re-fetched -> halves resident-weight
  VMEM (the main fit-or-spill lever on v7x's 64 MiB).  Falls back silently if the
  running JAX version does not take pipeline_mode.
  """
  index_map = lambda *args, _r=len(shape): (0,) * _r
  if single_buffer:
    try:
      return pl.BlockSpec(shape, index_map, pipeline_mode=pl.Buffered(1))
    except (TypeError, AttributeError):
      pass
  return pl.BlockSpec(shape, index_map)


# --------------------------------------------------------------------------------------
# Kernel 1: RMSNorm + per-head QKV projection -> head-major bf16 Q/K/V.
# Grid: (batch, row_tile), both parallel.
# --------------------------------------------------------------------------------------
def _qkv_kernel(x_ref, g1_ref, wq_ref, wk_ref, wv_ref,
                q_ref, k_ref, v_ref, *, n_heads, scale):
  f32, bf16 = jnp.float32, jnp.bfloat16
  D = x_ref.shape[-1]
  dh = D // n_heads
  xs = x_ref[0].astype(f32)                                      # (tr, D)
  h1 = _rmsnorm(xs, g1_ref[...]).astype(bf16)
  for h in range(n_heads):                                       # per-head direct proj
    lo = h * dh
    q_ref[0, h] = (jnp.dot(h1, wq_ref[:, lo:lo + dh],
                           preferred_element_type=f32) * scale).astype(bf16)
    k_ref[0, h] = jnp.dot(h1, wk_ref[:, lo:lo + dh],
                          preferred_element_type=f32).astype(bf16)
    v_ref[0, h] = jnp.dot(h1, wv_ref[:, lo:lo + dh],
                          preferred_element_type=f32).astype(bf16)


def qkv_project_pallas(x, g1, wq, wk, wv, n_heads, *, row_block,
                       single_buffer_weights=False, vmem_limit_bytes=None):
  B, S, D = x.shape
  dh = D // n_heads
  tr = row_block
  assert S % tr == 0
  kernel = functools.partial(_qkv_kernel, n_heads=n_heads, scale=1.0 / math.sqrt(dh))
  hm = jax.ShapeDtypeStruct((B, n_heads, S, dh), jnp.bfloat16)
  out_spec = pl.BlockSpec((1, n_heads, tr, dh), lambda b, r: (b, 0, r, 0))
  grid_spec = pltpu.PrefetchScalarGridSpec(
      num_scalar_prefetch=0,
      grid=(B, S // tr),
      in_specs=[
          pl.BlockSpec((1, tr, D), lambda b, r: (b, r, 0)),      # x row tile
          _resident_spec((1, D), single_buffer_weights),         # g1
          _resident_spec((D, D), single_buffer_weights),         # wq
          _resident_spec((D, D), single_buffer_weights),         # wk
          _resident_spec((D, D), single_buffer_weights),         # wv
      ],
      out_specs=(out_spec, out_spec, out_spec),
  )
  return pl.pallas_call(
      kernel,
      out_shape=(hm, hm, hm),
      grid_spec=grid_spec,
      compiler_params=pltpu.CompilerParams(
          dimension_semantics=("parallel", "parallel"),
          vmem_limit_bytes=vmem_limit_bytes),
  )(x, g1, wq, wk, wv)


# --------------------------------------------------------------------------------------
# Kernel 2: causal flash attention (online softmax over KV chunks, masked chunks
# skipped) + output projection + residual + RMSNorm + chunked SwiGLU + residual.
# Grid: (batch, query_tile), both parallel.
# --------------------------------------------------------------------------------------
def _attn_ffn_kernel(x_ref, q_ref, k_ref, v_ref, wo_ref, g2_ref,
                     w1_ref, w3_ref, w2_ref, o_ref, ctx_scr,
                     *, kv_block, bf16_exp):
  f32, bf16 = jnp.float32, jnp.bfloat16
  _, H, _, dh = k_ref.shape
  _, tq, D = o_ref.shape
  n_chunks = w1_ref.shape[0]
  tkv = kv_block

  qi = pl.program_id(1)
  row0 = pl.multiple_of(qi * tq, tq)

  xq = x_ref[0].astype(f32)                                      # (tq, D) residual input
  qh = q_ref[0]                                                  # (H, tq, dh) bf16
  row_ids = row0 + jax.lax.broadcasted_iota(jnp.int32, (tq, 1), 0)

  # ---- online softmax; only chunks that intersect the causal region are visited ----
  def kv_step(c, carry):
    m, l, acc = carry
    kv0 = pl.multiple_of(c * tkv, tkv)
    kc = k_ref[0, :, pl.ds(kv0, tkv), :]                         # (H, tkv, dh) bf16
    vc = v_ref[0, :, pl.ds(kv0, tkv), :]
    col_ids = kv0 + jax.lax.broadcasted_iota(jnp.int32, (1, tkv), 1)
    bias = jnp.where(col_ids > row_ids, NEG_INF, 0.0).astype(f32)  # (tq, tkv)
    s = jnp.einsum('hqd,hkd->hqk', qh, kc,
                   preferred_element_type=f32) + bias            # (H, tq, tkv) f32
    m_new = jnp.maximum(m, jnp.max(s, axis=-1, keepdims=True))
    alpha = jnp.exp(m - m_new)
    if bf16_exp:  # v6e/v7x EUP option; keep False on v5e (no bf16 EUP)
      p = jnp.exp((s - m_new).astype(bf16))
      l_new = alpha * l + jnp.sum(p.astype(f32), axis=-1, keepdims=True)
      pv = p
    else:
      p = jnp.exp(s - m_new)
      l_new = alpha * l + jnp.sum(p, axis=-1, keepdims=True)
      pv = p.astype(bf16)
    acc_new = alpha * acc + jnp.einsum('hqk,hkd->hqd', pv, vc,
                                       preferred_element_type=f32)
    return m_new, l_new, acc_new

  n_kv = (row0 + tq + tkv - 1) // tkv                            # skip masked chunks
  m0 = jnp.full((H, tq, 1), NEG_INF, f32)
  l0 = jnp.zeros((H, tq, 1), f32)
  acc0 = jnp.zeros((H, tq, dh), f32)
  m, l, acc = jax.lax.fori_loop(0, n_kv, kv_step, (m0, l0, acc0))

  ctx = acc * pl.reciprocal(l, approx=True)                      # (H, tq, dh) f32
  for h in range(H):                                             # layout copies only
    ctx_scr[:, h * dh:(h + 1) * dh] = ctx[h]

  attn = jnp.dot(ctx_scr[...].astype(bf16), wo_ref[...],
                 preferred_element_type=f32)                     # single K=D projection
  x1 = xq + attn                                                 # residual 1

  # ---- RMSNorm 2 + SwiGLU FFN over pre-chunked weights (fori_loop bounds live ranges)
  h2 = _rmsnorm(x1, g2_ref[...]).astype(bf16)

  def ffn_step(c, ff):
    a = jnp.dot(h2, w1_ref[c], preferred_element_type=f32)       # (tq, hc)
    g = jnp.dot(h2, w3_ref[c], preferred_element_type=f32)
    a = a * jax.nn.sigmoid(a)                                    # SiLU, f32
    return ff + jnp.dot((a * g).astype(bf16), w2_ref[c],
                        preferred_element_type=f32)

  ff = jax.lax.fori_loop(0, n_chunks, ffn_step, jnp.zeros((tq, D), f32))
  # TODO(synk): nn.Dropout(0.1) layers are identity in eval/inference mode; omitted.
  o_ref[0] = (x1 + ff).astype(o_ref.dtype)                       # residual 2


def transformer_block_pallas(x, p, n_heads, *, q_block=None, kv_block=None,
                             single_buffer_weights=False, bf16_exp=False,
                             vmem_limit_bytes=None):
  """One fused transformer block.  x: (B, S, D) float32 (module's native layout)."""
  B, S, D = x.shape
  assert D % n_heads == 0
  dh = D // n_heads
  # bf16 head-major tensors put tq/tkv in the sublane slot -> align to 16;
  # 256 preferred (v6e/v7x MXU width); small S just uses S.
  tq = q_block or _pick_tile(S, 256, 16)
  tkv = kv_block or _pick_tile(S, 256, 16)
  assert S % tq == 0 and S % tkv == 0

  # 1) RMSNorm + head-major QKV projection (hoisted out of the attention grid).
  qh, kh, vh = qkv_project_pallas(
      x, p['g1'], p['wq'], p['wk'], p['wv'], n_heads, row_block=tq,
      single_buffer_weights=single_buffer_weights, vmem_limit_bytes=vmem_limit_bytes)

  # 2) Attention + FFN, fully parallel grid (batch x query tiles).
  n_chunks, _, hc = p['w1c'].shape
  kernel = functools.partial(_attn_ffn_kernel, kv_block=tkv, bf16_exp=bf16_exp)
  grid_spec = pltpu.PrefetchScalarGridSpec(
      num_scalar_prefetch=0,
      grid=(B, S // tq),
      in_specs=[
          pl.BlockSpec((1, tq, D), lambda b, qi: (b, qi, 0)),           # x tile (resid)
          pl.BlockSpec((1, n_heads, tq, dh), lambda b, qi: (b, 0, qi, 0)),   # Q tile
          pl.BlockSpec((1, n_heads, S, dh), lambda b, qi: (b, 0, 0, 0)),     # K full seq
          pl.BlockSpec((1, n_heads, S, dh), lambda b, qi: (b, 0, 0, 0)),     # V full seq
          _resident_spec((D, D), single_buffer_weights),                # wo
          _resident_spec((1, D), single_buffer_weights),                # g2
          _resident_spec((n_chunks, D, hc), single_buffer_weights),     # w1 (chunked)
          _resident_spec((n_chunks, D, hc), single_buffer_weights),     # w3 (chunked)
          _resident_spec((n_chunks, hc, D), single_buffer_weights),     # w2 (chunked)
      ],
      out_specs=pl.BlockSpec((1, tq, D), lambda b, qi: (b, qi, 0)),
      scratch_shapes=[pltpu.VMEM((tq, D), jnp.float32)],                # attn context
  )
  return pl.pallas_call(
      kernel,
      out_shape=jax.ShapeDtypeStruct((B, S, D), x.dtype),
      grid_spec=grid_spec,
      compiler_params=pltpu.CompilerParams(
          dimension_semantics=("parallel", "parallel"),
          vmem_limit_bytes=vmem_limit_bytes),
  )(x, qh, kh, vh, p['wo'], p['g2'], p['w1c'], p['w3c'], p['w2c'])


# --------------------------------------------------------------------------------------
# Final RMSNorm (hoisted, once per row) + tied output projection (vocab-outer tiling so
# each (D, tv) weight tile is streamed from HBM exactly once).
# --------------------------------------------------------------------------------------
def _rmsnorm_cast_kernel(h_ref, g_ref, o_ref):
  h = h_ref[...].astype(jnp.float32)
  ms = jnp.mean(h * h, axis=-1, keepdims=True)
  o_ref[...] = (g_ref[...] * (h * jax.lax.rsqrt(ms + EPS))).astype(o_ref.dtype)


def _logits_matmul_kernel(hn_ref, w_ref, o_ref):
  o_ref[...] = jnp.dot(hn_ref[...], w_ref[...],
                       preferred_element_type=jnp.float32).astype(o_ref.dtype)


def rmsnorm_logits_pallas(h_flat, g, w_bf16, *, row_block=None, vocab_block=None,
                          vmem_limit_bytes=None):
  R, D = h_flat.shape
  V = w_bf16.shape[1]
  tm = row_block or _pick_tile(R, 256, 8)
  tv = vocab_block or _pick_tile(V, 2048, 128)
  assert R % tm == 0 and V % tv == 0

  hn = pl.pallas_call(                                            # norm once per row
      _rmsnorm_cast_kernel,
      out_shape=jax.ShapeDtypeStruct((R, D), jnp.bfloat16),
      grid_spec=pltpu.PrefetchScalarGridSpec(
          num_scalar_prefetch=0,
          grid=(R // tm,),
          in_specs=[pl.BlockSpec((tm, D), lambda i: (i, 0)),
                    pl.BlockSpec((1, D), lambda i: (0, 0))],
          out_specs=pl.BlockSpec((tm, D), lambda i: (i, 0))),
      compiler_params=pltpu.CompilerParams(
          dimension_semantics=("parallel",), vmem_limit_bytes=vmem_limit_bytes),
  )(h_flat, g)

  return pl.pallas_call(                                          # vocab axis OUTER
      _logits_matmul_kernel,
      out_shape=jax.ShapeDtypeStruct((R, V), jnp.float32),
      grid_spec=pltpu.PrefetchScalarGridSpec(
          num_scalar_prefetch=0,
          grid=(V // tv, R // tm),
          in_specs=[pl.BlockSpec((tm, D), lambda j, i: (i, 0)),
                    pl.BlockSpec((D, tv), lambda j, i: (0, j))],
          out_specs=pl.BlockSpec((tm, tv), lambda j, i: (i, j))),
      compiler_params=pltpu.CompilerParams(
          dimension_semantics=("parallel", "parallel"),
          vmem_limit_bytes=vmem_limit_bytes),
  )(hn, w_bf16)


# --------------------------------------------------------------------------------------
# Full model forward: tokens (S, B) int32 -> logits (S, B, V), as in the PyTorch module.
# --------------------------------------------------------------------------------------
def transformer_model_forward(tokens_sb, kparams, n_heads, *, q_block=None,
                              kv_block=None, row_block=None, vocab_block=None,
                              single_buffer_weights=False, bf16_exp=False,
                              vmem_limit_bytes=None):
  S, B = tokens_sb.shape
  emb = kparams['emb']
  V, D = emb.shape
  # TODO(synk): embedding gather + positional-encoding add stay as plain-JAX glue; a
  # scalar-prefetch / DMA-gather Pallas kernel could fuse them if they ever matter.
  h = jnp.take(emb, tokens_sb.T, axis=0) + kparams['pe'][None, :S, :]   # (B, S, D) f32
  for blk in kparams['blocks']:
    h = transformer_block_pallas(h, blk, n_heads, q_block=q_block, kv_block=kv_block,
                                 single_buffer_weights=single_buffer_weights,
                                 bf16_exp=bf16_exp, vmem_limit_bytes=vmem_limit_bytes)
  logits = rmsnorm_logits_pallas(h.reshape(B * S, D), kparams['gf'], kparams['wout'],
                                 row_block=row_block, vocab_block=vocab_block,
                                 vmem_limit_bytes=vmem_limit_bytes)
  return jnp.transpose(logits.reshape(B, S, V), (1, 0, 2))


# --------------------------------------------------------------------------------------
# Parameters, one-time kernel-side weight prep, pure-JAX reference (eval mode, f32).
# --------------------------------------------------------------------------------------
def make_positional_encoding(max_len, d_model):
  pos = jnp.arange(max_len, dtype=jnp.float32)[:, None]
  div = jnp.exp(jnp.arange(0, d_model, 2, dtype=jnp.float32)
                * (-math.log(10000.0) / d_model))
  pe = jnp.zeros((max_len, d_model), jnp.float32)
  pe = pe.at[:, 0::2].set(jnp.sin(pos * div))
  pe = pe.at[:, 1::2].set(jnp.cos(pos * div))
  return pe


def init_params(key, vocab, d_model, n_heads, n_blocks, max_seq_len, init_std=0.02):
  hidden = int(2 * (4 * d_model) / 3)
  hidden = 256 * ((hidden + 255) // 256)
  ks = jax.random.split(key, 7 * n_blocks + 1)
  f32 = jnp.float32
  std_resid = init_std / math.sqrt(2 * n_blocks)      # out.weight / w2.weight init
  blocks = []
  for b in range(n_blocks):
    kq, kk, kv, ko, k1, k2, k3 = ks[7 * b:7 * b + 7]
    blocks.append({
        'g1': jnp.ones((1, d_model), f32),
        'g2': jnp.ones((1, d_model), f32),
        # weights stored pre-transposed as (in, out): y = x @ W  (== x @ W_pt.T)
        'wq': jax.random.normal(kq, (d_model, d_model), f32) * init_std,
        'wk': jax.random.normal(kk, (d_model, d_model), f32) * init_std,
        'wv': jax.random.normal(kv, (d_model, d_model), f32) * init_std,
        'wo': jax.random.normal(ko, (d_model, d_model), f32) * std_resid,
        'w1': jax.random.normal(k1, (d_model, hidden), f32) * init_std,
        'w2': jax.random.normal(k2, (hidden, d_model), f32) * std_resid,
        'w3': jax.random.normal(k3, (d_model, hidden), f32) * init_std,
    })
  return {
      'emb': jax.random.normal(ks[-1], (vocab, d_model), f32) * init_std,
      'pe': make_positional_encoding(max_seq_len, d_model),
      'blocks': blocks,
      'gf': jnp.ones((1, d_model), f32),
  }


def prepare_kernel_params(params, *, ffn_chunk=None):
  """One-time weight prep for the kernels: bf16 cast + FFN chunking + tied output.

  Done once outside the forward so no per-call f32->bf16 HBM round trip remains.
  """
  bf16 = jnp.bfloat16
  blocks = []
  for p in params['blocks']:
    D, hidden = p['w1'].shape
    hc = ffn_chunk or _pick_tile(hidden, 512, 256)
    assert hidden % hc == 0
    nc = hidden // hc
    blocks.append({
        'g1': p['g1'], 'g2': p['g2'],
        'wq': p['wq'].astype(bf16), 'wk': p['wk'].astype(bf16),
        'wv': p['wv'].astype(bf16), 'wo': p['wo'].astype(bf16),
        # chunk axis leading so the kernel's fori_loop indexes it dynamically
        'w1c': p['w1'].reshape(D, nc, hc).transpose(1, 0, 2).astype(bf16),
        'w3c': p['w3'].reshape(D, nc, hc).transpose(1, 0, 2).astype(bf16),
        'w2c': p['w2'].reshape(nc, hc, D).astype(bf16),
    })
  return {
      'emb': params['emb'],
      'pe': params['pe'],
      'gf': params['gf'],
      'wout': jnp.transpose(params['emb']).astype(bf16),   # tied weights: output = emb^T
      'blocks': blocks,
  }


def _reference_block(x, p, n_heads):
  B, S, D = x.shape
  dh = D // n_heads

  def rms(t, g):
    return g * (t * jax.lax.rsqrt(jnp.mean(t * t, axis=-1, keepdims=True) + EPS))

  hn = rms(x, p['g1'])
  q, k, v = hn @ p['wq'], hn @ p['wk'], hn @ p['wv']

  def split(t):
    return jnp.transpose(t.reshape(B, S, n_heads, dh), (0, 2, 1, 3))

  qh, kh, vh = split(q), split(k), split(v)
  s = jnp.einsum('bhqd,bhkd->bhqk', qh, kh) / math.sqrt(dh)
  mask = jnp.triu(jnp.ones((S, S), bool), 1)
  s = jnp.where(mask[None, None], -jnp.inf, s)
  pattn = jax.nn.softmax(s, axis=-1)
  ctx = jnp.einsum('bhqk,bhkd->bhqd', pattn, vh)
  ctx = jnp.transpose(ctx, (0, 2, 1, 3)).reshape(B, S, D)
  x1 = x + ctx @ p['wo']
  h2 = rms(x1, p['g2'])
  a = h2 @ p['w1']
  ff = (a * jax.nn.sigmoid(a) * (h2 @ p['w3'])) @ p['w2']
  return x1 + ff


def reference_model(tokens_sb, params, n_heads):
  S, B = tokens_sb.shape
  h = params['emb'][tokens_sb.T] + params['pe'][None, :S, :]
  for blk in params['blocks']:
    h = _reference_block(h, blk, n_heads)
  hn = params['gf'] * (h * jax.lax.rsqrt(jnp.mean(h * h, -1, keepdims=True) + EPS))
  logits = hn @ params['emb'].T
  return jnp.transpose(logits, (1, 0, 2))


if __name__ == "__main__":
  VOCAB, D_MODEL, N_HEADS, N_BLOCKS = 512, 512, 4, 2   # head_dim = 128 (lane-dense)
  SEQ, BATCH, MAX_SEQ = 32, 2, 64

  key = jax.random.PRNGKey(0)
  kt, kp = jax.random.split(key)
  tokens = jax.random.randint(kt, (SEQ, BATCH), 0, VOCAB, dtype=jnp.int32)
  params = init_params(kp, VOCAB, D_MODEL, N_HEADS, N_BLOCKS, MAX_SEQ)
  kparams = prepare_kernel_params(params, ffn_chunk=512)

  # small tiles so chunk skipping / KV tiling / FFN fori-loop / vocab-outer tiling
  # are all exercised (on real shapes use tq=tkv=256 on v6e/v7x, 128 on v5e).
  logits = transformer_model_forward(
      tokens, kparams, N_HEADS,
      q_block=16, kv_block=16, row_block=32, vocab_block=256)
  logits = jax.block_until_ready(logits)

  ref = reference_model(tokens, params, N_HEADS)
  assert logits.shape == (SEQ, BATCH, VOCAB)
  max_err = float(jnp.max(jnp.abs(logits - ref)))
  assert jnp.allclose(logits, ref, atol=5e-2, rtol=5e-2), f"max abs err {max_err}"
  print("KERNEL_OK")
</pallas_src>

<mosaic_0001>
module attributes {stable_mosaic.version = 11 : i64} {
  func.func @_qkv_kernel(%arg0: i32, %arg1: i32, %arg2: memref<1x16x512xf32, #tpu.memory_space<vmem>>, %arg3: memref<1x512xf32, #tpu.memory_space<vmem>>, %arg4: memref<512x512xbf16, #tpu.memory_space<vmem>>, %arg5: memref<512x512xbf16, #tpu.memory_space<vmem>>, %arg6: memref<512x512xbf16, #tpu.memory_space<vmem>>, %arg7: memref<1x4x16x128xbf16, #tpu.memory_space<vmem>>, %arg8: memref<1x4x16x128xbf16, #tpu.memory_space<vmem>>, %arg9: memref<1x4x16x128xbf16, #tpu.memory_space<vmem>>) attributes {dimension_semantics = [#tpu.dimension_semantics<parallel>, #tpu.dimension_semantics<parallel>], iteration_bounds = array<i64: 2, 2>, scalar_prefetch = 0 : i64, scratch_operands = 0 : i64, tpu.core_type = #tpu.core_type<tc>, window_params = [{transform_indices = @transform_0, window_bounds = array<i64: 1, 16, 512>}, {pipeline_mode = #tpu.pipeline_mode<synchronous>, transform_indices = @transform_1, window_bounds = array<i64: 1, 512>}, {pipeline_mode = #tpu.pipeline_mode<synchronous>, transform_indices = @transform_2, window_bounds = array<i64: 512, 512>}, {pipeline_mode = #tpu.pipeline_mode<synchronous>, transform_indices = @transform_3, window_bounds = array<i64: 512, 512>}, {pipeline_mode = #tpu.pipeline_mode<synchronous>, transform_indices = @transform_4, window_bounds = array<i64: 512, 512>}, {transform_indices = @transform_5, window_bounds = array<i64: 1, 4, 16, 128>}, {transform_indices = @transform_6, window_bounds = array<i64: 1, 4, 16, 128>}, {transform_indices = @transform_7, window_bounds = array<i64: 1, 4, 16, 128>}]} {
    %c0 = arith.constant 0 : index
    %c0_0 = arith.constant 0 : index
    %c0_1 = arith.constant 0 : index
    %0 = vector.load %arg2[%c0, %c0_0, %c0_1] : memref<1x16x512xf32, #tpu.memory_space<vmem>>, vector<1x16x512xf32>
    %1 = vector.shape_cast %0 : vector<1x16x512xf32> to vector<16x512xf32>
    %c0_2 = arith.constant 0 : index
    %c0_3 = arith.constant 0 : index
    %2 = vector.load %arg3[%c0_2, %c0_3] : memref<1x512xf32, #tpu.memory_space<vmem>>, vector<1x512xf32>
    %3 = arith.mulf %1, %1 : vector<16x512xf32>
    %cst = arith.constant dense<0.000000e+00> : vector<16xf32>
    %4 = vector.multi_reduction <add>, %3, %cst [1] : vector<16x512xf32> to vector<16xf32>
    %5 = vector.shape_cast %4 : vector<16xf32> to vector<16x1xf32>
    %cst_4 = arith.constant 5.120000e+02 : f32
    %6 = vector.broadcast %cst_4 : f32 to vector<16x1xf32>
    %7 = arith.divf %5, %6 : vector<16x1xf32>
    %cst_5 = arith.constant 9.99999974E-6 : f32
    %8 = vector.broadcast %cst_5 : f32 to vector<16x1xf32>
    %9 = arith.addf %7, %8 : vector<16x1xf32>
    %10 = math.rsqrt %9 : vector<16x1xf32>
    %11 = vector.broadcast %10 : vector<16x1xf32> to vector<16x512xf32>
    %12 = arith.mulf %1, %11 : vector<16x512xf32>
    %13 = vector.broadcast %2 : vector<1x512xf32> to vector<16x512xf32>
    %14 = arith.mulf %13, %12 : vector<16x512xf32>
    %15 = arith.truncf %14 : vector<16x512xf32> to vector<16x512xbf16>
    %c0_6 = arith.constant 0 : index
    %c0_7 = arith.constant 0 : index
    %16 = vector.load %arg4[%c0_6, %c0_7] : memref<512x512xbf16, #tpu.memory_space<vmem>>, vector<512x128xbf16>
    %cst_8 = arith.constant dense<0.000000e+00> : vector<16x128xf32>
    %17 = tpu.matmul %15, %16, %cst_8 {dimension_numbers = #tpu.dot_dimension_numbers<[1], [0], [0], [1], [0, 0, 1, 1], [], []>} : vector<16x512xbf16>, vector<512x128xbf16>, vector<16x128xf32> -> vector<16x128xf32>
    %cst_9 = arith.constant 0.0883883461 : f32
    %18 = vector.broadcast %cst_9 : f32 to vector<16x128xf32>
    %19 = arith.mulf %17, %18 : vector<16x128xf32>
    %20 = arith.truncf %19 : vector<16x128xf32> to vector<16x128xbf16>
    %c0_10 = arith.constant 0 : index
    %c0_11 = arith.constant 0 : index
    %c0_12 = arith.constant 0 : index
    %c0_13 = arith.constant 0 : index
    %21 = vector.load %arg7[%c0_10, %c0_11, %c0_12, %c0_13] : memref<1x4x16x128xbf16, #tpu.memory_space<vmem>>, vector<1x1x16x128xbf16>
    %22 = vector.shape_cast %21 : vector<1x1x16x128xbf16> to vector<16x128xbf16>
    %23 = vector.shape_cast %20 : vector<16x128xbf16> to vector<1x1x16x128xbf16>
    tpu.vector_store %arg7[%c0_10, %c0_11, %c0_12, %c0_13], %23 {strides = array<i32>} : memref<1x4x16x128xbf16, #tpu.memory_space<vmem>>, vector<1x1x16x128xbf16>,
    %c0_14 = arith.constant 0 : index
    %c0_15 = arith.constant 0 : index
    %24 = vector.load %arg5[%c0_14, %c0_15] : memref<512x512xbf16, #tpu.memory_space<vmem>>, vector<512x128xbf16>
    %cst_16 = arith.constant dense<0.000000e+00> : vector<16x128xf32>
    %25 = tpu.matmul %15, %24, %cst_16 {dimension_numbers = #tpu.dot_dimension_numbers<[1], [0], [0], [1], [0, 0, 1, 1], [], []>} : vector<16x512xbf16>, vector<512x128xbf16>, vector<16x128xf32> -> vector<16x128xf32>
    %26 = arith.truncf %25 : vector<16x128xf32> to vector<16x128xbf16>
    %c0_17 = arith.constant 0 : index
    %c0_18 = arith.constant 0 : index
    %c0_19 = arith.constant 0 : index
    %c0_20 = arith.constant 0 : index
    %27 = vector.load %arg8[%c0_17, %c0_18, %c0_19, %c0_20] : memref<1x4x16x128xbf16, #tpu.memory_space<vmem>>, vector<1x1x16x128xbf16>
    %28 = vector.shape_cast %27 : vector<1x1x16x128xbf16> to vector<16x128xbf16>
    %29 = vector.shape_cast %26 : vector<16x128xbf16> to vector<1x1x16x128xbf16>
    tpu.vector_store %arg8[%c0_17, %c0_18, %c0_19, %c0_20], %29 {strides = array<i32>} : memref<1x4x16x128xbf16, #tpu.memory_space<vmem>>, vector<1x1x16x128xbf16>,
    %c0_21 = arith.constant 0 : index
    %c0_22 = arith.constant 0 : index
    %30 = vector.load %arg6[%c0_21, %c0_22] : memref<512x512xbf16, #tpu.memory_space<vmem>>, vector<512x128xbf16>
    %cst_23 = arith.constant dense<0.000000e+00> : vector<16x128xf32>
    %31 = tpu.matmul %15, %30, %cst_23 {dimension_numbers = #tpu.dot_dimension_numbers<[1], [0], [0], [1], [0, 0, 1, 1], [], []>} : vector<16x512xbf16>, vector<512x128xbf16>, vector<16x128xf32> -> vector<16x128xf32>
    %32 = arith.truncf %31 : vector<16x128xf32> to vector<16x128xbf16>
    %c0_24 = arith.constant 0 : index
    %c0_25 = arith.constant 0 : index
    %c0_26 = arith.constant 0 : index
    %c0_27 = arith.constant 0 : index
    %33 = vector.load %arg9[%c0_24, %c0_25, %c0_26, %c0_27] : memref<1x4x16x128xbf16, #tpu.memory_space<vmem>>, vector<1x1x16x128xbf16>
    %34 = vector.shape_cast %33 : vector<1x1x16x128xbf16> to vector<16x128xbf16>
    %35 = vector.shape_cast %32 : vector<16x128xbf16> to vector<1x1x16x128xbf16>
    tpu.vector_store %arg9[%c0_24, %c0_25, %c0_26, %c0_27], %35 {strides = array<i32>} : memref<1x4x16x128xbf16, #tpu.memory_space<vmem>>, vector<1x1x16x128xbf16>,
    %c0_28 = arith.constant 0 : index
    %c128 = arith.constant 128 : index
    %36 = vector.load %arg4[%c0_28, %c128] : memref<512x512xbf16, #tpu.memory_space<vmem>>, vector<512x128xbf16>
    %cst_29 = arith.constant dense<0.000000e+00> : vector<16x128xf32>
    %37 = tpu.matmul %15, %36, %cst_29 {dimension_numbers = #tpu.dot_dimension_numbers<[1], [0], [0], [1], [0, 0, 1, 1], [], []>} : vector<16x512xbf16>, vector<512x128xbf16>, vector<16x128xf32> -> vector<16x128xf32>
    %cst_30 = arith.constant 0.0883883461 : f32
    %38 = vector.broadcast %cst_30 : f32 to vector<16x128xf32>
    %39 = arith.mulf %37, %38 : vector<16x128xf32>
    %40 = arith.truncf %39 : vector<16x128xf32> to vector<16x128xbf16>
    %c0_31 = arith.constant 0 : index
    %c1 = arith.constant 1 : index
    %c0_32 = arith.constant 0 : index
    %c0_33 = arith.constant 0 : index
    %41 = vector.load %arg7[%c0_31, %c1, %c0_32, %c0_33] : memref<1x4x16x128xbf16, #tpu.memory_space<vmem>>, vector<1x1x16x128xbf16>
    %42 = vector.shape_cast %41 : vector<1x1x16x128xbf16> to vector<16x128xbf16>
    %43 = vector.shape_cast %40 : vector<16x128xbf16> to vector<1x1x16x128xbf16>
    tpu.vector_store %arg7[%c0_31, %c1, %c0_32, %c0_33], %43 {strides = array<i32>} : memref<1x4x16x128xbf16, #tpu.memory_space<vmem>>, vector<1x1x16x128xbf16>,
    %c0_34 = arith.constant 0 : index
    %c128_35 = arith.constant 128 : index
    %44 = vector.load %arg5[%c0_34, %c128_35] : memref<512x512xbf16, #tpu.memory_space<vmem>>, vector<512x128xbf16>
    %cst_36 = arith.constant dense<0.000000e+00> : vector<16x128xf32>
    %45 = tpu.matmul %15, %44, %cst_36 {dimension_numbers = #tpu.dot_dimension_numbers<[1], [0], [0], [1], [0, 0, 1, 1], [], []>} : vector<16x512xbf16>, vector<512x128xbf16>, vector<16x128xf32> -> vector<16x128xf32>
    %46 = arith.truncf %45 : vector<16x128xf32> to vector<16x128xbf16>
    %c0_37 = arith.constant 0 : index
    %c1_38 = arith.constant 1 : index
    %c0_39 = arith.constant 0 : index
    %c0_40 = arith.constant 0 : index
    %47 = vector.load %arg8[%c0_37, %c1_38, %c0_39, %c0_40] : memref<1x4x16x128xbf16, #tpu.memory_space<vmem>>, vector<1x1x16x128xbf16>
    %48 = vector.shape_cast %47 : vector<1x1x16x128xbf16> to vector<16x128xbf16>
    %49 = vector.shape_cast %46 : vector<16x128xbf16> to vector<1x1x16x128xbf16>
    tpu.vector_store %arg8[%c0_37, %c1_38, %c0_39, %c0_40], %49 {strides = array<i32>} : memref<1x4x16x128xbf16, #tpu.memory_space<vmem>>, vector<1x1x16x128xbf16>,
    %c0_41 = arith.constant 0 : index
    %c128_42 = arith.constant 128 : index
    %50 = vector.load %arg6[%c0_41, %c128_42] : memref<512x512xbf16, #tpu.memory_space<vmem>>, vector<512x128xbf16>
    %cst_43 = arith.constant dense<0.000000e+00> : vector<16x128xf32>
    %51 = tpu.matmul %15, %50, %cst_43 {dimension_numbers = #tpu.dot_dimension_numbers<[1], [0], [0], [1], [0, 0, 1, 1], [], []>} : vector<16x512xbf16>, vector<512x128xbf16>, vector<16x128xf32> -> vector<16x128xf32>
    %52 = arith.truncf %51 : vector<16x128xf32> to vector<16x128xbf16>
    %c0_44 = arith.constant 0 : index
    %c1_45 = arith.constant 1 : index
    %c0_46 = arith.constant 0 : index
    %c0_47 = arith.constant 0 : index
    %53 = vector.load %arg9[%c0_44, %c1_45, %c0_46, %c0_47] : memref<1x4x16x128xbf16, #tpu.memory_space<vmem>>, vector<1x1x16x128xbf16>
    %54 = vector.shape_cast %53 : vector<1x1x16x128xbf16> to vector<16x128xbf16>
    %55 = vector.shape_cast %52 : vector<16x128xbf16> to vector<1x1x16x128xbf16>
    tpu.vector_store %arg9[%c0_44, %c1_45, %c0_46, %c0_47], %55 {strides = array<i32>} : memref<1x4x16x128xbf16, #tpu.memory_space<vmem>>, vector<1x1x16x128xbf16>,
    %c0_48 = arith.constant 0 : index
    %c256 = arith.constant 256 : index
    %56 = vector.load %arg4[%c0_48, %c256] : memref<512x512xbf16, #tpu.memory_space<vmem>>, vector<512x128xbf16>
    %cst_49 = arith.constant dense<0.000000e+00> : vector<16x128xf32>
    %57 = tpu.matmul %15, %56, %cst_49 {dimension_numbers = #tpu.dot_dimension_numbers<[1], [0], [0], [1], [0, 0, 1, 1], [], []>} : vector<16x512xbf16>, vector<512x128xbf16>, vector<16x128xf32> -> vector<16x128xf32>
    %cst_50 = arith.constant 0.0883883461 : f32
    %58 = vector.broadcast %cst_50 : f32 to vector<16x128xf32>
    %59 = arith.mulf %57, %58 : vector<16x128xf32>
    %60 = arith.truncf %59 : vector<16x128xf32> to vector<16x128xbf16>
    %c0_51 = arith.constant 0 : index
    %c2 = arith.constant 2 : index
    %c0_52 = arith.constant 0 : index
    %c0_53 = arith.constant 0 : index
    %61 = vector.load %arg7[%c0_51, %c2, %c0_52, %c0_53] : memref<1x4x16x128xbf16, #tpu.memory_space<vmem>>, vector<1x1x16x128xbf16>
    %62 = vector.shape_cast %61 : vector<1x1x16x128xbf16> to vector<16x128xbf16>
    %63 = vector.shape_cast %60 : vector<16x128xbf16> to vector<1x1x16x128xbf16>
    tpu.vector_store %arg7[%c0_51, %c2, %c0_52, %c0_53], %63 {strides = array<i32>} : memref<1x4x16x128xbf16, #tpu.memory_space<vmem>>, vector<1x1x16x128xbf16>,
    %c0_54 = arith.constant 0 : index
    %c256_55 = arith.constant 256 : index
    %64 = vector.load %arg5[%c0_54, %c256_55] : memref<512x512xbf16, #tpu.memory_space<vmem>>, vector<512x128xbf16>
    %cst_56 = arith.constant dense<0.000000e+00> : vector<16x128xf32>
    %65 = tpu.matmul %15, %64, %cst_56 {dimension_numbers = #tpu.dot_dimension_numbers<[1], [0], [0], [1], [0, 0, 1, 1], [], []>} : vector<16x512xbf16>, vector<512x128xbf16>, vector<16x128xf32> -> vector<16x128xf32>
    %66 = arith.truncf %65 : vector<16x128xf32> to vector<16x128xbf16>
    %c0_57 = arith.constant 0 : index
    %c2_58 = arith.constant 2 : index
    %c0_59 = arith.constant 0 : index
    %c0_60 = arith.constant 0 : index
    %67 = vector.load %arg8[%c0_57, %c2_58, %c0_59, %c0_60] : memref<1x4x16x128xbf16, #tpu.memory_space<vmem>>, vector<1x1x16x128xbf16>
    %68 = vector.shape_cast %67 : vector<1x1x16x128xbf16> to vector<16x128xbf16>
    %69 = vector.shape_cast %66 : vector<16x128xbf16> to vector<1x1x16x128xbf16>
    tpu.vector_store %arg8[%c0_57, %c2_58, %c0_59, %c0_60], %69 {strides = array<i32>} : memref<1x4x16x128xbf16, #tpu.memory_space<vmem>>, vector<1x1x16x128xbf16>,
    %c0_61 = arith.constant 0 : index
    %c256_62 = arith.constant 256 : index
    %70 = vector.load %arg6[%c0_61, %c256_62] : memref<512x512xbf16, #tpu.memory_space<vmem>>, vector<512x128xbf16>
    %cst_63 = arith.constant dense<0.000000e+00> : vector<16x128xf32>
    %71 = tpu.matmul %15, %70, %cst_63 {dimension_numbers = #tpu.dot_dimension_numbers<[1], [0], [0], [1], [0, 0, 1, 1], [], []>} : vector<16x512xbf16>, vector<512x128xbf16>, vector<16x128xf32> -> vector<16x128xf32>
    %72 = arith.truncf %71 : vector<16x128xf32> to vector<16x128xbf16>
    %c0_64 = arith.constant 0 : index
    %c2_65 = arith.constant 2 : index
    %c0_66 = arith.constant 0 : index
    %c0_67 = arith.constant 0 : index
    %73 = vector.load %arg9[%c0_64, %c2_65, %c0_66, %c0_67] : memref<1x4x16x128xbf16, #tpu.memory_space<vmem>>, vector<1x1x16x128xbf16>
    %74 = vector.shape_cast %73 : vector<1x1x16x128xbf16> to vector<16x128xbf16>
    %75 = vector.shape_cast %72 : vector<16x128xbf16> to vector<1x1x16x128xbf16>
    tpu.vector_store %arg9[%c0_64, %c2_65, %c0_66, %c0_67], %75 {strides = array<i32>} : memref<1x4x16x128xbf16, #tpu.memory_space<vmem>>, vector<1x1x16x128xbf16>,
    %c0_68 = arith.constant 0 : index
    %c384 = arith.constant 384 : index
    %76 = vector.load %arg4[%c0_68, %c384] : memref<512x512xbf16, #tpu.memory_space<vmem>>, vector<512x128xbf16>
    %cst_69 = arith.constant dense<0.000000e+00> : vector<16x128xf32>
    %77 = tpu.matmul %15, %76, %cst_69 {dimension_numbers = #tpu.dot_dimension_numbers<[1], [0], [0], [1], [0, 0, 1, 1], [], []>} : vector<16x512xbf16>, vector<512x128xbf16>, vector<16x128xf32> -> vector<16x128xf32>
    %cst_70 = arith.constant 0.0883883461 : f32
    %78 = vector.broadcast %cst_70 : f32 to vector<16x128xf32>
    %79 = arith.mulf %77, %78 : vector<16x128xf32>
    %80 = arith.truncf %79 : vector<16x128xf32> to vector<16x128xbf16>
    %c0_71 = arith.constant 0 : index
    %c3 = arith.constant 3 : index
    %c0_72 = arith.constant 0 : index
    %c0_73 = arith.constant 0 : index
    %81 = vector.load %arg7[%c0_71, %c3, %c0_72, %c0_73] : memref<1x4x16x128xbf16, #tpu.memory_space<vmem>>, vector<1x1x16x128xbf16>
    %82 = vector.shape_cast %81 : vector<1x1x16x128xbf16> to vector<16x128xbf16>
    %83 = vector.shape_cast %80 : vector<16x128xbf16> to vector<1x1x16x128xbf16>
    tpu.vector_store %arg7[%c0_71, %c3, %c0_72, %c0_73], %83 {strides = array<i32>} : memref<1x4x16x128xbf16, #tpu.memory_space<vmem>>, vector<1x1x16x128xbf16>,
    %c0_74 = arith.constant 0 : index
    %c384_75 = arith.constant 384 : index
    %84 = vector.load %arg5[%c0_74, %c384_75] : memref<512x512xbf16, #tpu.memory_space<vmem>>, vector<512x128xbf16>
    %cst_76 = arith.constant dense<0.000000e+00> : vector<16x128xf32>
    %85 = tpu.matmul %15, %84, %cst_76 {dimension_numbers = #tpu.dot_dimension_numbers<[1], [0], [0], [1], [0, 0, 1, 1], [], []>} : vector<16x512xbf16>, vector<512x128xbf16>, vector<16x128xf32> -> vector<16x128xf32>
    %86 = arith.truncf %85 : vector<16x128xf32> to vector<16x128xbf16>
    %c0_77 = arith.constant 0 : index
    %c3_78 = arith.constant 3 : index
    %c0_79 = arith.constant 0 : index
    %c0_80 = arith.constant 0 : index
    %87 = vector.load %arg8[%c0_77, %c3_78, %c0_79, %c0_80] : memref<1x4x16x128xbf16, #tpu.memory_space<vmem>>, vector<1x1x16x128xbf16>
    %88 = vector.shape_cast %87 : vector<1x1x16x128xbf16> to vector<16x128xbf16>
    %89 = vector.shape_cast %86 : vector<16x128xbf16> to vector<1x1x16x128xbf16>
    tpu.vector_store %arg8[%c0_77, %c3_78, %c0_79, %c0_80], %89 {strides = array<i32>} : memref<1x4x16x128xbf16, #tpu.memory_space<vmem>>, vector<1x1x16x128xbf16>,
    %c0_81 = arith.constant 0 : index
    %c384_82 = arith.constant 384 : index
    %90 = vector.load %arg6[%c0_81, %c384_82] : memref<512x512xbf16, #tpu.memory_space<vmem>>, vector<512x128xbf16>
    %cst_83 = arith.constant dense<0.000000e+00> : vector<16x128xf32>
    %91 = tpu.matmul %15, %90, %cst_83 {dimension_numbers = #tpu.dot_dimension_numbers<[1], [0], [0], [1], [0, 0, 1, 1], [], []>} : vector<16x512xbf16>, vector<512x128xbf16>, vector<16x128xf32> -> vector<16x128xf32>
    %92 = arith.truncf %91 : vector<16x128xf32> to vector<16x128xbf16>
    %c0_84 = arith.constant 0 : index
    %c3_85 = arith.constant 3 : index
    %c0_86 = arith.constant 0 : index
    %c0_87 = arith.constant 0 : index
    %93 = vector.load %arg9[%c0_84, %c3_85, %c0_86, %c0_87] : memref<1x4x16x128xbf16, #tpu.memory_space<vmem>>, vector<1x1x16x128xbf16>
    %94 = vector.shape_cast %93 : vector<1x1x16x128xbf16> to vector<16x128xbf16>
    %95 = vector.shape_cast %92 : vector<16x128xbf16> to vector<1x1x16x128xbf16>
    tpu.vector_store %arg9[%c0_84, %c3_85, %c0_86, %c0_87], %95 {strides = array<i32>} : memref<1x4x16x128xbf16, #tpu.memory_space<vmem>>, vector<1x1x16x128xbf16>,
    return
  }
  func.func @transform_0(%arg0: i32, %arg1: i32) -> (i32, i32, i32) {
    %c0_i32 = arith.constant 0 : i32
    %c0_i32_0 = arith.constant 0 : i32
    return %arg0, %arg1, %c0_i32 : i32, i32, i32
  }
  func.func @transform_1(%arg0: i32, %arg1: i32) -> (i32, i32) {
    %c0_i32 = arith.constant 0 : i32
    %c0_i32_0 = arith.constant 0 : i32
    %c0_i32_1 = arith.constant 0 : i32
    return %c0_i32, %c0_i32_0 : i32, i32
  }
  func.func @transform_2(%arg0: i32, %arg1: i32) -> (i32, i32) {
    %c0_i32 = arith.constant 0 : i32
    %c0_i32_0 = arith.constant 0 : i32
    %c0_i32_1 = arith.constant 0 : i32
    return %c0_i32, %c0_i32_0 : i32, i32
  }
  func.func @transform_3(%arg0: i32, %arg1: i32) -> (i32, i32) {
    %c0_i32 = arith.constant 0 : i32
    %c0_i32_0 = arith.constant 0 : i32
    %c0_i32_1 = arith.constant 0 : i32
    return %c0_i32, %c0_i32_0 : i32, i32
  }
  func.func @transform_4(%arg0: i32, %arg1: i32) -> (i32, i32) {
    %c0_i32 = arith.constant 0 : i32
    %c0_i32_0 = arith.constant 0 : i32
    %c0_i32_1 = arith.constant 0 : i32
    return %c0_i32, %c0_i32_0 : i32, i32
  }
  func.func @transform_5(%arg0: i32, %arg1: i32) -> (i32, i32, i32, i32) {
    %c0_i32 = arith.constant 0 : i32
    %c0_i32_0 = arith.constant 0 : i32
    %c0_i32_1 = arith.constant 0 : i32
    return %arg0, %c0_i32, %arg1, %c0_i32_0 : i32, i32, i32, i32
  }
  func.func @transform_6(%arg0: i32, %arg1: i32) -> (i32, i32, i32, i32) {
    %c0_i32 = arith.constant 0 : i32
    %c0_i32_0 = arith.constant 0 : i32
    %c0_i32_1 = arith.constant 0 : i32
    return %arg0, %c0_i32, %arg1, %c0_i32_0 : i32, i32, i32, i32
  }
  func.func @transform_7(%arg0: i32, %arg1: i32) -> (i32, i32, i32, i32) {
    %c0_i32 = arith.constant 0 : i32
    %c0_i32_0 = arith.constant 0 : i32
    %c0_i32_1 = arith.constant 0 : i32
    return %arg0, %c0_i32, %arg1, %c0_i32_0 : i32, i32, i32, i32
  }
}

</mosaic_0001>

<bundles_post_ra>
// kernel: tpu_custom_call.1
= control target key start
LH: loop header
LB: loop body
LE: loop exit
PB: predicated region body
PF: predicated region fallthrough
CT: control target
= control target key end

     0   :  { %s7547_s0 = inlined_call_operand.hbm [shape: f32[2,32,512], index: 0, kind: input, shape index: {}]   ;;  %s7548_s1 = inlined_call_operand.hbm [shape: f32[1,512], index: 1, kind: input, shape index: {}]   ;;  %s7549_s2 = inlined_call_operand.hbm [shape: bf16[512,512], index: 2, kind: input, shape index: {}]   ;;  %s7550_s3 = inlined_call_operand.hbm [shape: bf16[512,512], index: 3, kind: input, shape index: {}]   ;;  %s7551_s4 = inlined_call_operand.hbm [shape: bf16[512,512], index: 4, kind: input, shape index: {}]   ;;  %s7552_s5 = inlined_call_operand.hbm [shape: bf16[2,4,32,128], index: 5, kind: output, shape index: {0}]   ;;  %s7553_s6 = inlined_call_operand.hbm [shape: bf16[2,4,32,128], index: 6, kind: output, shape index: {1}]   ;;  %s7554_s7 = inlined_call_operand.hbm [shape: bf16[2,4,32,128], index: 7, kind: output, shape index: {2}]  }
   0x1   :  { %7559 = sst [smem:[#allocation29_spill]] %s7548_s1 }
   0x2   :  { %7560 = sst [smem:[#allocation30_spill]] %s7549_s2 }
   0x3   :  { %7561 = sst [smem:[#allocation31_spill]] %s7550_s3 }
   0x4   :  { %7562 = sst [smem:[#allocation32_spill]] %s7551_s4 }
   0x5   :  { %7563 = sst [smem:[#allocation33_spill]] %s7552_s5 }
   0x6   :  { %7564 = sst [smem:[#allocation34_spill]] %s7553_s6 }
   0x7   :  { %7565 = sst [smem:[#allocation35_spill]] %s7554_s7 }
   0x8   :  { %13 = vsyncpa [#allocation3], 0 }
   0x9   :  { %15 = vsyncpa [#allocation3 + $0x1], 0 }
   0xa   :  { %16 = vsyncpa [#allocation6], 0 }
   0xb   :  { %17 = vsyncpa [#allocation9], 0 }
   0xc   :  { %18 = vsyncpa [#allocation4], 0 }
   0xd   :  { %20 = vsyncpa [#allocation4 + $0x1], 0 }
   0xe   :  { %21 = vsyncpa [#allocation13], 0 }
   0xf   :  { %23 = vsyncpa [#allocation13 + $0x1], 0  ;;  %s7163_s24 = smov 0   ;;  %s7165_s25 = smov 0  }
  0x10   :  { %s7167_s26 = smov 0   ;;  %s7169_s27 = smov 0  }
  0x11   :  { %s7171_s28 = smov 0   ;;  %s7173_s29 = smov 0  }
  0x12   :  { %s7175_s30 = smov 0   ;;  %s7177_s8 = smov 0  }
  0x13 LB: > { %7566 = sst [smem:[#allocation26_spill]] %s7063_s24  ;;  %s7204_s9 = sadd.s32 4294967295, %s7091_s8   ;;  %s7091_s8 = sphi %s7177_s8, %s29_s8   ;;  %s7087_s30 = sphi %s7175_s30, %s7592_s30   ;;  %s7083_s29 = sphi %s7173_s29, %s7591_s29   ;;  %s7079_s28 = sphi %s7171_s28, %s7590_s28   ;;  %s7075_s27 = sphi %s7169_s27, %s7589_s27   ;;  %s7071_s26 = sphi %s7167_s26, %s7588_s26   ;;  %s7067_s25 = sphi %s7165_s25, %s7587_s25   ;;  %s7063_s24 = sphi %s7163_s24, %s7586_s24  }
  0x14   : > { %s7555_s10 = sadd.s32 4294967294, %s7091_s8   ;;  %p63_p0 = scmp.ne.s32.totalorder %s7067_s25, %s7063_s24 }
  0x15   : > { %p64_p1 = scmp.eq.s32.totalorder %s7204_s9, 0  ;;  %p173_p2 = scmp.eq.s32.totalorder %s7204_s9, 3 }
  0x16   : > { %p179_p3 = scmp.eq.s32.totalorder %s7555_s10, 3  ;;  %p4638_p5 = scmp.ge.s32.totalorder %s7091_s8, 1 }
  0x17   : > { %p7215_p4 = por %p64_p1, %p63_p0  ;;  %p242_p7 = scmp.lt.s32.totalorder %s7091_s8, 5 }
  0x18   : > { %p7220_p6 = por %p179_p3, %p63_p0  ;;  %s7570_s1 = sld [smem:[#allocation29_spill]] }
  0x19   : > { %p7228_p8 = pnand %p4638_p5, %p242_p7  ;;  %s7093_s17 = smov [#allocation5]  }
  0x1a   : > { %s7568_s12 = scalar_select %p7220_p6, 1, 0 }
  0x1b   : > { %p6722_p9 = pneg %p7228_p8  ;;  %s256_s18 = sshll.u32 %s7093_s17, 4  ;;  %s257_s18 = int_to_ptr.vmem [resolvable:$true] %s256_s18 }
  0x1c   : > { %7569 = sst [smem:[#allocation27_spill]] %s7568_s12  ;;  %s7094_s23 = smov [#allocation8]  }
  0x1d   : > { %p7236_p10 = pnand %p6722_p9, %p64_p1  ;;  %s7573_s3 = sld [smem:[#allocation31_spill]] }
  0x1e   : > { %s254_s15 = sshll.u32 %s7570_s1, 4  ;;  %s281_s13 = sshll.u32 %s7094_s23, 4  ;;  %s255_s15 = int_to_ptr.hbm [resolvable:$true] %s254_s15  ;;  %s282_s13 = int_to_ptr.vmem [resolvable:$true] %s281_s13 }
  0x1f   : > { %6725 = dma.hbm_to_vmem [thread:$0]  (!%p7236_p10), %s255_s15, 64, %s257_s18, [#allocation6]  }
  0x20   : > { %s7574_s2 = sld [smem:[#allocation30_spill]]  ;;  %s7095_s1 = smov 256  }
  0x21   : > { %s7096_s20 = smov 16   ;;  %s7575_s4 = sld [smem:[#allocation32_spill]] }
  0x22   : > { %s7097_s23 = smov [#allocation7]   ;;  %s7098_s17 = smov [#allocation10]  }
  0x23   : > { %s279_s22 = sshll.u32 %s7573_s3, 4  ;;  %s267_s14 = sshll.u32 %s7097_s23, 4  ;;  %s280_s22 = int_to_ptr.hbm [resolvable:$true] %s279_s22  ;;  %s268_s14 = int_to_ptr.vmem [resolvable:$true] %s267_s14 }
  0x24   : > { %6731 = dma.hbm_to_vmem [thread:$0]  (!%p7236_p10), %s280_s22, 16384, %s282_s13, [#allocation9], %s7095_s1, %s7095_s1, %s7096_s20  }
  0x25   : > { %s38_s22 = sadd.s32 1, %s7083_s29  ;;  %s41_s13 = sadd.s32 1, %s7087_s30 }
  0x26   : > { %s265_s10 = sshll.u32 %s7574_s2, 4  ;;  %s295_s2 = sshll.u32 %s7098_s17, 4  ;;  %s266_s10 = int_to_ptr.hbm [resolvable:$true] %s265_s10  ;;  %s296_s2 = int_to_ptr.vmem [resolvable:$true] %s295_s2 }
  0x27   : > { %s293_s18 = sshll.u32 %s7575_s4, 4  ;;  %p39_p11 = scmp.ge.s32.totalorder %s38_s22, 2  ;;  %s294_s18 = int_to_ptr.hbm [resolvable:$true] %s293_s18 }
  0x28   : > { %6728 = dma.hbm_to_vmem [thread:$0]  (!%p7236_p10), %s266_s10, 16384, %s268_s14, [#allocation6], %s7095_s1, %s7095_s1, %s7096_s20  }
  0x29   : > { %6734 = dma.hbm_to_vmem [thread:$0]  (!%p7236_p10), %s294_s18, 16384, %s296_s2, [#allocation9], %s7095_s1, %s7095_s1, %s7096_s20  }
  0x2a   : > { %s50_s21 = sadd.s32 1, %s7071_s26  ;;  %p57_p12 = scmp.ne.s32.totalorder %s7071_s26, %s7067_s25 }
  0x2b   : > { %p58_p13 = scmp.eq.s32.totalorder %s7091_s8, 0  ;;  %s7594_s22 = smov (%p39_p11, %s38_s22), 0 }
  0x2c   : > { %7576 = sst [smem:[#allocation28_spill]] %s7594_s22  ;;  %s7596_s13 = smov (!%p39_p11, %s41_s13), %s7087_s30 }
  0x2d   : > { %s46_s10 = ssub.s32 %s7083_s29, %s7594_s22  ;;  %p7268_p0 = por %p58_p13, %p57_p12 }
  0x2e   : > { %p43_p3 = scmp.ge.s32.totalorder %s7596_s13, 2  ;;  %p7274_p5 = por %p173_p2, %p57_p12 }
  0x2f   : > { %p6753_p7 = scmp.lt.s32.totalorder %s7091_s8, 4  ;;  %s309_s2 = sand.u32 1, %s7071_s26  }
  0x30   : > { %s7598_s13 = smov (%p43_p3, %s7596_s13), 0  ;;  %s4644_s19 = sshll.u32 %s309_s2, 6 }
  0x31   : > { %s45_s20 = ssub.s32 %s7087_s30, %s7598_s13  ;;  %s6226_s23 = sshll.u32 %s7083_s29, 3 }
  0x32   : > { %s47_s18 = sor.u32 %s46_s10, %s45_s20  ;;  %s4647_s14 = sshll.u32 %s7087_s30, 4 }
  0x33   : > { %p48_p9 = scmp.eq.s32.totalorder %s47_s18, 0  ;;  %s319_s17 = sadd.s32 %s6226_s23, %s4647_s14 }
  0x34   : > { %s313_s3 = scalar_lea.vmem [#allocation2], %s4644_s19  ;;  %s4648_s12 = sshll.u32 %s319_s17, 3 }
  0x35   : > { %s324_s4 = sshll.u32 %s313_s3, 4  ;;  %s321_s6 = scalar_lea.hbm %s7547_s0, %s4648_s12  ;;  %s325_s4 = int_to_ptr.vmem [resolvable:$true] %s324_s4 }
  0x36   : > { %s7287_s22 = scalar_select %p48_p9, %s7071_s26, %s50_s21  }
  0x37   : > { %p6736_p2 = pnand %p6753_p7, %p7268_p0  ;;  %s322_s5 = sshll.u32 %s321_s6, 4  ;;  %s323_s5 = int_to_ptr.hbm [resolvable:$true] %s322_s5 }
  0x38   : > { %s310_s10 = scalar_lea.sflag [#allocation3], %s309_s2  ;;  %s7099_s20 = smov 512  }
  0x39   : > { %s7100_s18 = smov 32   ;;  %336 = sbr.rel (%p7228_p8) target bundleno = 729 (0x2d9), region = 40 }
  0x3a   : > { %6738 = dma.hbm_to_vmem [thread:$0]  (!%p6736_p2), %s323_s5, 1024, %s325_s4, %s310_s10, %s7099_s20, %s7099_s20, %s7100_s18  }
  0x3b   : > { %s7299_s3 = sand.u32 (!%p7228_p8), 1, %s7067_s25  }
  0x3c   : > { %s4650_s7 = sshll.u32 (!%p7228_p8), %s7299_s3, 6  ;;  %s339_s24 = scalar_lea.sflag (!%p7228_p8), [#allocation3], %s7299_s3 }
  0x3d   : > { %s342_s12 = scalar_lea.vmem (!%p7228_p8), [#allocation2], %s4650_s7 }
  0x3e   : > { %7042 = dma.done.wait (%p7215_p4), %s339_s24, 1024  }
  0x3f   : > { %7044 = vsyncadd (%p7215_p4), %s339_s24, 4294966272 }
  0x40   : > { %7046 = dma.done.wait (%p64_p1), [#allocation6], 16448  }
  0x41   : > { %7048 = vsyncadd (%p64_p1), [#allocation6], 4294950848 }
  0x42   : > { %7050 = dma.done.wait (%p64_p1), [#allocation9], 32768  }
  0x43   : > { %7052 = vsyncadd (%p64_p1), [#allocation9], 4294934528  ;;  %v7315_v0 = vld [vmem:[%s342_s12] sm:$0xff]  ;;  %v7317_v1 = vld [vmem:[%s342_s12 + $0x8] sm:$0xff]  ;;  %s7395_s4 = sshll.u32 %s7299_s3, 5  ;;  %s4309_s16 = sand.u32 1, %s7204_s9  }
  0x44   : > { %v7319_v2 = vld [vmem:[%s342_s12 + $0x10] sm:$0xff]  ;;  %v7321_v3 = vld [vmem:[%s342_s12 + $0x18] sm:$0xff]  ;;  %v417_v4 = vmul.f32 %v7315_v0, %v7315_v0  ;;  %v418_v5 = vmul.f32 %v7317_v1, %v7317_v1  ;;  %v7329_v7 = vld [vmem:[%s342_s12 + $0x20] sm:$0xff]  ;;  %s7402_s5 = scalar_lea.vmem [#allocation11], %s7395_s4  ;;  %s7412_s6 = scalar_lea.vmem [#allocation12], %s7395_s4 }
  0x45   : > { %v419_v6 = vmul.f32 %v7319_v2, %v7319_v2  ;;  %v7331_v8 = vld [vmem:[%s342_s12 + $0x28] sm:$0xff]  ;;  %v7333_v9 = vld [vmem:[%s342_s12 + $0x30] sm:$0xff]  ;;  %v421_v10 = vmul.f32 %v7329_v7, %v7329_v7  ;;  %v4688_v12 = vld [vmem:[#allocation7 + $0xe0] sm:$0xf]  ;;  %v420_v13 = vmul.f32 %v7321_v3, %v7321_v3  ;;  %s7416_s11 = scalar_lea.vmem [#allocation14], %s7395_s4  ;;  %s4305_s21 = scalar_lea.sflag [#allocation4], %s7299_s3 }
  0x46   : > { %v422_v11 = vmul.f32 %v7331_v8, %v7331_v8  ;;  %v425_v14 = vadd.f32 %v418_v5, %v417_v4  ;;  %v6234_v15 = vld [vmem:[#allocation7 + $0xec] sm:$0xf0]  ;;  %v4720_v16 = vld [vmem:[#allocation7 + $0x1e0] sm:$0xf]  ;;  %v7341_v18 = vld [vmem:[%s342_s12 + $0x38] sm:$0xff]  ;;  %v423_v25 = vmul.f32 %v7333_v9, %v7333_v9  ;;  %s7452_s15 = scalar_lea.sflag [#allocation13], %s4309_s16 }
  0x47   : > { %v6242_v17 = vld [vmem:[#allocation7 + $0x1ec] sm:$0xf0]  ;;  %v4689_v19 = vor.u32 %v6234_v15, %v4688_v12  ;;  %v4752_v21 = vld [vmem:[#allocation7 + $0x2e0] sm:$0xf]  ;;  %v424_v46 = vmul.f32 %v7341_v18, %v7341_v18 }
  0x48   : > { %v4721_v20 = vor.u32 %v6242_v17, %v4720_v16  ;;  %v6250_v22 = vld [vmem:[#allocation7 + $0x2ec] sm:$0xf0]  ;;  %v4784_v23 = vld [vmem:[#allocation7 + $0x3e0] sm:$0xf]  ;;  %v426_v24 = vadd.f32 %v425_v14, %v419_v6  ;;  %v430_v26 = vadd.f32 %v422_v11, %v421_v10 }
  0x49   : > { %v4753_v27 = vor.u32 %v6250_v22, %v4752_v21  ;;  %v6258_v28 = vld [vmem:[#allocation7 + $0x3ec] sm:$0xf0]  ;;  %v4684_v29 = vld [vmem:[#allocation7 + $0xc0] sm:$0xf]  ;;  %751 = vmatpush.bf16.msra.mxu0 %v4689_v19 }
  0x4a   : > { %v6233_v30 = vld [vmem:[#allocation7 + $0xcc] sm:$0xf0]  ;;  %765 = vmatpush.bf16.msra.mxu1 %v4721_v20  ;;  %v4785_v31 = vor.u32 %v6258_v28, %v4784_v23  ;;  %v4716_v33 = vld [vmem:[#allocation7 + $0x1c0] sm:$0xf]  ;;  %v427_v36 = vadd.f32 %v426_v24, %v420_v13  ;;  %v431_v47 = vadd.f32 %v430_v26, %v423_v25 }
  0x4b   : > { %v4685_v32 = vor.u32 %v6233_v30, %v4684_v29  ;;  %v6241_v34 = vld [vmem:[#allocation7 + $0x1cc] sm:$0xf0]  ;;  %v4748_v35 = vld [vmem:[#allocation7 + $0x2c0] sm:$0xf]  ;;  %779 = vmatpush.bf16.msra.mxu2 %v4753_v27 }
  0x4c   : > { %v4717_v37 = vor.u32 %v6241_v34, %v4716_v33  ;;  %v6249_v38 = vld [vmem:[#allocation7 + $0x2cc] sm:$0xf0]  ;;  %v4780_v39 = vld [vmem:[#allocation7 + $0x3c0] sm:$0xf]  ;;  %793 = vmatpush.bf16.msra.mxu3 %v4785_v31  ;;  %428 = vadd.xlane.f32.xlu0 %v427_v36  ;;  %v432_v63 = vadd.f32 %v431_v47, %v424_v46 }
  0x4d   : > { %v6257_v40 = vld [vmem:[#allocation7 + $0x3cc] sm:$0xf0]  ;;  %v4749_v41 = vor.u32 %v6249_v38, %v4748_v35  ;;  %v4680_v43 = vld [vmem:[#allocation7 + $0xa0] sm:$0xf]  ;;  %752 = vmatpush.bf16.msra.mxu0 %v4685_v32 }
  0x4e   : > { %v4781_v42 = vor.u32 %v6257_v40, %v4780_v39  ;;  %v6232_v44 = vld [vmem:[#allocation7 + $0xac] sm:$0xf0]  ;;  %v4712_v45 = vld [vmem:[#allocation7 + $0x1a0] sm:$0xf]  ;;  %766 = vmatpush.bf16.msra.mxu1 %v4717_v37 }
  0x4f   : > { %v6240_v48 = vld [vmem:[#allocation7 + $0x1ac] sm:$0xf0]  ;;  %v4744_v49 = vld [vmem:[#allocation7 + $0x2a0] sm:$0xf]  ;;  %v4681_v51 = vor.u32 %v6232_v44, %v4680_v43  ;;  %780 = vmatpush.bf16.msra.mxu2 %v4749_v41 }
  0x50   : > { %v6248_v50 = vld [vmem:[#allocation7 + $0x2ac] sm:$0xf0]  ;;  %v4713_v52 = vor.u32 %v6240_v48, %v4712_v45  ;;  %v4776_v53 = vld [vmem:[#allocation7 + $0x3a0] sm:$0xf]  ;;  %794 = vmatpush.bf16.msra.mxu3 %v4781_v42 }
  0x51   : > { %v6256_v54 = vld [vmem:[#allocation7 + $0x3ac] sm:$0xf0]  ;;  %v4676_v55 = vld [vmem:[#allocation7 + $0x80] sm:$0xf]  ;;  %v4745_v56 = vor.u32 %v6248_v50, %v4744_v49  ;;  %753 = vmatpush.bf16.msra.mxu0 %v4681_v51  ;;  %v7101_v49 = vmov 512.0  }
  0x52   : > { %v6231_v57 = vld [vmem:[#allocation7 + $0x8c] sm:$0xf0]  ;;  %v4708_v58 = vld [vmem:[#allocation7 + $0x180] sm:$0xf]  ;;  %v4777_v60 = vor.u32 %v6256_v54, %v4776_v53  ;;  %767 = vmatpush.bf16.msra.mxu1 %v4713_v52  ;;  %6853 = vrcp.f32 %v7101_v49 }
  0x53   : > { %v6239_v59 = vld [vmem:[#allocation7 + $0x18c] sm:$0xf0]  ;;  %v4740_v61 = vld [vmem:[#allocation7 + $0x280] sm:$0xf]  ;;  %v4677_v6 = vor.u32 %v6231_v57, %v4676_v55  ;;  %781 = vmatpush.bf16.msra.mxu2 %v4745_v56 }
  0x54   : > { %v6247_v62 = vld [vmem:[#allocation7 + $0x28c] sm:$0xf0]  ;;  %v4772_v4 = vld [vmem:[#allocation7 + $0x380] sm:$0xf]  ;;  %v4709_v10 = vor.u32 %v6239_v59, %v4708_v58  ;;  %795 = vmatpush.bf16.msra.mxu3 %v4777_v60  ;;  %433 = vadd.xlane.f32.xlu0 %v432_v63 }
  0x55   : > { %v6255_v5 = vld [vmem:[#allocation7 + $0x38c] sm:$0xf0]  ;;  %v4672_v11 = vld [vmem:[#allocation7 + $0x60] sm:$0xf]  ;;  %v4741_v12 = vor.u32 %v6247_v62, %v4740_v61  ;;  %754 = vmatpush.bf16.msra.mxu0 %v4677_v6 }
  0x56   : > { %v6230_v13 = vld [vmem:[#allocation7 + $0x6c] sm:$0xf0]  ;;  %v4704_v14 = vld [vmem:[#allocation7 + $0x160] sm:$0xf]  ;;  %v4773_v16 = vor.u32 %v6255_v5, %v4772_v4  ;;  %768 = vmatpush.bf16.msra.mxu1 %v4709_v10 }
  0x57   : > { %v6238_v15 = vld [vmem:[#allocation7 + $0x16c] sm:$0xf0]  ;;  %v4736_v17 = vld [vmem:[#allocation7 + $0x260] sm:$0xf]  ;;  %v4673_v22 = vor.u32 %v6230_v13, %v4672_v11  ;;  %782 = vmatpush.bf16.msra.mxu2 %v4741_v12 }
  0x58   : > { %v6246_v19 = vld [vmem:[#allocation7 + $0x26c] sm:$0xf0]  ;;  %v4768_v20 = vld [vmem:[#allocation7 + $0x360] sm:$0xf]  ;;  %v4705_v23 = vor.u32 %v6238_v15, %v4704_v14  ;;  %796 = vmatpush.bf16.msra.mxu3 %v4773_v16  ;;  %v7347_v15 = vpop.eup %6853 }
  0x59   : > { %v6254_v21 = vld [vmem:[#allocation7 + $0x36c] sm:$0xf0]  ;;  %v4668_v24 = vld [vmem:[#allocation7 + $0x40] sm:$0xf]  ;;  %v4737_v25 = vor.u32 %v6246_v19, %v4736_v17  ;;  %755 = vmatpush.bf16.msra.mxu0 %v4673_v22  ;;  %vm440_vm0 = vweird.f32 %v7347_v15 }
  0x5a   : > { %v6229_v26 = vld [vmem:[#allocation7 + $0x4c] sm:$0xf0]  ;;  %v4700_v27 = vld [vmem:[#allocation7 + $0x140] sm:$0xf]  ;;  %v4769_v29 = vor.u32 %v6254_v21, %v4768_v20  ;;  %769 = vmatpush.bf16.msra.mxu1 %v4705_v23 }
  0x5b   : > { %v6237_v28 = vld [vmem:[#allocation7 + $0x14c] sm:$0xf0]  ;;  %v4732_v30 = vld [vmem:[#allocation7 + $0x240] sm:$0xf]  ;;  %v4669_v34 = vor.u32 %v6229_v26, %v4668_v24  ;;  %783 = vmatpush.bf16.msra.mxu2 %v4737_v25 }
  0x5c   : > { %v6245_v31 = vld [vmem:[#allocation7 + $0x24c] sm:$0xf0]  ;;  %v4764_v32 = vld [vmem:[#allocation7 + $0x340] sm:$0xf]  ;;  %v4701_v35 = vor.u32 %v6237_v28, %v4700_v27  ;;  %797 = vmatpush.bf16.msra.mxu3 %v4769_v29 }
  0x5d   : > { %v6253_v33 = vld [vmem:[#allocation7 + $0x34c] sm:$0xf0]  ;;  %v4733_v36 = vor.u32 %v6245_v31, %v4732_v30  ;;  %756 = vmatpush.bf16.msra.mxu0 %v4669_v34  ;;  %v4664_v38 = vld [vmem:[#allocation7 + $0x20] sm:$0xf]  ;;  %v436_v30 = vmul.f32 512.0, %v7347_v15 }
  0x5e   : > { %v4765_v37 = vor.u32 %v6253_v33, %v4764_v32  ;;  %770 = vmatpush.bf16.msra.mxu1 %v4701_v35  ;;  %v6228_v39 = vld [vmem:[#allocation7 + $0x2c] sm:$0xf0]  ;;  %v4696_v40 = vld [vmem:[#allocation7 + $0x120] sm:$0xf] }
  0x5f   : > { %784 = vmatpush.bf16.msra.mxu2 %v4733_v36  ;;  %v4665_v41 = vor.u32 %v6228_v39, %v4664_v38  ;;  %v6236_v42 = vld [vmem:[#allocation7 + $0x12c] sm:$0xf0]  ;;  %v4728_v43 = vld [vmem:[#allocation7 + $0x220] sm:$0xf] }
  0x60   : > { %798 = vmatpush.bf16.msra.mxu3 %v4765_v37  ;;  %v6244_v44 = vld [vmem:[#allocation7 + $0x22c] sm:$0xf0]  ;;  %v4697_v45 = vor.u32 %v6236_v42, %v4696_v40  ;;  %v4760_v47 = vld [vmem:[#allocation7 + $0x320] sm:$0xf] }
  0x61   : > { %v4729_v46 = vor.u32 %v6244_v44, %v4728_v43  ;;  %v6252_v48 = vld [vmem:[#allocation7 + $0x32c] sm:$0xf0]  ;;  %757 = vmatpush.bf16.msra.mxu0 %v4665_v41  ;;  %v4660_v51 = vld [vmem:[#allocation7] sm:$0xf]  ;;  %v437_v44 = vsub.f32 1.0, %v436_v30 }
  0x62   : > { %v4761_v50 = vor.u32 %v6252_v48, %v4760_v47  ;;  %771 = vmatpush.bf16.msra.mxu1 %v4697_v45  ;;  %v6227_v52 = vld [vmem:[#allocation7 + $0xc] sm:$0xf0]  ;;  %v4692_v53 = vld [vmem:[#allocation7 + $0x100] sm:$0xf] }
  0x63   : > { %785 = vmatpush.bf16.msra.mxu2 %v4729_v46  ;;  %v4661_v54 = vor.u32 %v6227_v52, %v4660_v51  ;;  %v6235_v55 = vld [vmem:[#allocation7 + $0x10c] sm:$0xf0]  ;;  %v4724_v56 = vld [vmem:[#allocation7 + $0x200] sm:$0xf] }
  0x64   : > { %799 = vmatpush.bf16.msra.mxu3 %v4761_v50  ;;  %v6243_v57 = vld [vmem:[#allocation7 + $0x20c] sm:$0xf0]  ;;  %v4693_v58 = vor.u32 %v6235_v55, %v4692_v53  ;;  %v4756_v60 = vld [vmem:[#allocation7 + $0x300] sm:$0xf] }
  0x65   : > { %v4725_v59 = vor.u32 %v6243_v57, %v4724_v56  ;;  %v6251_v61 = vld [vmem:[#allocation7 + $0x30c] sm:$0xf0]  ;;  %v4816_v62 = vld [vmem:[#allocation8 + $0xe0] sm:$0xf]  ;;  %758 = vmatpush.bf16.msra.mxu0 %v4661_v54 }
  0x66   : > { %v4757_v63 = vor.u32 %v6251_v61, %v4756_v60  ;;  %v6266_v4 = vld [vmem:[#allocation8 + $0xec] sm:$0xf0]  ;;  %v4848_v5 = vld [vmem:[#allocation8 + $0x1e0] sm:$0xf]  ;;  %772 = vmatpush.bf16.msra.mxu1 %v4693_v58  ;;  %v438_v61 = vmul.f32 %v7347_v15, %v437_v44 }
  0x67   : > { %v6274_v6 = vld [vmem:[#allocation8 + $0x1ec] sm:$0xf0]  ;;  %786 = vmatpush.bf16.msra.mxu2 %v4725_v59  ;;  %v4817_v10 = vor.u32 %v6266_v4, %v4816_v62  ;;  %v4880_v12 = vld [vmem:[#allocation8 + $0x2e0] sm:$0xf] }
  0x68   : > { %v4849_v11 = vor.u32 %v6274_v6, %v4848_v5  ;;  %v6282_v13 = vld [vmem:[#allocation8 + $0x2ec] sm:$0xf0]  ;;  %v4912_v14 = vld [vmem:[#allocation8 + $0x3e0] sm:$0xf]  ;;  %800 = vmatpush.bf16.msra.mxu3 %v4757_v63 }
  0x69   : > { %v4881_v16 = vor.u32 %v6282_v13, %v4880_v12  ;;  %v6290_v17 = vld [vmem:[#allocation8 + $0x3ec] sm:$0xf0]  ;;  %v4812_v19 = vld [vmem:[#allocation8 + $0xc0] sm:$0xf]  ;;  %1069 = vmatpush.bf16.msrb.mxu0 %v4817_v10 }
  0x6a   : > { %v6265_v20 = vld [vmem:[#allocation8 + $0xcc] sm:$0xf0]  ;;  %1083 = vmatpush.bf16.msrb.mxu1 %v4849_v11  ;;  %v4913_v21 = vor.u32 %v6290_v17, %v4912_v14  ;;  %v4844_v23 = vld [vmem:[#allocation8 + $0x1c0] sm:$0xf] }
  0x6b   : > { %v4813_v22 = vor.u32 %v6265_v20, %v4812_v19  ;;  %v6273_v24 = vld [vmem:[#allocation8 + $0x1cc] sm:$0xf0]  ;;  %v4876_v25 = vld [vmem:[#allocation8 + $0x2c0] sm:$0xf]  ;;  %1097 = vmatpush.bf16.msrb.mxu2 %v4881_v16  ;;  %v439_v19 = vadd.f32 %v7347_v15, %v438_v61 }
  0x6c   : > { %v4845_v26 = vor.u32 %v6273_v24, %v4844_v23  ;;  %v6281_v27 = vld [vmem:[#allocation8 + $0x2cc] sm:$0xf0]  ;;  %v4908_v28 = vld [vmem:[#allocation8 + $0x3c0] sm:$0xf]  ;;  %1111 = vmatpush.bf16.msrb.mxu3 %v4913_v21 }
  0x6d   : > { %v6289_v29 = vld [vmem:[#allocation8 + $0x3cc] sm:$0xf0]  ;;  %v4877_v31 = vor.u32 %v6281_v27, %v4876_v25  ;;  %v4808_v33 = vld [vmem:[#allocation8 + $0xa0] sm:$0xf]  ;;  %1070 = vmatpush.bf16.msrb.mxu0 %v4813_v22 }
  0x6e   : > { %v4909_v32 = vor.u32 %v6289_v29, %v4908_v28  ;;  %v6264_v34 = vld [vmem:[#allocation8 + $0xac] sm:$0xf0]  ;;  %v4840_v35 = vld [vmem:[#allocation8 + $0x1a0] sm:$0xf]  ;;  %1084 = vmatpush.bf16.msrb.mxu1 %v4845_v26 }
  0x6f   : > { %v4809_v36 = vor.u32 %v6264_v34, %v4808_v33  ;;  %v6272_v37 = vld [vmem:[#allocation8 + $0x1ac] sm:$0xf0]  ;;  %v4872_v38 = vld [vmem:[#allocation8 + $0x2a0] sm:$0xf]  ;;  %1098 = vmatpush.bf16.msrb.mxu2 %v4877_v31 }
  0x70   : > { %v6280_v39 = vld [vmem:[#allocation8 + $0x2ac] sm:$0xf0]  ;;  %v4841_v40 = vor.u32 %v6272_v37, %v4840_v35  ;;  %v4904_v42 = vld [vmem:[#allocation8 + $0x3a0] sm:$0xf]  ;;  %1112 = vmatpush.bf16.msrb.mxu3 %v4909_v32  ;;  %v441_v32 = vsel %vm440_vm0, %v7347_v15, %v439_v19 }
  0x71   : > { %v4873_v41 = vor.u32 %v6280_v39, %v4872_v38  ;;  %v6288_v43 = vld [vmem:[#allocation8 + $0x3ac] sm:$0xf0]  ;;  %v4804_v46 = vld [vmem:[#allocation8 + $0x80] sm:$0xf]  ;;  %1071 = vmatpush.bf16.msrb.mxu0 %v4809_v36 }
  0x72   : > { %v4905_v45 = vor.u32 %v6288_v43, %v4904_v42  ;;  %v6263_v47 = vld [vmem:[#allocation8 + $0x8c] sm:$0xf0]  ;;  %v4836_v48 = vld [vmem:[#allocation8 + $0x180] sm:$0xf]  ;;  %1085 = vmatpush.bf16.msrb.mxu1 %v4841_v40 }
  0x73   : > { %v4805_v49 = vor.u32 %v6263_v47, %v4804_v46  ;;  %v6271_v50 = vld [vmem:[#allocation8 + $0x18c] sm:$0xf0]  ;;  %v4868_v51 = vld [vmem:[#allocation8 + $0x280] sm:$0xf]  ;;  %1099 = vmatpush.bf16.msrb.mxu2 %v4873_v41 }
  0x74   : > { %v6279_v52 = vld [vmem:[#allocation8 + $0x28c] sm:$0xf0]  ;;  %v4837_v53 = vor.u32 %v6271_v50, %v4836_v48  ;;  %v4900_v55 = vld [vmem:[#allocation8 + $0x380] sm:$0xf]  ;;  %1113 = vmatpush.bf16.msrb.mxu3 %v4905_v45 }
  0x75   : > { %v4869_v54 = vor.u32 %v6279_v52, %v4868_v51  ;;  %v6287_v56 = vld [vmem:[#allocation8 + $0x38c] sm:$0xf0]  ;;  %v4800_v58 = vld [vmem:[#allocation8 + $0x60] sm:$0xf]  ;;  %1072 = vmatpush.bf16.msrb.mxu0 %v4805_v49 }
  0x76   : > { %v4901_v57 = vor.u32 %v6287_v56, %v4900_v55  ;;  %v6262_v59 = vld [vmem:[#allocation8 + $0x6c] sm:$0xf0]  ;;  %v4832_v60 = vld [vmem:[#allocation8 + $0x160] sm:$0xf]  ;;  %1086 = vmatpush.bf16.msrb.mxu1 %v4837_v53 }
  0x77   : > { %v4801_v62 = vor.u32 %v6262_v59, %v4800_v58  ;;  %v6270_v63 = vld [vmem:[#allocation8 + $0x16c] sm:$0xf0]  ;;  %v4864_v4 = vld [vmem:[#allocation8 + $0x260] sm:$0xf]  ;;  %1100 = vmatpush.bf16.msrb.mxu2 %v4869_v54 }
  0x78   : > { %v6278_v5 = vld [vmem:[#allocation8 + $0x26c] sm:$0xf0]  ;;  %v4833_v6 = vor.u32 %v6270_v63, %v4832_v60  ;;  %v4896_v11 = vld [vmem:[#allocation8 + $0x360] sm:$0xf]  ;;  %1114 = vmatpush.bf16.msrb.mxu3 %v4901_v57 }
  0x79   : > { %v4865_v10 = vor.u32 %v6278_v5, %v4864_v4  ;;  %v6286_v12 = vld [vmem:[#allocation8 + $0x36c] sm:$0xf0]  ;;  %v4796_v14 = vld [vmem:[#allocation8 + $0x40] sm:$0xf]  ;;  %1073 = vmatpush.bf16.msrb.mxu0 %v4801_v62 }
  0x7a   : > { %v4897_v13 = vor.u32 %v6286_v12, %v4896_v11  ;;  %v6261_v16 = vld [vmem:[#allocation8 + $0x4c] sm:$0xf0]  ;;  %v4828_v17 = vld [vmem:[#allocation8 + $0x140] sm:$0xf]  ;;  %1087 = vmatpush.bf16.msrb.mxu1 %v4833_v6  ;;  %v416_v11 = vld [vmem:[#allocation5] sm:$0xf] }
  0x7b   : > { %v4797_v20 = vor.u32 %v6261_v16, %v4796_v14  ;;  %v6269_v21 = vld [vmem:[#allocation8 + $0x14c] sm:$0xf0]  ;;  %v4860_v22 = vld [vmem:[#allocation8 + $0x240] sm:$0xf]  ;;  %1101 = vmatpush.bf16.msrb.mxu2 %v4865_v10  ;;  %v475_v14 = vperm.slane %v416_v11, 0  ;;  %v476_v16 = vperm.slane %v416_v11, 1 }
  0x7c   : > { %v6277_v23 = vld [vmem:[#allocation8 + $0x24c] sm:$0xf0]  ;;  %v4829_v24 = vor.u32 %v6269_v21, %v4828_v17  ;;  %v4892_v26 = vld [vmem:[#allocation8 + $0x340] sm:$0xf]  ;;  %1115 = vmatpush.bf16.msrb.mxu3 %v4897_v13  ;;  %v477_v19 = vperm.slane %v416_v11, 2 }
  0x7d   : > { %v4861_v25 = vor.u32 %v6277_v23, %v4860_v22  ;;  %v6285_v27 = vld [vmem:[#allocation8 + $0x34c] sm:$0xf0]  ;;  %v4792_v29 = vld [vmem:[#allocation8 + $0x20] sm:$0xf]  ;;  %1074 = vmatpush.bf16.msrb.mxu0 %v4797_v20  ;;  %v478_v20 = vperm.slane %v416_v11, 3 }
  0x7e   : > { %v4893_v28 = vor.u32 %v6285_v27, %v4892_v26  ;;  %v6260_v30 = vld [vmem:[#allocation8 + $0x2c] sm:$0xf0]  ;;  %v4824_v31 = vld [vmem:[#allocation8 + $0x120] sm:$0xf]  ;;  %1088 = vmatpush.bf16.msrb.mxu1 %v4829_v24 }
  0x7f   : > { %v4793_v33 = vor.u32 %v6260_v30, %v4792_v29  ;;  %v6268_v34 = vld [vmem:[#allocation8 + $0x12c] sm:$0xf0]  ;;  %v4856_v35 = vld [vmem:[#allocation8 + $0x220] sm:$0xf]  ;;  %1102 = vmatpush.bf16.msrb.mxu2 %v4861_v25 }
  0x80   : > { %v6276_v36 = vld [vmem:[#allocation8 + $0x22c] sm:$0xf0]  ;;  %v4825_v37 = vor.u32 %v6268_v34, %v4824_v31  ;;  %v4888_v39 = vld [vmem:[#allocation8 + $0x320] sm:$0xf]  ;;  %1116 = vmatpush.bf16.msrb.mxu3 %v4893_v28 }
  0x81   : > { %v4857_v38 = vor.u32 %v6276_v36, %v4856_v35  ;;  %v6284_v40 = vld [vmem:[#allocation8 + $0x32c] sm:$0xf0]  ;;  %v4788_v44 = vld [vmem:[#allocation8] sm:$0xf]  ;;  %1075 = vmatpush.bf16.msrb.mxu0 %v4793_v33 }
  0x82   : > { %v4889_v42 = vor.u32 %v6284_v40, %v4888_v39  ;;  %v6259_v45 = vld [vmem:[#allocation8 + $0xc] sm:$0xf0]  ;;  %v4820_v46 = vld [vmem:[#allocation8 + $0x100] sm:$0xf]  ;;  %1089 = vmatpush.bf16.msrb.mxu1 %v4825_v37 }
  0x83   : > { %v4789_v15 = vor.u32 %v6259_v45, %v4788_v44  ;;  %v6267_v47 = vld [vmem:[#allocation8 + $0x10c] sm:$0xf0]  ;;  %v4852_v48 = vld [vmem:[#allocation8 + $0x200] sm:$0xf]  ;;  %1103 = vmatpush.bf16.msrb.mxu2 %v4857_v38 }
  0x84   : > { %v6275_v49 = vld [vmem:[#allocation8 + $0x20c] sm:$0xf0]  ;;  %v4821_v51 = vor.u32 %v6267_v47, %v4820_v46  ;;  %v4884_v53 = vld [vmem:[#allocation8 + $0x300] sm:$0xf]  ;;  %1117 = vmatpush.bf16.msrb.mxu3 %v4889_v42 }
  0x85   : > { %v4853_v52 = vor.u32 %v6275_v49, %v4852_v48  ;;  %v6283_v54 = vld [vmem:[#allocation8 + $0x30c] sm:$0xf0]  ;;  %1076 = vmatpush.bf16.msrb.mxu0 %v4789_v15  ;;  %v4944_v27 = vld [vmem:[#allocation10 + $0xe0] sm:$0xf] }
  0x86   : > { %v4885_v55 = vor.u32 %v6283_v54, %v4884_v53  ;;  %1090 = vmatpush.bf16.msrb.mxu1 %v4821_v51  ;;  %v6306_v33 = vld [vmem:[#allocation10 + $0x1ec] sm:$0xf0]  ;;  %v4940_v45 = vld [vmem:[#allocation10 + $0xc0] sm:$0xf] }
  0x87   : > { %1104 = vmatpush.bf16.msrb.mxu2 %v4853_v52  ;;  %v6314_v40 = vld [vmem:[#allocation10 + $0x2ec] sm:$0xf0]  ;;  %v4972_v48 = vld [vmem:[#allocation10 + $0x1c0] sm:$0xf] }
  0x88   : > { %1118 = vmatpush.bf16.msrb.mxu3 %v4885_v55  ;;  %v6297_v46 = vld [vmem:[#allocation10 + $0xcc] sm:$0xf0]  ;;  %v5036_v52 = vld [vmem:[#allocation10 + $0x3c0] sm:$0xf] }
  0x89   : > { %v6305_v49 = vld [vmem:[#allocation10 + $0x1cc] sm:$0xf0]  ;;  %v4941_v54 = vor.u32 %v6297_v46, %v4940_v45  ;;  %v4932_v11 = vld [vmem:[#allocation10 + $0x80] sm:$0xf] }
  0x8a   : > { %v6313_v51 = vld [vmem:[#allocation10 + $0x2cc] sm:$0xf0]  ;;  %v4973_v55 = vor.u32 %v6305_v49, %v4972_v48  ;;  %v4920_v45 = vld [vmem:[#allocation10 + $0x20] sm:$0xf] }
  0x8b   : > { %v6321_v53 = vld [vmem:[#allocation10 + $0x3cc] sm:$0xf0]  ;;  %v4952_v48 = vld [vmem:[#allocation10 + $0x120] sm:$0xf] }
  0x8c   : > { %v6292_v46 = vld [vmem:[#allocation10 + $0x2c] sm:$0xf0] }
  0x8d   : > { %v6300_v49 = vld [vmem:[#allocation10 + $0x12c] sm:$0xf0] }
  0xbf   : > { %v429_v41 = vpop.xlane.xlu0 %428 }
  0xc0   : > { %v442_v43 = vmul.f32 %v441_v32, %v429_v41  ;;  %v6322_v41 = vld [vmem:[#allocation10 + $0x3ec] sm:$0xf0] }
  0xc2   : > { %v444_v50 = vadd.f32 1e-05, %v442_v43 }
  0xc4   : > { %6855 = vrsqrt.f32 %v444_v50  ;;  %vm452_vm2 = vweird.f32 %v444_v50 }
  0xc7   : > { %v434_v56 = vpop.xlane.xlu0 %433 }
  0xc8   : > { %v443_v57 = vmul.f32 %v441_v32, %v434_v56  ;;  %v4976_v32 = vld [vmem:[#allocation10 + $0x1e0] sm:$0xf] }
  0xc9   : > { %v4977_v42 = vor.u32 %v6306_v33, %v4976_v32  ;;  %v4936_v56 = vld [vmem:[#allocation10 + $0xa0] sm:$0xf]  ;;  %v6318_v33 = vld [vmem:[#allocation10 + $0x36c] sm:$0xf0] }
  0xca   : > { %v6856_v58 = vpop.eup %6855  ;;  %v445_v59 = vadd.f32 1e-05, %v443_v57  ;;  %v6296_v57 = vld [vmem:[#allocation10 + $0xac] sm:$0xf0]  ;;  %v5024_v32 = vld [vmem:[#allocation10 + $0x360] sm:$0xf] }
  0xcb   : > { %v447_v60 = vmul.f32 %v6856_v58, %v444_v50  ;;  %vm453_vm1 = vweird.f32 %v6856_v58  ;;  %v5004_v50 = vld [vmem:[#allocation10 + $0x2c0] sm:$0xf] }
  0xcc   : > { %6857 = vrsqrt.f32 %v445_v59  ;;  %vm454_vm3 = vmor %vm452_vm2, %vm453_vm1  ;;  %vm462_vm5 = vweird.f32 %v445_v59 }
  0xcd   : > { %v448_v61 = vmul.f32 %v6856_v58, %v447_v60  ;;  %v4968_v60 = vld [vmem:[#allocation10 + $0x1a0] sm:$0xf] }
  0xcf   : > { %v449_v62 = vmul.f32 0.5, %v448_v61  ;;  %v6304_v61 = vld [vmem:[#allocation10 + $0x1ac] sm:$0xf0] }
  0xd1   : > { %v450_v63 = vsub.f32 1.5, %v449_v62  ;;  %v5000_v62 = vld [vmem:[#allocation10 + $0x2a0] sm:$0xf] }
  0xd2   : > { %v6858_v4 = vpop.eup %6857 }
  0xd3   : > { %v451_v5 = vmul.f32 %v6856_v58, %v450_v63  ;;  %v457_v6 = vmul.f32 %v6858_v4, %v445_v59  ;;  %vm463_vm4 = vweird.f32 %v6858_v4  ;;  %v5037_v59 = vor.u32 %v6321_v53, %v5036_v52  ;;  %v6312_v63 = vld [vmem:[#allocation10 + $0x2ac] sm:$0xf0]  ;;  %v5016_v52 = vld [vmem:[#allocation10 + $0x320] sm:$0xf] }
  0xd4   : > { %vm464_vm6 = vmor %vm462_vm5, %vm463_vm4  ;;  %v6316_v53 = vld [vmem:[#allocation10 + $0x32c] sm:$0xf0] }
  0xd5   : > { %v458_v10 = vmul.f32 %v6858_v4, %v457_v6  ;;  %v455_v12 = vsel %vm454_vm3, %v6856_v58, %v451_v5  ;;  %v5005_v58 = vor.u32 %v6313_v51, %v5004_v50  ;;  %v6320_v5 = vld [vmem:[#allocation10 + $0x3ac] sm:$0xf0]  ;;  %v4937_v6 = vor.u32 %v6296_v57, %v4936_v56  ;;  %v4984_v50 = vld [vmem:[#allocation10 + $0x220] sm:$0xf] }
  0xd6   : > { %v466_v21 = vmul.f32 %v455_v12, %v7315_v0  ;;  %v467_v22 = vmul.f32 %v455_v12, %v7317_v1  ;;  %v468_v23 = vmul.f32 %v455_v12, %v7319_v2  ;;  %v469_v24 = vmul.f32 %v455_v12, %v7321_v3  ;;  %v6298_v0 = vld [vmem:[#allocation10 + $0xec] sm:$0xf0]  ;;  %v5008_v3 = vld [vmem:[#allocation10 + $0x2e0] sm:$0xf] }
  0xd7   : > { %v459_v13 = vmul.f32 0.5, %v458_v10  ;;  %v5009_v15 = vor.u32 %v6314_v40, %v5008_v3  ;;  %v4969_v10 = vor.u32 %v6304_v61, %v4968_v60  ;;  %v6295_v12 = vld [vmem:[#allocation10 + $0x8c] sm:$0xf0]  ;;  %v4953_v56 = vor.u32 %v6300_v49, %v4952_v48  ;;  %v5092_v48 = vld [vmem:[#allocation7 + $0x184] sm:$0xf] }
  0xd8   : > { %v483_v1 = vmul.f32 %v475_v14, %v466_v21  ;;  %v484_v34 = vmul.f32 %v476_v16, %v467_v22  ;;  %v485_v2 = vmul.f32 %v477_v19, %v468_v23  ;;  %v486_v35 = vmul.f32 %v478_v20, %v469_v24  ;;  %v5028_v21 = vld [vmem:[#allocation10 + $0x380] sm:$0xf]  ;;  %v6319_v22 = vld [vmem:[#allocation10 + $0x38c] sm:$0xf0]  ;;  %v6335_v49 = vld [vmem:[#allocation7 + $0x190] sm:$0xf0] }
  0xd9   : > { %v460_v17 = vsub.f32 1.5, %v459_v13  ;;  %v5001_v13 = vor.u32 %v6312_v63, %v5000_v62  ;;  %v4933_v23 = vor.u32 %v6295_v12, %v4932_v11  ;;  %v6309_v40 = vld [vmem:[#allocation10 + $0x24c] sm:$0xf0]  ;;  %v5017_v61 = vor.u32 %v6316_v53, %v5016_v52  ;;  %v4980_v62 = vld [vmem:[#allocation10 + $0x200] sm:$0xf] }
  0xda   : > { %v6308_v51 = vld [vmem:[#allocation10 + $0x22c] sm:$0xf0]  ;;  %v5104_v11 = vld [vmem:[#allocation7 + $0x1e4] sm:$0xf]  ;;  %v6338_v12 = vld [vmem:[#allocation7 + $0x1f0] sm:$0xf0] }
  0xdb   : > { %v461_v25 = vmul.f32 %v6858_v4, %v460_v17  ;;  %v6303_v17 = vld [vmem:[#allocation10 + $0x18c] sm:$0xf0]  ;;  %v4985_v60 = vor.u32 %v6308_v51, %v4984_v50  ;;  %v5124_v50 = vld [vmem:[#allocation7 + $0x284] sm:$0xf]  ;;  %v6343_v51 = vld [vmem:[#allocation7 + $0x290] sm:$0xf0] }
  0xdc   : > { %v6291_v57 = vld [vmem:[#allocation10 + $0xc] sm:$0xf0]  ;;  %v5156_v52 = vld [vmem:[#allocation7 + $0x384] sm:$0xf]  ;;  %v6351_v53 = vld [vmem:[#allocation7 + $0x390] sm:$0xf0] }
  0xdd   : > { %v465_v26 = vsel %vm464_vm6, %v6858_v4, %v461_v25  ;;  %v5032_v4 = vld [vmem:[#allocation10 + $0x3a0] sm:$0xf]  ;;  %v6307_v63 = vld [vmem:[#allocation10 + $0x20c] sm:$0xf0] }
  0xde   : > { %v470_v28 = vmul.f32 %v465_v26, %v7329_v7  ;;  %v471_v29 = vmul.f32 %v465_v26, %v7331_v8  ;;  %v472_v30 = vmul.f32 %v465_v26, %v7333_v9  ;;  %v473_v31 = vmul.f32 %v465_v26, %v7341_v18  ;;  %v5040_v7 = vld [vmem:[#allocation10 + $0x3e0] sm:$0xf]  ;;  %v6294_v26 = vld [vmem:[#allocation10 + $0x6c] sm:$0xf0] }
  0xdf   : > { %v4945_v8 = vor.u32 %v6298_v0, %v4944_v27  ;;  %v5041_v47 = vor.u32 %v6322_v41, %v5040_v7  ;;  %v4928_v25 = vld [vmem:[#allocation10 + $0x60] sm:$0xf]  ;;  %v6310_v0 = vld [vmem:[#allocation10 + $0x26c] sm:$0xf0] }
  0xe0   : > { %v487_v36 = vmul.f32 %v475_v14, %v470_v28  ;;  %v488_v37 = vmul.f32 %v476_v16, %v471_v29  ;;  %v489_v38 = vmul.f32 %v477_v19, %v472_v30  ;;  %v490_v39 = vmul.f32 %v478_v20, %v473_v31  ;;  %v4964_v16 = vld [vmem:[#allocation10 + $0x180] sm:$0xf]  ;;  %v6311_v20 = vld [vmem:[#allocation10 + $0x28c] sm:$0xf0] }
  0xe1   : > { %v5033_v14 = vor.u32 %v6320_v5, %v5032_v4  ;;  %v4996_v19 = vld [vmem:[#allocation10 + $0x280] sm:$0xf]  ;;  %v4965_v24 = vor.u32 %v6303_v17, %v4964_v16  ;;  %v5029_v28 = vor.u32 %v6319_v22, %v5028_v21  ;;  %v6302_v30 = vld [vmem:[#allocation10 + $0x16c] sm:$0xf0]  ;;  %v6346_v17 = vld [vmem:[#allocation7 + $0x2f0] sm:$0xf0]  ;;  %v4981_v21 = vor.u32 %v6307_v63, %v4980_v62 }
  0xe2   : > { %v7362_v9 = vpack.c.bf16 %v487_v36, %v483_v1  ;;  %v7364_v18 = vpack.c.bf16 %v488_v37, %v484_v34  ;;  %v7366_v43 = vpack.c.bf16 %v489_v38, %v485_v2  ;;  %v7368_v44 = vpack.c.bf16 %v490_v39, %v486_v35  ;;  %v4960_v29 = vld [vmem:[#allocation10 + $0x160] sm:$0xf]  ;;  %v6293_v35 = vld [vmem:[#allocation10 + $0x4c] sm:$0xf0]  ;;  %v5120_v62 = vld [vmem:[#allocation7 + $0x264] sm:$0xf] }
  0xe3   : > { %v4997_v27 = vor.u32 %v6311_v20, %v4996_v19  ;;  %v4992_v31 = vld [vmem:[#allocation10 + $0x260] sm:$0xf]  ;;  %v4929_v1 = vor.u32 %v6294_v26, %v4928_v25  ;;  %v4961_v34 = vor.u32 %v6302_v30, %v4960_v29  ;;  %v5025_v36 = vor.u32 %v6318_v33, %v5024_v32  ;;  %v6301_v38 = vld [vmem:[#allocation10 + $0x14c] sm:$0xf0]  ;;  %v5168_v19 = vld [vmem:[#allocation7 + $0x3e4] sm:$0xf] }
  0xe4   : > { %759 = vmatmul.bf16.vlgmr.msra.gmra.mxu0 %v7362_v9  ;;  %773 = vmatmul.bf16.vlgmr.msra.gmra.mxu1 %v7364_v18  ;;  %v4924_v2 = vld [vmem:[#allocation10 + $0x40] sm:$0xf]  ;;  %v4993_v3 = vor.u32 %v6310_v0, %v4992_v31  ;;  %v6317_v41 = vld [vmem:[#allocation10 + $0x34c] sm:$0xf0]  ;;  %v6354_v20 = vld [vmem:[#allocation7 + $0x3f0] sm:$0xf0] }
  0xe5   : > { %787 = vmatmul.bf16.vlgmr.msra.gmra.mxu2 %v7366_v43  ;;  %801 = vmatmul.bf16.vlgmr.msra.gmra.mxu3 %v7368_v44  ;;  %v4956_v37 = vld [vmem:[#allocation10 + $0x140] sm:$0xf]  ;;  %v6315_v5 = vld [vmem:[#allocation10 + $0x30c] sm:$0xf0]  ;;  %v5068_v25 = vld [vmem:[#allocation7 + $0xc4] sm:$0xf] }
  0xe6   : > { %1385 = vmatpush.bf16.msra.mxu0 %v4945_v8  ;;  %1399 = vmatpush.bf16.msra.mxu1 %v4977_v42  ;;  %v4988_v39 = vld [vmem:[#allocation10 + $0x240] sm:$0xf]  ;;  %v4925_v8 = vor.u32 %v6293_v35, %v4924_v2  ;;  %v4957_v42 = vor.u32 %v6301_v38, %v4956_v37  ;;  %v6329_v26 = vld [vmem:[#allocation7 + $0xd0] sm:$0xf0]  ;;  %v5100_v29 = vld [vmem:[#allocation7 + $0x1c4] sm:$0xf] }
  0xe7   : > { %1413 = vmatpush.bf16.msra.mxu2 %v5009_v15  ;;  %1427 = vmatpush.bf16.msra.mxu3 %v5041_v47  ;;  %v5020_v7 = vld [vmem:[#allocation10 + $0x340] sm:$0xf]  ;;  %v4989_v15 = vor.u32 %v6309_v40, %v4988_v39  ;;  %v6337_v30 = vld [vmem:[#allocation7 + $0x1d0] sm:$0xf0]  ;;  %v5132_v31 = vld [vmem:[#allocation7 + $0x2c4] sm:$0xf] }
  0xe8   : > { %v5021_v47 = vor.u32 %v6317_v41, %v5020_v7  ;;  %v5012_v4 = vld [vmem:[#allocation10 + $0x300] sm:$0xf]  ;;  %v6345_v0 = vld [vmem:[#allocation7 + $0x2d0] sm:$0xf0]  ;;  %v5164_v32 = vld [vmem:[#allocation7 + $0x3c4] sm:$0xf] }
  0xe9   : > { %v5013_v22 = vor.u32 %v6315_v5, %v5012_v4  ;;  %v6353_v33 = vld [vmem:[#allocation7 + $0x3d0] sm:$0xf0]  ;;  %v5064_v2 = vld [vmem:[#allocation7 + $0xa4] sm:$0xf] }
  0xea   : > { %1386 = vmatpush.bf16.msra.mxu0 %v4941_v54  ;;  %1400 = vmatpush.bf16.msra.mxu1 %v4973_v55  ;;  %v4916_v54 = vld [vmem:[#allocation10] sm:$0xf]  ;;  %v4921_v55 = vor.u32 %v6292_v46, %v4920_v45  ;;  %v6328_v35 = vld [vmem:[#allocation7 + $0xb0] sm:$0xf0]  ;;  %v5096_v37 = vld [vmem:[#allocation7 + $0x1a4] sm:$0xf] }
  0xeb   : > { %1414 = vmatpush.bf16.msra.mxu2 %v5005_v58  ;;  %1428 = vmatpush.bf16.msra.mxu3 %v5037_v59  ;;  %v4948_v58 = vld [vmem:[#allocation10 + $0x100] sm:$0xf]  ;;  %v6299_v59 = vld [vmem:[#allocation10 + $0x10c] sm:$0xf0]  ;;  %v6336_v38 = vld [vmem:[#allocation7 + $0x1b0] sm:$0xf0] }
  0xec   : > { %v4949_v16 = vor.u32 %v6299_v59, %v4948_v58  ;;  %v5128_v39 = vld [vmem:[#allocation7 + $0x2a4] sm:$0xf]  ;;  %v6344_v40 = vld [vmem:[#allocation7 + $0x2b0] sm:$0xf0]  ;;  %v5125_v58 = vor.u32 %v6343_v51, %v5124_v50  ;;  %v5157_v59 = vor.u32 %v6351_v53, %v5156_v52 }
  0xed   : > { %v5160_v7 = vld [vmem:[#allocation7 + $0x3a4] sm:$0xf]  ;;  %v6352_v41 = vld [vmem:[#allocation7 + $0x3b0] sm:$0xf0] }
  0xee   : > { %1387 = vmatpush.bf16.msra.mxu0 %v4937_v6  ;;  %1401 = vmatpush.bf16.msra.mxu1 %v4969_v10  ;;  %v5072_v6 = vld [vmem:[#allocation7 + $0xe4] sm:$0xf]  ;;  %v6330_v10 = vld [vmem:[#allocation7 + $0xf0] sm:$0xf0] }
  0xef   : > { %1415 = vmatpush.bf16.msra.mxu2 %v5001_v13  ;;  %1429 = vmatpush.bf16.msra.mxu3 %v5033_v14  ;;  %v5136_v13 = vld [vmem:[#allocation7 + $0x2e4] sm:$0xf]  ;;  %v4917_v14 = vor.u32 %v6291_v57, %v4916_v54  ;;  %v6327_v46 = vld [vmem:[#allocation7 + $0x90] sm:$0xf0] }
  0xf0   : > { %v5060_v45 = vld [vmem:[#allocation7 + $0x84] sm:$0xf]  ;;  %v6326_v57 = vld [vmem:[#allocation7 + $0x70] sm:$0xf0] }
  0xf1   : > { %v5061_v54 = vor.u32 %v6327_v46, %v5060_v45  ;;  %v6342_v63 = vld [vmem:[#allocation7 + $0x270] sm:$0xf0]  ;;  %v5152_v4 = vld [vmem:[#allocation7 + $0x364] sm:$0xf] }
  0xf2   : > { %1388 = vmatpush.bf16.msra.mxu0 %v4933_v23  ;;  %1402 = vmatpush.bf16.msra.mxu1 %v4965_v24  ;;  %v5073_v23 = vor.u32 %v6330_v10, %v5072_v6  ;;  %v5105_v24 = vor.u32 %v6338_v12, %v5104_v11  ;;  %v6350_v5 = vld [vmem:[#allocation7 + $0x370] sm:$0xf0]  ;;  %v5052_v11 = vld [vmem:[#allocation7 + $0x44] sm:$0xf] }
  0xf3   : > { %1416 = vmatpush.bf16.msra.mxu2 %v4997_v27  ;;  %1430 = vmatpush.bf16.msra.mxu3 %v5029_v28  ;;  %v5137_v27 = vor.u32 %v6346_v17, %v5136_v13  ;;  %v5169_v28 = vor.u32 %v6354_v20, %v5168_v19  ;;  %v6325_v12 = vld [vmem:[#allocation7 + $0x50] sm:$0xf0]  ;;  %v5121_v13 = vor.u32 %v6342_v63, %v5120_v62  ;;  %v5116_v19 = vld [vmem:[#allocation7 + $0x244] sm:$0xf] }
  0xf4   : > { %1077 = vmatmul.bf16.vlgmr.msrb.gmra.mxu0 %v7362_v9  ;;  %1091 = vmatmul.bf16.vlgmr.msrb.gmra.mxu1 %v7364_v18  ;;  %v6333_v17 = vld [vmem:[#allocation7 + $0x150] sm:$0xf0]  ;;  %v5234_v45 = vld [vmem:[#allocation8 + $0x1e4] sm:$0xf] }
  0xf5   : > { %1105 = vmatmul.bf16.vlgmr.msrb.gmra.mxu2 %v7366_v43  ;;  %1119 = vmatmul.bf16.vlgmr.msrb.gmra.mxu3 %v7368_v44  ;;  %v6341_v20 = vld [vmem:[#allocation7 + $0x250] sm:$0xf0]  ;;  %v5298_v50 = vld [vmem:[#allocation8 + $0x3e4] sm:$0xf] }
  0xf6   : > { %1389 = vmatpush.bf16.msra.mxu0 %v4929_v1  ;;  %1403 = vmatpush.bf16.msra.mxu1 %v4961_v34  ;;  %v5069_v1 = vor.u32 %v6329_v26, %v5068_v25  ;;  %v5101_v34 = vor.u32 %v6337_v30, %v5100_v29  ;;  %v5048_v25 = vld [vmem:[#allocation7 + $0x24] sm:$0xf]  ;;  %v6324_v26 = vld [vmem:[#allocation7 + $0x30] sm:$0xf0] }
  0xf7   : > { %1417 = vmatpush.bf16.msra.mxu2 %v4993_v3  ;;  %1431 = vmatpush.bf16.msra.mxu3 %v5025_v36  ;;  %v5133_v3 = vor.u32 %v6345_v0, %v5132_v31  ;;  %v5165_v36 = vor.u32 %v6353_v33, %v5164_v32  ;;  %v5080_v29 = vld [vmem:[#allocation7 + $0x124] sm:$0xf]  ;;  %v6332_v30 = vld [vmem:[#allocation7 + $0x130] sm:$0xf0] }
  0xf8   : > { %v5112_v31 = vld [vmem:[#allocation7 + $0x224] sm:$0xf]  ;;  %v6340_v0 = vld [vmem:[#allocation7 + $0x230] sm:$0xf0] }
  0xf9   : > { %v5144_v32 = vld [vmem:[#allocation7 + $0x324] sm:$0xf]  ;;  %v6348_v33 = vld [vmem:[#allocation7 + $0x330] sm:$0xf0] }
  0xfa   : > { %1390 = vmatpush.bf16.msra.mxu0 %v4925_v8  ;;  %1404 = vmatpush.bf16.msra.mxu1 %v4957_v42  ;;  %v5065_v8 = vor.u32 %v6328_v35, %v5064_v2  ;;  %v5097_v42 = vor.u32 %v6336_v38, %v5096_v37  ;;  %v5081_v2 = vor.u32 %v6332_v30, %v5080_v29  ;;  %v6323_v35 = vld [vmem:[#allocation7 + $0x10] sm:$0xf0]  ;;  %v5262_v62 = vld [vmem:[#allocation8 + $0x2c4] sm:$0xf] }
  0xfb   : > { %1418 = vmatpush.bf16.msra.mxu2 %v4989_v15  ;;  %1432 = vmatpush.bf16.msra.mxu3 %v5021_v47  ;;  %v5129_v15 = vor.u32 %v6344_v40, %v5128_v39  ;;  %v5161_v47 = vor.u32 %v6352_v41, %v5160_v7  ;;  %v5113_v37 = vor.u32 %v6340_v0, %v5112_v31  ;;  %v5108_v39 = vld [vmem:[#allocation7 + $0x204] sm:$0xf]  ;;  %v6339_v40 = vld [vmem:[#allocation7 + $0x210] sm:$0xf0] }
  0xfc   : > { %v5145_v38 = vor.u32 %v6348_v33, %v5144_v32  ;;  %v5140_v7 = vld [vmem:[#allocation7 + $0x304] sm:$0xf]  ;;  %v6347_v41 = vld [vmem:[#allocation7 + $0x310] sm:$0xf0]  ;;  %v5109_v52 = vor.u32 %v6339_v40, %v5108_v39 }
  0xfd   : > { %v6370_v46 = vld [vmem:[#allocation8 + $0x1f0] sm:$0xf0]  ;;  %v5141_v53 = vor.u32 %v6347_v41, %v5140_v7  ;;  %v5222_v29 = vld [vmem:[#allocation8 + $0x184] sm:$0xf] }
  0xfe   : > { %1391 = vmatpush.bf16.msra.mxu0 %v4921_v55  ;;  %1405 = vmatpush.bf16.msra.mxu1 %v4953_v56  ;;  %v5093_v55 = vor.u32 %v6335_v49, %v5092_v48  ;;  %v5056_v56 = vld [vmem:[#allocation7 + $0x64] sm:$0xf]  ;;  %v6378_v49 = vld [vmem:[#allocation8 + $0x2f0] sm:$0xf0] }
  0xff   : > { %1419 = vmatpush.bf16.msra.mxu2 %v4985_v60  ;;  %1433 = vmatpush.bf16.msra.mxu3 %v5017_v61  ;;  %v5088_v60 = vld [vmem:[#allocation7 + $0x164] sm:$0xf]  ;;  %v6334_v61 = vld [vmem:[#allocation7 + $0x170] sm:$0xf0]  ;;  %v5057_v6 = vor.u32 %v6326_v57, %v5056_v56 }
 0x100   : > { %v5089_v10 = vor.u32 %v6334_v61, %v5088_v60  ;;  %v6386_v51 = vld [vmem:[#allocation8 + $0x3f0] sm:$0xf0]  ;;  %v5198_v56 = vld [vmem:[#allocation8 + $0xc4] sm:$0xf] }
 0x101   : > { %v6361_v57 = vld [vmem:[#allocation8 + $0xd0] sm:$0xf0]  ;;  %v5230_v60 = vld [vmem:[#allocation8 + $0x1c4] sm:$0xf] }
 0x102   : > { %1392 = vmatpush.bf16.msra.mxu0 %v4917_v14  ;;  %1406 = vmatpush.bf16.msra.mxu1 %v4949_v16  ;;  %v5153_v14 = vor.u32 %v6350_v5, %v5152_v4  ;;  %v5084_v16 = vld [vmem:[#allocation7 + $0x144] sm:$0xf]  ;;  %v6369_v61 = vld [vmem:[#allocation8 + $0x1d0] sm:$0xf0] }
 0x103   : > { %1420 = vmatpush.bf16.msra.mxu2 %v4981_v21  ;;  %1434 = vmatpush.bf16.msra.mxu3 %v5013_v22  ;;  %v5148_v21 = vld [vmem:[#allocation7 + $0x344] sm:$0xf]  ;;  %v6349_v22 = vld [vmem:[#allocation7 + $0x350] sm:$0xf0] }
 0x104   : > { %v6377_v63 = vld [vmem:[#allocation8 + $0x2d0] sm:$0xf0]  ;;  %v5294_v4 = vld [vmem:[#allocation8 + $0x3c4] sm:$0xf] }
 0x105   : > { %1393 = vmatmul.bf16.vlgmr.msra.gmra.mxu0 %v7362_v9  ;;  %1407 = vmatmul.bf16.vlgmr.msra.gmra.mxu1 %v7364_v18  ;;  %v6385_v5 = vld [vmem:[#allocation8 + $0x3d0] sm:$0xf0]  ;;  %v5254_v31 = vld [vmem:[#allocation8 + $0x284] sm:$0xf] }
 0x106   : > { %1701 = vmatpush.bf16.msrb.mxu0 %v5073_v23  ;;  %1715 = vmatpush.bf16.msrb.mxu1 %v5105_v24  ;;  %v5053_v23 = vor.u32 %v6325_v12, %v5052_v11  ;;  %v5085_v24 = vor.u32 %v6333_v17, %v5084_v16  ;;  %v5194_v11 = vld [vmem:[#allocation8 + $0xa4] sm:$0xf]  ;;  %v6360_v12 = vld [vmem:[#allocation8 + $0xb0] sm:$0xf0] }
 0x107   : > { %1729 = vmatpush.bf16.msrb.mxu2 %v5137_v27  ;;  %1743 = vmatpush.bf16.msrb.mxu3 %v5169_v28  ;;  %v5117_v27 = vor.u32 %v6341_v20, %v5116_v19  ;;  %v5149_v28 = vor.u32 %v6349_v22, %v5148_v21  ;;  %v5226_v16 = vld [vmem:[#allocation8 + $0x1a4] sm:$0xf]  ;;  %v6368_v17 = vld [vmem:[#allocation8 + $0x1b0] sm:$0xf0] }
 0x108   : > { %1421 = vmatmul.bf16.vlgmr.msra.gmra.mxu2 %v7366_v43  ;;  %1435 = vmatmul.bf16.vlgmr.msra.gmra.mxu3 %v7368_v44  ;;  %v5258_v19 = vld [vmem:[#allocation8 + $0x2a4] sm:$0xf]  ;;  %v6376_v20 = vld [vmem:[#allocation8 + $0x2b0] sm:$0xf0] }
 0x109   : > { %v5290_v21 = vld [vmem:[#allocation8 + $0x3a4] sm:$0xf]  ;;  %v6384_v22 = vld [vmem:[#allocation8 + $0x3b0] sm:$0xf0] }
 0x10a   : > { %1702 = vmatpush.bf16.msrb.mxu0 %v5069_v1  ;;  %1716 = vmatpush.bf16.msrb.mxu1 %v5101_v34  ;;  %v5044_v1 = vld [vmem:[#allocation7 + $0x4] sm:$0xf]  ;;  %v5049_v34 = vor.u32 %v6324_v26, %v5048_v25  ;;  %v6359_v26 = vld [vmem:[#allocation8 + $0x90] sm:$0xf0] }
 0x10b   : > { %1730 = vmatpush.bf16.msrb.mxu2 %v5133_v3  ;;  %1744 = vmatpush.bf16.msrb.mxu3 %v5165_v36  ;;  %v5076_v3 = vld [vmem:[#allocation7 + $0x104] sm:$0xf]  ;;  %v6331_v36 = vld [vmem:[#allocation7 + $0x110] sm:$0xf0] }
 0x10c   : > { %v5077_v48 = vor.u32 %v6331_v36, %v5076_v3  ;;  %v5190_v25 = vld [vmem:[#allocation8 + $0x84] sm:$0xf]  ;;  %v6367_v30 = vld [vmem:[#allocation8 + $0x190] sm:$0xf0] }
 0x10d   : > { %v6375_v0 = vld [vmem:[#allocation8 + $0x290] sm:$0xf0]  ;;  %v5286_v32 = vld [vmem:[#allocation8 + $0x384] sm:$0xf] }
 0x10e   : > { %1703 = vmatpush.bf16.msrb.mxu0 %v5065_v8  ;;  %1717 = vmatpush.bf16.msrb.mxu1 %v5097_v42  ;;  %v5202_v8 = vld [vmem:[#allocation8 + $0xe4] sm:$0xf]  ;;  %v6362_v42 = vld [vmem:[#allocation8 + $0xf0] sm:$0xf0]  ;;  %v5255_v3 = vor.u32 %v6375_v0, %v5254_v31 }
 0x10f   : > { %1731 = vmatpush.bf16.msrb.mxu2 %v5129_v15  ;;  %1745 = vmatpush.bf16.msrb.mxu3 %v5161_v47  ;;  %v5266_v15 = vld [vmem:[#allocation8 + $0x2e4] sm:$0xf]  ;;  %v5045_v47 = vor.u32 %v6323_v35, %v5044_v1  ;;  %v6383_v33 = vld [vmem:[#allocation8 + $0x390] sm:$0xf0]  ;;  %v5191_v1 = vor.u32 %v6359_v26, %v5190_v25 }
 0x110   : > { %v6358_v35 = vld [vmem:[#allocation8 + $0x70] sm:$0xf0]  ;;  %v5287_v36 = vor.u32 %v6383_v33, %v5286_v32  ;;  %v5250_v39 = vld [vmem:[#allocation8 + $0x264] sm:$0xf] }
 0x111   : > { %v6374_v40 = vld [vmem:[#allocation8 + $0x270] sm:$0xf0]  ;;  %v5282_v7 = vld [vmem:[#allocation8 + $0x364] sm:$0xf] }
 0x112   : > { %1704 = vmatpush.bf16.msrb.mxu0 %v5061_v54  ;;  %1718 = vmatpush.bf16.msrb.mxu1 %v5093_v55  ;;  %v5203_v54 = vor.u32 %v6362_v42, %v5202_v8  ;;  %v5235_v55 = vor.u32 %v6370_v46, %v5234_v45  ;;  %v6382_v41 = vld [vmem:[#allocation8 + $0x370] sm:$0xf0]  ;;  %v5182_v45 = vld [vmem:[#allocation8 + $0x44] sm:$0xf] }
 0x113   : > { %1732 = vmatpush.bf16.msrb.mxu2 %v5125_v58  ;;  %1746 = vmatpush.bf16.msrb.mxu3 %v5157_v59  ;;  %v5267_v58 = vor.u32 %v6378_v49, %v5266_v15  ;;  %v5299_v59 = vor.u32 %v6386_v51, %v5298_v50  ;;  %v6357_v46 = vld [vmem:[#allocation8 + $0x50] sm:$0xf0]  ;;  %v5251_v15 = vor.u32 %v6374_v40, %v5250_v39  ;;  %v5246_v50 = vld [vmem:[#allocation8 + $0x244] sm:$0xf] }
 0x114   : > { %v6365_v49 = vld [vmem:[#allocation8 + $0x150] sm:$0xf0]  ;;  %v5364_v25 = vld [vmem:[#allocation10 + $0x1e4] sm:$0xf] }
 0x115   : > { %v6373_v51 = vld [vmem:[#allocation8 + $0x250] sm:$0xf0]  ;;  %v5428_v31 = vld [vmem:[#allocation10 + $0x3e4] sm:$0xf] }
 0x116   : > { %1705 = vmatpush.bf16.msrb.mxu0 %v5057_v6  ;;  %1719 = vmatpush.bf16.msrb.mxu1 %v5089_v10  ;;  %v5199_v6 = vor.u32 %v6361_v57, %v5198_v56  ;;  %v5231_v10 = vor.u32 %v6369_v61, %v5230_v60  ;;  %v5178_v56 = vld [vmem:[#allocation8 + $0x24] sm:$0xf]  ;;  %v6356_v57 = vld [vmem:[#allocation8 + $0x30] sm:$0xf0] }
 0x117   : > { %1733 = vmatpush.bf16.msrb.mxu2 %v5121_v13  ;;  %1747 = vmatpush.bf16.msrb.mxu3 %v5153_v14  ;;  %v5263_v13 = vor.u32 %v6377_v63, %v5262_v62  ;;  %v5295_v14 = vor.u32 %v6385_v5, %v5294_v4  ;;  %v5210_v60 = vld [vmem:[#allocation8 + $0x124] sm:$0xf]  ;;  %v6364_v61 = vld [vmem:[#allocation8 + $0x130] sm:$0xf0] }
 0x118   : > { %v5242_v62 = vld [vmem:[#allocation8 + $0x224] sm:$0xf]  ;;  %v6372_v63 = vld [vmem:[#allocation8 + $0x230] sm:$0xf0] }
 0x119   : > { %v5274_v4 = vld [vmem:[#allocation8 + $0x324] sm:$0xf]  ;;  %v6380_v5 = vld [vmem:[#allocation8 + $0x330] sm:$0xf0] }
 0x11a   : > { %1706 = vmatpush.bf16.msrb.mxu0 %v5053_v23  ;;  %1720 = vmatpush.bf16.msrb.mxu1 %v5085_v24  ;;  %v5195_v23 = vor.u32 %v6360_v12, %v5194_v11  ;;  %v5227_v24 = vor.u32 %v6368_v17, %v5226_v16  ;;  %v5211_v11 = vor.u32 %v6364_v61, %v5210_v60  ;;  %v6355_v12 = vld [vmem:[#allocation8 + $0x10] sm:$0xf0]  ;;  %v5392_v39 = vld [vmem:[#allocation10 + $0x2c4] sm:$0xf] }
 0x11b   : > { %1734 = vmatpush.bf16.msrb.mxu2 %v5117_v27  ;;  %1748 = vmatpush.bf16.msrb.mxu3 %v5149_v28  ;;  %v5259_v27 = vor.u32 %v6376_v20, %v5258_v19  ;;  %v5291_v28 = vor.u32 %v6384_v22, %v5290_v21  ;;  %v5243_v16 = vor.u32 %v6372_v63, %v5242_v62  ;;  %v5238_v19 = vld [vmem:[#allocation8 + $0x204] sm:$0xf]  ;;  %v6371_v20 = vld [vmem:[#allocation8 + $0x210] sm:$0xf0] }
 0x11c   : > { %v5275_v17 = vor.u32 %v6380_v5, %v5274_v4  ;;  %v5270_v21 = vld [vmem:[#allocation8 + $0x304] sm:$0xf]  ;;  %v6379_v22 = vld [vmem:[#allocation8 + $0x310] sm:$0xf0]  ;;  %v5239_v32 = vor.u32 %v6371_v20, %v5238_v19 }
 0x11d   : > { %v6402_v26 = vld [vmem:[#allocation10 + $0x1f0] sm:$0xf0]  ;;  %v5271_v33 = vor.u32 %v6379_v22, %v5270_v21  ;;  %v5352_v60 = vld [vmem:[#allocation10 + $0x184] sm:$0xf] }
 0x11e   : > { %1707 = vmatpush.bf16.msrb.mxu0 %v5049_v34  ;;  %1721 = vmatpush.bf16.msrb.mxu1 %v5081_v2  ;;  %v5223_v34 = vor.u32 %v6367_v30, %v5222_v29  ;;  %v5186_v2 = vld [vmem:[#allocation8 + $0x64] sm:$0xf]  ;;  %v6410_v30 = vld [vmem:[#allocation10 + $0x2f0] sm:$0xf0] }
 0x11f   : > { %1735 = vmatpush.bf16.msrb.mxu2 %v5113_v37  ;;  %1749 = vmatpush.bf16.msrb.mxu3 %v5145_v38  ;;  %v5218_v37 = vld [vmem:[#allocation8 + $0x164] sm:$0xf]  ;;  %v6366_v38 = vld [vmem:[#allocation8 + $0x170] sm:$0xf0]  ;;  %v5187_v8 = vor.u32 %v6358_v35, %v5186_v2 }
 0x120   : > { %v5219_v42 = vor.u32 %v6366_v38, %v5218_v37  ;;  %v6418_v0 = vld [vmem:[#allocation10 + $0x3f0] sm:$0xf0]  ;;  %v5328_v2 = vld [vmem:[#allocation10 + $0xc4] sm:$0xf] }
 0x121   : > { %v6393_v35 = vld [vmem:[#allocation10 + $0xd0] sm:$0xf0]  ;;  %v5360_v37 = vld [vmem:[#allocation10 + $0x1c4] sm:$0xf] }
 0x122   : > { %1708 = vmatpush.bf16.msrb.mxu0 %v5045_v47  ;;  %1722 = vmatpush.bf16.msrb.mxu1 %v5077_v48  ;;  %v5283_v47 = vor.u32 %v6382_v41, %v5282_v7  ;;  %v5214_v48 = vld [vmem:[#allocation8 + $0x144] sm:$0xf]  ;;  %v6401_v38 = vld [vmem:[#allocation10 + $0x1d0] sm:$0xf0] }
 0x123   : > { %1736 = vmatpush.bf16.msrb.mxu2 %v5109_v52  ;;  %1750 = vmatpush.bf16.msrb.mxu3 %v5141_v53  ;;  %v5278_v52 = vld [vmem:[#allocation8 + $0x344] sm:$0xf]  ;;  %v6381_v53 = vld [vmem:[#allocation8 + $0x350] sm:$0xf0] }
 0x124   : > { %v6409_v40 = vld [vmem:[#allocation10 + $0x2d0] sm:$0xf0]  ;;  %v5424_v7 = vld [vmem:[#allocation10 + $0x3c4] sm:$0xf] }
 0x125   : > { %1709 = vmatmul.bf16.vlgmr.msrb.gmra.mxu0 %v7362_v9  ;;  %1723 = vmatmul.bf16.vlgmr.msrb.gmra.mxu1 %v7364_v18  ;;  %v6417_v41 = vld [vmem:[#allocation10 + $0x3d0] sm:$0xf0]  ;;  %v5384_v62 = vld [vmem:[#allocation10 + $0x284] sm:$0xf] }
 0x126   : > { %2020 = vmatpush.bf16.msra.mxu0 %v5203_v54  ;;  %2034 = vmatpush.bf16.msra.mxu1 %v5235_v55  ;;  %v5183_v54 = vor.u32 %v6357_v46, %v5182_v45  ;;  %v5215_v55 = vor.u32 %v6365_v49, %v5214_v48  ;;  %v5324_v45 = vld [vmem:[#allocation10 + $0xa4] sm:$0xf]  ;;  %v6392_v46 = vld [vmem:[#allocation10 + $0xb0] sm:$0xf0] }
 0x127   : > { %2048 = vmatpush.bf16.msra.mxu2 %v5267_v58  ;;  %2062 = vmatpush.bf16.msra.mxu3 %v5299_v59  ;;  %v5247_v58 = vor.u32 %v6373_v51, %v5246_v50  ;;  %v5279_v59 = vor.u32 %v6381_v53, %v5278_v52  ;;  %v5356_v48 = vld [vmem:[#allocation10 + $0x1a4] sm:$0xf]  ;;  %v6400_v49 = vld [vmem:[#allocation10 + $0x1b0] sm:$0xf0] }
 0x128   : > { %1737 = vmatmul.bf16.vlgmr.msrb.gmra.mxu2 %v7366_v43  ;;  %1751 = vmatmul.bf16.vlgmr.msrb.gmra.mxu3 %v7368_v44  ;;  %v5388_v50 = vld [vmem:[#allocation10 + $0x2a4] sm:$0xf]  ;;  %v6408_v51 = vld [vmem:[#allocation10 + $0x2b0] sm:$0xf0] }
 0x129   : > { %v5420_v52 = vld [vmem:[#allocation10 + $0x3a4] sm:$0xf]  ;;  %v6416_v53 = vld [vmem:[#allocation10 + $0x3b0] sm:$0xf0] }
 0x12a   : > { %2021 = vmatpush.bf16.msra.mxu0 %v5199_v6  ;;  %2035 = vmatpush.bf16.msra.mxu1 %v5231_v10  ;;  %v5174_v6 = vld [vmem:[#allocation8 + $0x4] sm:$0xf]  ;;  %v5179_v10 = vor.u32 %v6356_v57, %v5178_v56  ;;  %v6391_v57 = vld [vmem:[#allocation10 + $0x90] sm:$0xf0] }
 0x12b   : > { %2049 = vmatpush.bf16.msra.mxu2 %v5263_v13  ;;  %2063 = vmatpush.bf16.msra.mxu3 %v5295_v14  ;;  %v5206_v13 = vld [vmem:[#allocation8 + $0x104] sm:$0xf]  ;;  %v6363_v14 = vld [vmem:[#allocation8 + $0x110] sm:$0xf0] }
 0x12c   : > { %v5207_v29 = vor.u32 %v6363_v14, %v5206_v13  ;;  %v5320_v56 = vld [vmem:[#allocation10 + $0x84] sm:$0xf]  ;;  %v6399_v61 = vld [vmem:[#allocation10 + $0x190] sm:$0xf0] }
 0x12d   : > { %v6407_v63 = vld [vmem:[#allocation10 + $0x290] sm:$0xf0]  ;;  %v5416_v4 = vld [vmem:[#allocation10 + $0x384] sm:$0xf] }
 0x12e   : > { %2022 = vmatpush.bf16.msra.mxu0 %v5195_v23  ;;  %2036 = vmatpush.bf16.msra.mxu1 %v5227_v24  ;;  %v5332_v23 = vld [vmem:[#allocation10 + $0xe4] sm:$0xf]  ;;  %v6394_v24 = vld [vmem:[#allocation10 + $0xf0] sm:$0xf0]  ;;  %v5385_v13 = vor.u32 %v6407_v63, %v5384_v62  ;;  %v5558_v62 = vld [vmem:[#allocation7 + $0x3e8] sm:$0xf] }
 0x12f   : > { %2050 = vmatpush.bf16.msra.mxu2 %v5259_v27  ;;  %2064 = vmatpush.bf16.msra.mxu3 %v5291_v28  ;;  %v5396_v27 = vld [vmem:[#allocation10 + $0x2e4] sm:$0xf]  ;;  %v5175_v28 = vor.u32 %v6355_v12, %v5174_v6  ;;  %v6415_v5 = vld [vmem:[#allocation10 + $0x390] sm:$0xf0]  ;;  %v5321_v6 = vor.u32 %v6391_v57, %v5320_v56  ;;  %v5494_v56 = vld [vmem:[#allocation7 + $0x1e8] sm:$0xf] }
 0x130   : > { %v6390_v12 = vld [vmem:[#allocation10 + $0x70] sm:$0xf0]  ;;  %v5417_v14 = vor.u32 %v6415_v5, %v5416_v4  ;;  %v5380_v19 = vld [vmem:[#allocation10 + $0x264] sm:$0xf]  ;;  %v6434_v57 = vld [vmem:[#allocation7 + $0x1f4] sm:$0xf0] }
 0x131   : > { %v6406_v20 = vld [vmem:[#allocation10 + $0x270] sm:$0xf0]  ;;  %v5412_v21 = vld [vmem:[#allocation10 + $0x364] sm:$0xf]  ;;  %v6450_v63 = vld [vmem:[#allocation7 + $0x3f4] sm:$0xf0] }
 0x132   : > { %2023 = vmatpush.bf16.msra.mxu0 %v5191_v1  ;;  %2037 = vmatpush.bf16.msra.mxu1 %v5223_v34  ;;  %v5333_v1 = vor.u32 %v6394_v24, %v5332_v23  ;;  %v5365_v34 = vor.u32 %v6402_v26, %v5364_v25  ;;  %v6414_v22 = vld [vmem:[#allocation10 + $0x370] sm:$0xf0]  ;;  %v5312_v25 = vld [vmem:[#allocation10 + $0x44] sm:$0xf] }
 0x133   : > { %2051 = vmatpush.bf16.msra.mxu2 %v5255_v3  ;;  %2065 = vmatpush.bf16.msra.mxu3 %v5287_v36  ;;  %v5397_v3 = vor.u32 %v6410_v30, %v5396_v27  ;;  %v5429_v36 = vor.u32 %v6418_v0, %v5428_v31  ;;  %v6389_v26 = vld [vmem:[#allocation10 + $0x50] sm:$0xf0]  ;;  %v5381_v27 = vor.u32 %v6406_v20, %v5380_v19  ;;  %v5376_v31 = vld [vmem:[#allocation10 + $0x244] sm:$0xf]  ;;  %v5522_v19 = vld [vmem:[#allocation7 + $0x2c8] sm:$0xf] }
 0x134   : > { %v6397_v30 = vld [vmem:[#allocation10 + $0x150] sm:$0xf0]  ;;  %v6441_v20 = vld [vmem:[#allocation7 + $0x2d4] sm:$0xf0] }
 0x135   : > { %v6405_v0 = vld [vmem:[#allocation10 + $0x250] sm:$0xf0] }
 0x136   : > { %2024 = vmatpush.bf16.msra.mxu0 %v5187_v8  ;;  %2038 = vmatpush.bf16.msra.mxu1 %v5219_v42  ;;  %v5329_v8 = vor.u32 %v6393_v35, %v5328_v2  ;;  %v5361_v42 = vor.u32 %v6401_v38, %v5360_v37  ;;  %v5308_v2 = vld [vmem:[#allocation10 + $0x24] sm:$0xf]  ;;  %v6388_v35 = vld [vmem:[#allocation10 + $0x30] sm:$0xf0] }
 0x137   : > { %2052 = vmatpush.bf16.msra.mxu2 %v5251_v15  ;;  %2066 = vmatpush.bf16.msra.mxu3 %v5283_v47  ;;  %v5393_v15 = vor.u32 %v6409_v40, %v5392_v39  ;;  %v5425_v47 = vor.u32 %v6417_v41, %v5424_v7  ;;  %v5340_v37 = vld [vmem:[#allocation10 + $0x124] sm:$0xf]  ;;  %v6396_v38 = vld [vmem:[#allocation10 + $0x130] sm:$0xf0] }
 0x138   : > { %v5372_v39 = vld [vmem:[#allocation10 + $0x224] sm:$0xf]  ;;  %v6404_v40 = vld [vmem:[#allocation10 + $0x230] sm:$0xf0] }
 0x139   : > { %v5404_v7 = vld [vmem:[#allocation10 + $0x324] sm:$0xf]  ;;  %v6412_v41 = vld [vmem:[#allocation10 + $0x330] sm:$0xf0] }
 0x13a   : > { %2025 = vmatpush.bf16.msra.mxu0 %v5183_v54  ;;  %2039 = vmatpush.bf16.msra.mxu1 %v5215_v55  ;;  %v5325_v54 = vor.u32 %v6392_v46, %v5324_v45  ;;  %v5357_v55 = vor.u32 %v6400_v49, %v5356_v48  ;;  %v5341_v45 = vor.u32 %v6396_v38, %v5340_v37  ;;  %v6387_v46 = vld [vmem:[#allocation10 + $0x10] sm:$0xf0] }
 0x13b   : > { %2053 = vmatpush.bf16.msra.mxu2 %v5247_v58  ;;  %2067 = vmatpush.bf16.msra.mxu3 %v5279_v59  ;;  %v5389_v58 = vor.u32 %v6408_v51, %v5388_v50  ;;  %v5421_v59 = vor.u32 %v6416_v53, %v5420_v52  ;;  %v5373_v48 = vor.u32 %v6404_v40, %v5372_v39  ;;  %v5368_v50 = vld [vmem:[#allocation10 + $0x204] sm:$0xf]  ;;  %v6403_v51 = vld [vmem:[#allocation10 + $0x210] sm:$0xf0]  ;;  %v5482_v39 = vld [vmem:[#allocation7 + $0x188] sm:$0xf] }
 0x13c   : > { %v5405_v49 = vor.u32 %v6412_v41, %v5404_v7  ;;  %v5400_v52 = vld [vmem:[#allocation10 + $0x304] sm:$0xf]  ;;  %v6411_v53 = vld [vmem:[#allocation10 + $0x310] sm:$0xf0]  ;;  %v5369_v4 = vor.u32 %v6403_v51, %v5368_v50  ;;  %v6431_v40 = vld [vmem:[#allocation7 + $0x194] sm:$0xf0] }
 0x13d   : > { %v5401_v5 = vor.u32 %v6411_v53, %v5400_v52  ;;  %v5514_v7 = vld [vmem:[#allocation7 + $0x288] sm:$0xf]  ;;  %v6439_v41 = vld [vmem:[#allocation7 + $0x294] sm:$0xf0] }
 0x13e   : > { %2026 = vmatpush.bf16.msra.mxu0 %v5179_v10  ;;  %2040 = vmatpush.bf16.msra.mxu1 %v5211_v11  ;;  %v5353_v10 = vor.u32 %v6399_v61, %v5352_v60  ;;  %v5316_v11 = vld [vmem:[#allocation10 + $0x64] sm:$0xf]  ;;  %v6442_v61 = vld [vmem:[#allocation7 + $0x2f4] sm:$0xf0]  ;;  %v5478_v50 = vld [vmem:[#allocation7 + $0x168] sm:$0xf] }
 0x13f   : > { %2054 = vmatpush.bf16.msra.mxu2 %v5243_v16  ;;  %2068 = vmatpush.bf16.msra.mxu3 %v5275_v17  ;;  %v5348_v16 = vld [vmem:[#allocation10 + $0x164] sm:$0xf]  ;;  %v6398_v17 = vld [vmem:[#allocation10 + $0x170] sm:$0xf0]  ;;  %v5317_v23 = vor.u32 %v6390_v12, %v5316_v11  ;;  %v5458_v11 = vld [vmem:[#allocation7 + $0xc8] sm:$0xf] }
 0x140   : > { %v5349_v24 = vor.u32 %v6398_v17, %v5348_v16  ;;  %v6425_v12 = vld [vmem:[#allocation7 + $0xd4] sm:$0xf0]  ;;  %v5490_v16 = vld [vmem:[#allocation7 + $0x1c8] sm:$0xf] }
 0x141   : > { %v6433_v17 = vld [vmem:[#allocation7 + $0x1d4] sm:$0xf0]  ;;  %v5510_v52 = vld [vmem:[#allocation7 + $0x268] sm:$0xf] }
 0x142   : > { %2027 = vmatpush.bf16.msra.mxu0 %v5175_v28  ;;  %2041 = vmatpush.bf16.msra.mxu1 %v5207_v29  ;;  %v5413_v28 = vor.u32 %v6414_v22, %v5412_v21  ;;  %v5344_v29 = vld [vmem:[#allocation10 + $0x144] sm:$0xf]  ;;  %v5554_v21 = vld [vmem:[#allocation7 + $0x3c8] sm:$0xf]  ;;  %v6449_v22 = vld [vmem:[#allocation7 + $0x3d4] sm:$0xf0] }
 0x143   : > { %2055 = vmatpush.bf16.msra.mxu2 %v5239_v32  ;;  %2069 = vmatpush.bf16.msra.mxu3 %v5271_v33  ;;  %v5408_v32 = vld [vmem:[#allocation10 + $0x344] sm:$0xf]  ;;  %v6413_v33 = vld [vmem:[#allocation10 + $0x350] sm:$0xf0]  ;;  %v6430_v51 = vld [vmem:[#allocation7 + $0x174] sm:$0xf0] }
 0x145   : > { %2028 = vmatmul.bf16.vlgmr.msra.gmra.mxu0 %v7362_v9  ;;  %2042 = vmatmul.bf16.vlgmr.msra.gmra.mxu1 %v7364_v18 }
 0x146   : > { %2337 = vmatpush.bf16.msrb.mxu0 %v5333_v1  ;;  %2351 = vmatpush.bf16.msrb.mxu1 %v5365_v34  ;;  %v5313_v1 = vor.u32 %v6389_v26, %v5312_v25  ;;  %v5345_v34 = vor.u32 %v6397_v30, %v5344_v29  ;;  %v5454_v25 = vld [vmem:[#allocation7 + $0xa8] sm:$0xf]  ;;  %v6424_v26 = vld [vmem:[#allocation7 + $0xb4] sm:$0xf0] }
 0x147   : > { %2365 = vmatpush.bf16.msrb.mxu2 %v5397_v3  ;;  %2379 = vmatpush.bf16.msrb.mxu3 %v5429_v36  ;;  %v5377_v3 = vor.u32 %v6405_v0, %v5376_v31  ;;  %v5409_v36 = vor.u32 %v6413_v33, %v5408_v32  ;;  %v5486_v29 = vld [vmem:[#allocation7 + $0x1a8] sm:$0xf]  ;;  %v6432_v30 = vld [vmem:[#allocation7 + $0x1b4] sm:$0xf0] }
 0x148   : > { %2056 = vmatmul.bf16.vlgmr.msra.gmra.mxu2 %v7366_v43  ;;  %2070 = vmatmul.bf16.vlgmr.msra.gmra.mxu3 %v7368_v44  ;;  %v5518_v31 = vld [vmem:[#allocation7 + $0x2a8] sm:$0xf]  ;;  %v6440_v0 = vld [vmem:[#allocation7 + $0x2b4] sm:$0xf0] }
 0x149   : > { %v5550_v32 = vld [vmem:[#allocation7 + $0x3a8] sm:$0xf]  ;;  %v6448_v33 = vld [vmem:[#allocation7 + $0x3b4] sm:$0xf0]  ;;  %v5519_v37 = vor.u32 %v6440_v0, %v5518_v31 }
 0x14a   : > { %2338 = vmatpush.bf16.msrb.mxu0 %v5329_v8  ;;  %2352 = vmatpush.bf16.msrb.mxu1 %v5361_v42  ;;  %v5304_v8 = vld [vmem:[#allocation10 + $0x4] sm:$0xf]  ;;  %v5309_v42 = vor.u32 %v6388_v35, %v5308_v2  ;;  %v5455_v2 = vor.u32 %v6424_v26, %v5454_v25  ;;  %v5487_v35 = vor.u32 %v6432_v30, %v5486_v29  ;;  %v5470_v26 = vld [vmem:[#allocation7 + $0x128] sm:$0xf]  ;;  %v6436_v31 = vld [vmem:[#allocation7 + $0x234] sm:$0xf0] }
 0x14b   : > { %2366 = vmatpush.bf16.msrb.mxu2 %v5393_v15  ;;  %2380 = vmatpush.bf16.msrb.mxu3 %v5425_v47  ;;  %v5336_v15 = vld [vmem:[#allocation10 + $0x104] sm:$0xf]  ;;  %v6395_v47 = vld [vmem:[#allocation10 + $0x110] sm:$0xf0]  ;;  %v5551_v38 = vor.u32 %v6448_v33, %v5550_v32  ;;  %v5534_v0 = vld [vmem:[#allocation7 + $0x328] sm:$0xf] }
 0x14c   : > { %v5337_v60 = vor.u32 %v6395_v47, %v5336_v15  ;;  %v5446_v15 = vld [vmem:[#allocation7 + $0x68] sm:$0xf]  ;;  %v6422_v47 = vld [vmem:[#allocation7 + $0x74] sm:$0xf0] }
 0x14d   : > { %v6444_v32 = vld [vmem:[#allocation7 + $0x334] sm:$0xf0] }
 0x14e   : > { %2339 = vmatpush.bf16.msrb.mxu0 %v5325_v54  ;;  %2353 = vmatpush.bf16.msrb.mxu1 %v5357_v55  ;;  %v5462_v54 = vld [vmem:[#allocation7 + $0xe8] sm:$0xf]  ;;  %v6426_v55 = vld [vmem:[#allocation7 + $0xf4] sm:$0xf0] }
 0x14f   : > { %2367 = vmatpush.bf16.msrb.mxu2 %v5389_v58  ;;  %2381 = vmatpush.bf16.msrb.mxu3 %v5421_v59  ;;  %v5526_v58 = vld [vmem:[#allocation7 + $0x2e8] sm:$0xf]  ;;  %v5305_v59 = vor.u32 %v6387_v46, %v5304_v8  ;;  %v5483_v46 = vor.u32 %v6431_v40, %v5482_v39  ;;  %v6427_v39 = vld [vmem:[#allocation7 + $0x114] sm:$0xf0] }
 0x150   : > { %v5546_v8 = vld [vmem:[#allocation7 + $0x388] sm:$0xf] }
 0x151   : > { %v5498_v40 = vld [vmem:[#allocation7 + $0x208] sm:$0xf] }
 0x152   : > { %2340 = vmatpush.bf16.msrb.mxu0 %v5321_v6  ;;  %2354 = vmatpush.bf16.msrb.mxu1 %v5353_v10  ;;  %v5463_v6 = vor.u32 %v6426_v55, %v5462_v54  ;;  %v5495_v10 = vor.u32 %v6434_v57, %v5494_v56  ;;  %v6438_v55 = vld [vmem:[#allocation7 + $0x274] sm:$0xf0]  ;;  %v5542_v56 = vld [vmem:[#allocation7 + $0x368] sm:$0xf] }
 0x153   : > { %2368 = vmatpush.bf16.msrb.mxu2 %v5385_v13  ;;  %2382 = vmatpush.bf16.msrb.mxu3 %v5417_v14  ;;  %v5527_v13 = vor.u32 %v6442_v61, %v5526_v58  ;;  %v5559_v14 = vor.u32 %v6450_v63, %v5558_v62  ;;  %v6446_v57 = vld [vmem:[#allocation7 + $0x374] sm:$0xf0]  ;;  %v5479_v61 = vor.u32 %v6430_v51, %v5478_v50  ;;  %v5442_v62 = vld [vmem:[#allocation7 + $0x48] sm:$0xf] }
 0x154   : > { %v6421_v63 = vld [vmem:[#allocation7 + $0x54] sm:$0xf0] }
 0x156   : > { %2341 = vmatpush.bf16.msrb.mxu0 %v5317_v23  ;;  %2355 = vmatpush.bf16.msrb.mxu1 %v5349_v24  ;;  %v5459_v23 = vor.u32 %v6425_v12, %v5458_v11  ;;  %v5491_v24 = vor.u32 %v6433_v17, %v5490_v16  ;;  %v6429_v11 = vld [vmem:[#allocation7 + $0x154] sm:$0xf0]  ;;  %v5506_v12 = vld [vmem:[#allocation7 + $0x248] sm:$0xf] }
 0x157   : > { %2369 = vmatpush.bf16.msrb.mxu2 %v5381_v27  ;;  %2383 = vmatpush.bf16.msrb.mxu3 %v5413_v28  ;;  %v5523_v27 = vor.u32 %v6441_v20, %v5522_v19  ;;  %v5555_v28 = vor.u32 %v6449_v22, %v5554_v21  ;;  %v6445_v16 = vld [vmem:[#allocation7 + $0x354] sm:$0xf0]  ;;  %v5443_v19 = vor.u32 %v6421_v63, %v5442_v62  ;;  %v5438_v21 = vld [vmem:[#allocation7 + $0x28] sm:$0xf] }
 0x158   : > { %v6420_v22 = vld [vmem:[#allocation7 + $0x34] sm:$0xf0] }
 0x15a   : > { %2342 = vmatpush.bf16.msrb.mxu0 %v5313_v1  ;;  %2356 = vmatpush.bf16.msrb.mxu1 %v5345_v34 }
 0x15b   : > { %2370 = vmatpush.bf16.msrb.mxu2 %v5377_v3  ;;  %2384 = vmatpush.bf16.msrb.mxu3 %v5409_v36  ;;  %v5450_v3 = vld [vmem:[#allocation7 + $0x88] sm:$0xf]  ;;  %v6423_v36 = vld [vmem:[#allocation7 + $0x94] sm:$0xf0] }
 0x15e   : > { %2343 = vmatpush.bf16.msrb.mxu0 %v5309_v42  ;;  %2357 = vmatpush.bf16.msrb.mxu1 %v5341_v45  ;;  %v6447_v42 = vld [vmem:[#allocation7 + $0x394] sm:$0xf0]  ;;  %v5451_v45 = vor.u32 %v6423_v36, %v5450_v3  ;;  %v5466_v36 = vld [vmem:[#allocation7 + $0x108] sm:$0xf] }
 0x15f   : > { %2371 = vmatpush.bf16.msrb.mxu2 %v5373_v48  ;;  %2385 = vmatpush.bf16.msrb.mxu3 %v5405_v49  ;;  %v5515_v48 = vor.u32 %v6439_v41, %v5514_v7  ;;  %v5547_v49 = vor.u32 %v6447_v42, %v5546_v8  ;;  %v6419_v3 = vld [vmem:[#allocation7 + $0x14] sm:$0xf0]  ;;  %v5535_v42 = vor.u32 %v6444_v32, %v5534_v0  ;;  %v5680_v32 = vld [vmem:[#allocation8 + $0x3a8] sm:$0xf] }
 0x160   : > { %v6435_v7 = vld [vmem:[#allocation7 + $0x214] sm:$0xf0] }
 0x161   : > { %v760_v1 = vpop.f32.mrf.mxu0  ;;  %v774_v34 = vpop.f32.mrf.mxu1  ;;  %v6472_v0 = vld [vmem:[#allocation8 + $0x2b4] sm:$0xf0] }
 0x162   : > { %2344 = vmatpush.bf16.msrb.mxu0 %v5305_v59  ;;  %2358 = vmatpush.bf16.msrb.mxu1 %v5337_v60  ;;  %v5447_v60 = vor.u32 %v6422_v47, %v5446_v15  ;;  %v5592_v15 = vld [vmem:[#allocation8 + $0xe8] sm:$0xf]  ;;  %v6458_v47 = vld [vmem:[#allocation8 + $0xf4] sm:$0xf0] }
 0x163   : > { %2372 = vmatpush.bf16.msrb.mxu2 %v5369_v4  ;;  %2386 = vmatpush.bf16.msrb.mxu3 %v5401_v5  ;;  %v775_v4 = vadd.f32 %v774_v34, %v760_v1  ;;  %v5511_v5 = vor.u32 %v6438_v55, %v5510_v52  ;;  %v5656_v52 = vld [vmem:[#allocation8 + $0x2e8] sm:$0xf]  ;;  %v6474_v55 = vld [vmem:[#allocation8 + $0x2f4] sm:$0xf0] }
 0x165   : > { %2345 = vmatmul.bf16.vlgmr.msrb.gmra.mxu0 %v7362_v9  ;;  %2359 = vmatmul.bf16.vlgmr.msrb.gmra.mxu1 %v7364_v18 }
 0x166   : > { %2654 = vmatpush.bf16.msra.mxu0 %v5463_v6  ;;  %2668 = vmatpush.bf16.msra.mxu1 %v5495_v10  ;;  %v5543_v6 = vor.u32 %v6446_v57, %v5542_v56  ;;  %v5474_v10 = vld [vmem:[#allocation7 + $0x148] sm:$0xf]  ;;  %v6482_v57 = vld [vmem:[#allocation8 + $0x3f4] sm:$0xf0] }
 0x167   : > { %2682 = vmatpush.bf16.msra.mxu2 %v5527_v13  ;;  %2696 = vmatpush.bf16.msra.mxu3 %v5559_v14  ;;  %v6437_v13 = vld [vmem:[#allocation7 + $0x254] sm:$0xf0]  ;;  %v5538_v14 = vld [vmem:[#allocation7 + $0x348] sm:$0xf]  ;;  %v5475_v20 = vor.u32 %v6429_v11, %v5474_v10  ;;  %v5657_v10 = vor.u32 %v6474_v55, %v5656_v52 }
 0x168   : > { %2373 = vmatmul.bf16.vlgmr.msrb.gmra.mxu2 %v7366_v43  ;;  %2387 = vmatmul.bf16.vlgmr.msrb.gmra.mxu3 %v7368_v44  ;;  %v788_v53 = vpop.f32.mrf.mxu2  ;;  %v802_v54 = vpop.f32.mrf.mxu3  ;;  %v5539_v25 = vor.u32 %v6445_v16, %v5538_v14  ;;  %v5688_v56 = vld [vmem:[#allocation8 + $0x3e8] sm:$0xf] }
 0x169   : > { %v762_v58 = vpop.f32.mrf.mxu0  ;;  %v776_v59 = vpop.f32.mrf.mxu1  ;;  %v789_v17 = vadd.f32 %v788_v53, %v775_v4  ;;  %v5689_v11 = vor.u32 %v6482_v57, %v5688_v56  ;;  %v5652_v14 = vld [vmem:[#allocation8 + $0x2c8] sm:$0xf] }
 0x16a   : > { %2655 = vmatpush.bf16.msra.mxu0 %v5459_v23  ;;  %2669 = vmatpush.bf16.msra.mxu1 %v5491_v24  ;;  %v777_v23 = vadd.f32 %v776_v59, %v762_v58  ;;  %v5507_v24 = vor.u32 %v6437_v13, %v5506_v12  ;;  %v5499_v59 = vor.u32 %v6435_v7, %v5498_v40  ;;  %v5620_v12 = vld [vmem:[#allocation8 + $0x1c8] sm:$0xf]  ;;  %v6465_v13 = vld [vmem:[#allocation8 + $0x1d4] sm:$0xf0] }
 0x16b   : > { %2683 = vmatpush.bf16.msra.mxu2 %v5523_v27  ;;  %2697 = vmatpush.bf16.msra.mxu3 %v5555_v28  ;;  %v6428_v27 = vld [vmem:[#allocation7 + $0x134] sm:$0xf0]  ;;  %v5502_v28 = vld [vmem:[#allocation7 + $0x228] sm:$0xf]  ;;  %v803_v33 = vadd.f32 %v802_v54, %v789_v17  ;;  %v5467_v54 = vor.u32 %v6427_v39, %v5466_v36 }
 0x16c   : > { %v5503_v8 = vor.u32 %v6436_v31, %v5502_v28  ;;  %v5648_v31 = vld [vmem:[#allocation8 + $0x2a8] sm:$0xf] }
 0x16d   : > { %v807_v50 = vmul.f32 0.088388346, %v803_v33  ;;  %v6480_v33 = vld [vmem:[#allocation8 + $0x3b4] sm:$0xf0]  ;;  %v5649_v39 = vor.u32 %v6472_v0, %v5648_v31  ;;  %v5632_v31 = vld [vmem:[#allocation8 + $0x228] sm:$0xf] }
 0x16e   : > { %2656 = vmatpush.bf16.msra.mxu0 %v5455_v2  ;;  %2670 = vmatpush.bf16.msra.mxu1 %v5487_v35  ;;  %v5434_v35 = vld [vmem:[#allocation7 + $0x8] sm:$0xf]  ;;  %v5681_v40 = vor.u32 %v6480_v33, %v5680_v32  ;;  %v6468_v0 = vld [vmem:[#allocation8 + $0x234] sm:$0xf0] }
 0x16f   : > { %2684 = vmatpush.bf16.msra.mxu2 %v5519_v37  ;;  %2698 = vmatpush.bf16.msra.mxu3 %v5551_v38  ;;  %v5439_v37 = vor.u32 %v6420_v22, %v5438_v21  ;;  %v5471_v38 = vor.u32 %v6428_v27, %v5470_v26  ;;  %v5435_v53 = vor.u32 %v6419_v3, %v5434_v35  ;;  %v6481_v21 = vld [vmem:[#allocation8 + $0x3d4] sm:$0xf0] }
 0x170   : > { %v790_v29 = vpop.f32.mrf.mxu2  ;;  %v804_v30 = vpop.f32.mrf.mxu3 }
 0x171   : > { %v791_v1 = vadd.f32 %v790_v29, %v777_v23  ;;  %v7397_v34 = vpop.f32.mrf.mxu0  ;;  %v7399_v2 = vpop.f32.mrf.mxu1  ;;  %v5621_v23 = vor.u32 %v6465_v13, %v5620_v12  ;;  %v5616_v29 = vld [vmem:[#allocation8 + $0x1a8] sm:$0xf] }
 0x172   : > { %2657 = vmatpush.bf16.msra.mxu0 %v5451_v45  ;;  %2671 = vmatpush.bf16.msra.mxu1 %v5483_v46  ;;  %v5530_v45 = vld [vmem:[#allocation7 + $0x308] sm:$0xf]  ;;  %v6443_v46 = vld [vmem:[#allocation7 + $0x314] sm:$0xf0]  ;;  %v1093_v26 = vadd.f32 %v7399_v2, %v7397_v34 }
 0x173   : > { %2685 = vmatpush.bf16.msra.mxu2 %v5515_v48  ;;  %2699 = vmatpush.bf16.msra.mxu3 %v5547_v49  ;;  %v805_v41 = vadd.f32 %v804_v30, %v791_v1  ;;  %v5624_v48 = vld [vmem:[#allocation8 + $0x1e8] sm:$0xf]  ;;  %v6466_v49 = vld [vmem:[#allocation8 + $0x1f4] sm:$0xf0] }
 0x174   : > { %v5625_v62 = vor.u32 %v6466_v49, %v5624_v48  ;;  %v6464_v30 = vld [vmem:[#allocation8 + $0x1b4] sm:$0xf0]  ;;  %v5604_v13 = vld [vmem:[#allocation8 + $0x148] sm:$0xf] }
 0x175   : > { %v808_v51 = vmul.f32 0.088388346, %v805_v41  ;;  %v5617_v35 = vor.u32 %v6464_v30, %v5616_v29  ;;  %v5612_v41 = vld [vmem:[#allocation8 + $0x188] sm:$0xf]  ;;  %v6460_v30 = vld [vmem:[#allocation8 + $0x134] sm:$0xf0] }
 0x176   : > { %2658 = vmatpush.bf16.msra.mxu0 %v5447_v60  ;;  %2672 = vmatpush.bf16.msra.mxu1 %v5479_v61  ;;  %v5531_v60 = vor.u32 %v6443_v46, %v5530_v45  ;;  %v5593_v61 = vor.u32 %v6458_v47, %v5592_v15  ;;  %v6471_v45 = vld [vmem:[#allocation8 + $0x294] sm:$0xf0]  ;;  %v5676_v46 = vld [vmem:[#allocation8 + $0x388] sm:$0xf] }
 0x177   : > { %2686 = vmatpush.bf16.msra.mxu2 %v5511_v5  ;;  %2700 = vmatpush.bf16.msra.mxu3 %v5543_v6  ;;  %v6614_v58 = vpack.c.bf16 %v808_v51, %v807_v50  ;;  %v5588_v5 = vld [vmem:[#allocation8 + $0xc8] sm:$0xf]  ;;  %v6457_v6 = vld [vmem:[#allocation8 + $0xd4] sm:$0xf0] }
 0x178   : > { %v1106_v63 = vpop.f32.mrf.mxu2  ;;  %v1120_v4 = vpop.f32.mrf.mxu3  ;;  %v5589_v22 = vor.u32 %v6457_v6, %v5588_v5  ;;  %v6479_v15 = vld [vmem:[#allocation8 + $0x394] sm:$0xf0]  ;;  %v5572_v6 = vld [vmem:[#allocation8 + $0x48] sm:$0xf] }
 0x179   : > { %6615 = vst [vmem:[%s7402_s5] sm:$0xff] %v6614_v58   ;;  %v1080_v16 = vpop.f32.mrf.mxu0  ;;  %v1094_v17 = vpop.f32.mrf.mxu1  ;;  %v1107_v1 = vadd.f32 %v1106_v63, %v1093_v26  ;;  %v5677_v57 = vor.u32 %v6479_v15, %v5676_v46  ;;  %v5608_v58 = vld [vmem:[#allocation8 + $0x168] sm:$0xf]  ;;  %v6478_v63 = vld [vmem:[#allocation8 + $0x374] sm:$0xf0] }
 0x17a   : > { %2659 = vmatpush.bf16.msra.mxu0 %v5443_v19  ;;  %2673 = vmatpush.bf16.msra.mxu1 %v5475_v20  ;;  %v6473_v19 = vld [vmem:[#allocation8 + $0x2d4] sm:$0xf0]  ;;  %v5684_v20 = vld [vmem:[#allocation8 + $0x3c8] sm:$0xf]  ;;  %v1095_v34 = vadd.f32 %v1094_v17, %v1080_v16 }
 0x17b   : > { %2687 = vmatpush.bf16.msra.mxu2 %v5507_v24  ;;  %2701 = vmatpush.bf16.msra.mxu3 %v5539_v25  ;;  %v5584_v24 = vld [vmem:[#allocation8 + $0xa8] sm:$0xf]  ;;  %v6456_v25 = vld [vmem:[#allocation8 + $0xb4] sm:$0xf0]  ;;  %v5653_v27 = vor.u32 %v6473_v19, %v5652_v14  ;;  %v5685_v28 = vor.u32 %v6481_v21, %v5684_v20  ;;  %v1121_v47 = vadd.f32 %v1120_v4, %v1107_v1 }
 0x17c   : > { %v5585_v2 = vor.u32 %v6456_v25, %v5584_v24  ;;  %v6461_v14 = vld [vmem:[#allocation8 + $0x154] sm:$0xf0]  ;;  %v5636_v16 = vld [vmem:[#allocation8 + $0x248] sm:$0xf] }
 0x17d   : > { %v6469_v20 = vld [vmem:[#allocation8 + $0x254] sm:$0xf0]  ;;  %v5668_v21 = vld [vmem:[#allocation8 + $0x348] sm:$0xf]  ;;  %v5605_v24 = vor.u32 %v6461_v14, %v5604_v13 }
 0x17e   : > { %2660 = vmatpush.bf16.msra.mxu0 %v5439_v37  ;;  %2674 = vmatpush.bf16.msra.mxu1 %v5471_v38  ;;  %v5580_v37 = vld [vmem:[#allocation8 + $0x88] sm:$0xf]  ;;  %v6455_v38 = vld [vmem:[#allocation8 + $0x94] sm:$0xf0] }
 0x17f   : > { %2688 = vmatpush.bf16.msra.mxu2 %v5503_v8  ;;  %2702 = vmatpush.bf16.msra.mxu3 %v5535_v42  ;;  %v6463_v8 = vld [vmem:[#allocation8 + $0x194] sm:$0xf0]  ;;  %v5644_v42 = vld [vmem:[#allocation8 + $0x288] sm:$0xf]  ;;  %v5581_v51 = vor.u32 %v6455_v38, %v5580_v37  ;;  %v5633_v37 = vor.u32 %v6468_v0, %v5632_v31 }
 0x180   : > { %v1108_v3 = vpop.f32.mrf.mxu2  ;;  %v1122_v36 = vpop.f32.mrf.mxu3  ;;  %v5613_v52 = vor.u32 %v6463_v8, %v5612_v41  ;;  %v5645_v56 = vor.u32 %v6471_v45, %v5644_v42  ;;  %v5568_v25 = vld [vmem:[#allocation8 + $0x28] sm:$0xf]  ;;  %v6452_v26 = vld [vmem:[#allocation8 + $0x34] sm:$0xf0] }
 0x181   : > { %v1109_v7 = vadd.f32 %v1108_v3, %v1095_v34  ;;  %v5664_v1 = vld [vmem:[#allocation8 + $0x328] sm:$0xf]  ;;  %v6476_v34 = vld [vmem:[#allocation8 + $0x334] sm:$0xf0]  ;;  %v5569_v3 = vor.u32 %v6452_v26, %v5568_v25 }
 0x182   : > { %2661 = vmatpush.bf16.msra.mxu0 %v5435_v53  ;;  %2675 = vmatpush.bf16.msra.mxu1 %v5467_v54  ;;  %v1394_v49 = vpop.f32.mrf.mxu0  ;;  %v1408_v50 = vpop.f32.mrf.mxu1  ;;  %v5576_v53 = vld [vmem:[#allocation8 + $0x68] sm:$0xf]  ;;  %v6454_v54 = vld [vmem:[#allocation8 + $0x74] sm:$0xf0]  ;;  %v5665_v8 = vor.u32 %v6476_v34, %v5664_v1 }
 0x183   : > { %2689 = vmatpush.bf16.msra.mxu2 %v5499_v59  ;;  %2703 = vmatpush.bf16.msra.mxu3 %v5531_v60  ;;  %v1123_v48 = vadd.f32 %v1122_v36, %v1109_v7  ;;  %v6462_v59 = vld [vmem:[#allocation8 + $0x174] sm:$0xf0]  ;;  %v5640_v60 = vld [vmem:[#allocation8 + $0x268] sm:$0xf]  ;;  %v5577_v4 = vor.u32 %v6454_v54, %v5576_v53 }
 0x184   : > { %v5609_v5 = vor.u32 %v6462_v59, %v5608_v58  ;;  %v6451_v38 = vld [vmem:[#allocation8 + $0x14] sm:$0xf0]  ;;  %v5628_v42 = vld [vmem:[#allocation8 + $0x208] sm:$0xf] }
 0x185   : > { %2662 = vmatmul.bf16.vlgmr.msra.gmra.mxu0 %v7362_v9  ;;  %2676 = vmatmul.bf16.vlgmr.msra.gmra.mxu1 %v7364_v18  ;;  %v6619_v55 = vpack.c.bf16 %v1123_v48, %v1121_v47  ;;  %v6467_v45 = vld [vmem:[#allocation8 + $0x214] sm:$0xf0]  ;;  %v5660_v46 = vld [vmem:[#allocation8 + $0x308] sm:$0xf] }
 0x186   : > { %2973 = vmatpush.bf16.msrb.mxu0 %v5593_v61  ;;  %2987 = vmatpush.bf16.msrb.mxu1 %v5625_v62  ;;  %v6470_v61 = vld [vmem:[#allocation8 + $0x274] sm:$0xf0]  ;;  %v5672_v62 = vld [vmem:[#allocation8 + $0x368] sm:$0xf] }
 0x187   : > { %3001 = vmatpush.bf16.msrb.mxu2 %v5657_v10  ;;  %3015 = vmatpush.bf16.msrb.mxu3 %v5689_v11  ;;  %6620 = vst [vmem:[%s7412_s6] sm:$0xff] %v6619_v55   ;;  %v6453_v10 = vld [vmem:[#allocation8 + $0x54] sm:$0xf0]  ;;  %v5641_v11 = vor.u32 %v6470_v61, %v5640_v60  ;;  %v5673_v12 = vor.u32 %v6478_v63, %v5672_v62  ;;  %v5722_v48 = vld [vmem:[#allocation10 + $0xe8] sm:$0xf] }
 0x188   : > { %2690 = vmatmul.bf16.vlgmr.msra.gmra.mxu2 %v7366_v43  ;;  %2704 = vmatmul.bf16.vlgmr.msra.gmra.mxu3 %v7368_v44  ;;  %v6475_v47 = vld [vmem:[#allocation8 + $0x314] sm:$0xf0]  ;;  %v5786_v53 = vld [vmem:[#allocation10 + $0x2e8] sm:$0xf] }
 0x189   : > { %v6506_v58 = vld [vmem:[#allocation10 + $0x2f4] sm:$0xf0]  ;;  %v5818_v59 = vld [vmem:[#allocation10 + $0x3e8] sm:$0xf]  ;;  %v5661_v63 = vor.u32 %v6475_v47, %v5660_v46 }
 0x18a   : > { %2974 = vmatpush.bf16.msrb.mxu0 %v5589_v22  ;;  %2988 = vmatpush.bf16.msrb.mxu1 %v5621_v23  ;;  %v6477_v22 = vld [vmem:[#allocation8 + $0x354] sm:$0xf0]  ;;  %v5573_v23 = vor.u32 %v6453_v10, %v5572_v6  ;;  %v1396_v32 = vpop.f32.mrf.mxu0  ;;  %v1410_v33 = vpop.f32.mrf.mxu1  ;;  %v5718_v6 = vld [vmem:[#allocation10 + $0xc8] sm:$0xf] }
 0x18b   : > { %3002 = vmatpush.bf16.msrb.mxu2 %v5653_v27  ;;  %3016 = vmatpush.bf16.msrb.mxu3 %v5685_v28  ;;  %v1422_v17 = vpop.f32.mrf.mxu2  ;;  %v1436_v19 = vpop.f32.mrf.mxu3  ;;  %v5600_v27 = vld [vmem:[#allocation8 + $0x128] sm:$0xf]  ;;  %v5637_v28 = vor.u32 %v6469_v20, %v5636_v16  ;;  %v5669_v29 = vor.u32 %v6477_v22, %v5668_v21  ;;  %v1411_v41 = vadd.f32 %v1410_v33, %v1396_v32  ;;  %v6514_v60 = vld [vmem:[#allocation10 + $0x3f4] sm:$0xf0] }
 0x18c   : > { %v5601_v36 = vor.u32 %v6460_v30, %v5600_v27  ;;  %v6489_v10 = vld [vmem:[#allocation10 + $0xd4] sm:$0xf0]  ;;  %v5819_v13 = vor.u32 %v6514_v60, %v5818_v59  ;;  %v5750_v14 = vld [vmem:[#allocation10 + $0x1c8] sm:$0xf] }
 0x18d   : > { %v6497_v16 = vld [vmem:[#allocation10 + $0x1d4] sm:$0xf0]  ;;  %v5814_v21 = vld [vmem:[#allocation10 + $0x3c8] sm:$0xf]  ;;  %v5719_v22 = vor.u32 %v6489_v10, %v5718_v6 }
 0x18e   : > { %2975 = vmatpush.bf16.msrb.mxu0 %v5585_v2  ;;  %2989 = vmatpush.bf16.msrb.mxu1 %v5617_v35  ;;  %v1409_v2 = vadd.f32 %v1408_v50, %v1394_v49  ;;  %v5564_v35 = vld [vmem:[#allocation8 + $0x8] sm:$0xf]  ;;  %v6490_v49 = vld [vmem:[#allocation10 + $0xf4] sm:$0xf0] }
 0x18f   : > { %3003 = vmatpush.bf16.msrb.mxu2 %v5649_v39  ;;  %3017 = vmatpush.bf16.msrb.mxu3 %v5681_v40  ;;  %v5596_v39 = vld [vmem:[#allocation8 + $0x108] sm:$0xf]  ;;  %v6459_v40 = vld [vmem:[#allocation8 + $0x114] sm:$0xf0]  ;;  %v5565_v55 = vor.u32 %v6451_v38, %v5564_v35 }
 0x190   : > { %v1423_v7 = vadd.f32 %v1422_v17, %v1409_v2  ;;  %v5782_v17 = vld [vmem:[#allocation10 + $0x2c8] sm:$0xf]  ;;  %v6505_v20 = vld [vmem:[#allocation10 + $0x2d4] sm:$0xf0] }
 0x191   : > { %v6488_v25 = vld [vmem:[#allocation10 + $0xb4] sm:$0xf0]  ;;  %v5783_v26 = vor.u32 %v6505_v20, %v5782_v17  ;;  %v5778_v30 = vld [vmem:[#allocation10 + $0x2a8] sm:$0xf] }
 0x192   : > { %2976 = vmatpush.bf16.msrb.mxu0 %v5581_v51  ;;  %2990 = vmatpush.bf16.msrb.mxu1 %v5613_v52  ;;  %v5754_v51 = vld [vmem:[#allocation10 + $0x1e8] sm:$0xf]  ;;  %v6498_v52 = vld [vmem:[#allocation10 + $0x1f4] sm:$0xf0]  ;;  %v1437_v61 = vadd.f32 %v1436_v19, %v1423_v7 }
 0x193   : > { %3004 = vmatpush.bf16.msrb.mxu2 %v5645_v56  ;;  %3018 = vmatpush.bf16.msrb.mxu3 %v5677_v57  ;;  %v1424_v15 = vpop.f32.mrf.mxu2  ;;  %v1438_v54 = vpop.f32.mrf.mxu3  ;;  %v5597_v56 = vor.u32 %v6459_v40, %v5596_v39  ;;  %v5629_v57 = vor.u32 %v6467_v45, %v5628_v42  ;;  %v6513_v19 = vld [vmem:[#allocation10 + $0x3d4] sm:$0xf0]  ;;  %v5810_v0 = vld [vmem:[#allocation10 + $0x3a8] sm:$0xf] }
 0x194   : > { %v1425_v50 = vadd.f32 %v1424_v15, %v1411_v41  ;;  %v5815_v27 = vor.u32 %v6513_v19, %v5814_v21  ;;  %v6504_v31 = vld [vmem:[#allocation10 + $0x2b4] sm:$0xf0]  ;;  %v5710_v34 = vld [vmem:[#allocation10 + $0x88] sm:$0xf] }
 0x195   : > { %v6512_v32 = vld [vmem:[#allocation10 + $0x3b4] sm:$0xf0]  ;;  %v5779_v35 = vor.u32 %v6504_v31, %v5778_v30  ;;  %v5774_v38 = vld [vmem:[#allocation10 + $0x288] sm:$0xf] }
 0x196   : > { %2977 = vmatpush.bf16.msrb.mxu0 %v5577_v4  ;;  %2991 = vmatpush.bf16.msrb.mxu1 %v5609_v5  ;;  %v1439_v62 = vadd.f32 %v1438_v54, %v1425_v50  ;;  %v5723_v4 = vor.u32 %v6490_v49, %v5722_v48  ;;  %v5755_v5 = vor.u32 %v6498_v52, %v5754_v51  ;;  %v6487_v2 = vld [vmem:[#allocation10 + $0x94] sm:$0xf0]  ;;  %v5806_v40 = vld [vmem:[#allocation10 + $0x388] sm:$0xf] }
 0x197   : > { %3005 = vmatpush.bf16.msrb.mxu2 %v5641_v11  ;;  %3019 = vmatpush.bf16.msrb.mxu3 %v5673_v12  ;;  %v5787_v12 = vor.u32 %v6506_v58, %v5786_v53  ;;  %v6503_v39 = vld [vmem:[#allocation10 + $0x294] sm:$0xf0]  ;;  %v5711_v42 = vor.u32 %v6487_v2, %v5710_v34  ;;  %v5706_v46 = vld [vmem:[#allocation10 + $0x68] sm:$0xf] }
 0x198   : > { %v6624_v11 = vpack.c.bf16 %v1439_v62, %v1437_v61  ;;  %v6511_v7 = vld [vmem:[#allocation10 + $0x394] sm:$0xf0]  ;;  %v5775_v47 = vor.u32 %v6503_v39, %v5774_v38  ;;  %v5738_v49 = vld [vmem:[#allocation10 + $0x168] sm:$0xf] }
 0x199   : > { %v6486_v15 = vld [vmem:[#allocation10 + $0x74] sm:$0xf0]  ;;  %v5807_v48 = vor.u32 %v6511_v7, %v5806_v40  ;;  %v5770_v51 = vld [vmem:[#allocation10 + $0x268] sm:$0xf]  ;;  %v5852_v40 = vld [vmem:[#allocation7 + $0xec] sm:$0xf] }
 0x19a   : > { %2978 = vmatpush.bf16.msrb.mxu0 %v5573_v23  ;;  %2992 = vmatpush.bf16.msrb.mxu1 %v5605_v24  ;;  %6625 = vst [vmem:[%s7416_s11] sm:$0xff] %v6624_v11   ;;  %v5751_v23 = vor.u32 %v6497_v16, %v5750_v14  ;;  %v5714_v24 = vld [vmem:[#allocation10 + $0xa8] sm:$0xf]  ;;  %v6494_v50 = vld [vmem:[#allocation10 + $0x174] sm:$0xf0]  ;;  %v6522_v7 = vld [vmem:[#allocation7 + $0xf8] sm:$0xf0] }
 0x19b   : > { %3006 = vmatpush.bf16.msrb.mxu2 %v5637_v28  ;;  %3020 = vmatpush.bf16.msrb.mxu3 %v5669_v29  ;;  %v5746_v28 = vld [vmem:[#allocation10 + $0x1a8] sm:$0xf]  ;;  %v6496_v29 = vld [vmem:[#allocation10 + $0x1b4] sm:$0xf0]  ;;  %v5715_v33 = vor.u32 %v6488_v25, %v5714_v24 }
 0x19c   : > { %v5747_v1 = vor.u32 %v6496_v29, %v5746_v28  ;;  %v6502_v52 = vld [vmem:[#allocation10 + $0x274] sm:$0xf0]  ;;  %v5802_v53 = vld [vmem:[#allocation10 + $0x368] sm:$0xf] }
 0x19d   : > { %v6510_v54 = vld [vmem:[#allocation10 + $0x374] sm:$0xf0]  ;;  %v5771_v59 = vor.u32 %v6502_v52, %v5770_v51  ;;  %v5734_v61 = vld [vmem:[#allocation10 + $0x148] sm:$0xf]  ;;  %v6546_v51 = vld [vmem:[#allocation7 + $0x3f8] sm:$0xf0] }
 0x19e   : > { %2979 = vmatpush.bf16.msrb.mxu0 %v5569_v3  ;;  %2993 = vmatpush.bf16.msrb.mxu1 %v5601_v36  ;;  %v5811_v3 = vor.u32 %v6512_v32, %v5810_v0  ;;  %v5742_v36 = vld [vmem:[#allocation10 + $0x188] sm:$0xf]  ;;  %v6485_v58 = vld [vmem:[#allocation10 + $0x54] sm:$0xf0]  ;;  %v5803_v60 = vor.u32 %v6510_v54, %v5802_v53 }
 0x19f   : > { %3007 = vmatpush.bf16.msrb.mxu2 %v5633_v37  ;;  %3021 = vmatpush.bf16.msrb.mxu3 %v5665_v8  ;;  %v6495_v37 = vld [vmem:[#allocation10 + $0x194] sm:$0xf0]  ;;  %v5798_v10 = vld [vmem:[#allocation10 + $0x348] sm:$0xf] }
 0x1a0   : > { %v5743_v45 = vor.u32 %v6495_v37, %v5742_v36  ;;  %v6493_v62 = vld [vmem:[#allocation10 + $0x154] sm:$0xf0]  ;;  %v5698_v14 = vld [vmem:[#allocation10 + $0x28] sm:$0xf] }
 0x1a1   : > { %v6501_v6 = vld [vmem:[#allocation10 + $0x254] sm:$0xf0]  ;;  %v5730_v19 = vld [vmem:[#allocation10 + $0x128] sm:$0xf] }
 0x1a2   : > { %2980 = vmatpush.bf16.msrb.mxu0 %v5565_v55  ;;  %2994 = vmatpush.bf16.msrb.mxu1 %v5597_v56  ;;  %v1710_v41 = vpop.f32.mrf.mxu0  ;;  %v1724_v8 = vpop.f32.mrf.mxu1  ;;  %v5707_v55 = vor.u32 %v6486_v15, %v5706_v46  ;;  %v5739_v56 = vor.u32 %v6494_v50, %v5738_v49  ;;  %v6509_v11 = vld [vmem:[#allocation10 + $0x354] sm:$0xf0]  ;;  %v5694_v30 = vld [vmem:[#allocation10 + $0x8] sm:$0xf]  ;;  %v5916_v46 = vld [vmem:[#allocation7 + $0x2ec] sm:$0xf] }
 0x1a3   : > { %3008 = vmatpush.bf16.msrb.mxu2 %v5629_v57  ;;  %3022 = vmatpush.bf16.msrb.mxu3 %v5661_v63  ;;  %v5702_v57 = vld [vmem:[#allocation10 + $0x48] sm:$0xf]  ;;  %v6484_v16 = vld [vmem:[#allocation10 + $0x34] sm:$0xf0]  ;;  %v1725_v17 = vadd.f32 %v1724_v8, %v1710_v41  ;;  %v5799_v21 = vor.u32 %v6509_v11, %v5798_v10  ;;  %v6538_v49 = vld [vmem:[#allocation7 + $0x2f8] sm:$0xf0] }
 0x1a4   : > { %v5766_v63 = vld [vmem:[#allocation10 + $0x248] sm:$0xf]  ;;  %v6508_v28 = vld [vmem:[#allocation10 + $0x334] sm:$0xf0]  ;;  %v5699_v31 = vor.u32 %v6484_v16, %v5698_v14  ;;  %v5948_v50 = vld [vmem:[#allocation7 + $0x3ec] sm:$0xf] }
 0x1a5   : > { %2981 = vmatmul.bf16.vlgmr.msrb.gmra.mxu0 %v7362_v9  ;;  %2995 = vmatmul.bf16.vlgmr.msrb.gmra.mxu1 %v7364_v18  ;;  %v5767_v20 = vor.u32 %v6501_v6, %v5766_v63  ;;  %v6483_v32 = vld [vmem:[#allocation10 + $0x14] sm:$0xf0]  ;;  %v5790_v37 = vld [vmem:[#allocation10 + $0x308] sm:$0xf]  ;;  %v5917_v63 = vor.u32 %v6538_v49, %v5916_v46  ;;  %v6537_v6 = vld [vmem:[#allocation7 + $0x2d8] sm:$0xf0] }
 0x1a6   : > { %3290 = vmatpush.bf16.msra.mxu0 %v5723_v4  ;;  %3304 = vmatpush.bf16.msra.mxu1 %v5755_v5  ;;  %v6499_v36 = vld [vmem:[#allocation10 + $0x214] sm:$0xf0]  ;;  %v5944_v10 = vld [vmem:[#allocation7 + $0x3cc] sm:$0xf]  ;;  %v6545_v11 = vld [vmem:[#allocation7 + $0x3d8] sm:$0xf0] }
 0x1a7   : > { %3318 = vmatpush.bf16.msra.mxu2 %v5787_v12  ;;  %3332 = vmatpush.bf16.msra.mxu3 %v5819_v13  ;;  %v5703_v12 = vor.u32 %v6485_v58, %v5702_v57  ;;  %v5735_v13 = vor.u32 %v6493_v62, %v5734_v61  ;;  %v6507_v39 = vld [vmem:[#allocation10 + $0x314] sm:$0xf0]  ;;  %v6521_v58 = vld [vmem:[#allocation7 + $0xd8] sm:$0xf0]  ;;  %v5844_v16 = vld [vmem:[#allocation7 + $0xac] sm:$0xf] }
 0x1a8   : > { %3009 = vmatmul.bf16.vlgmr.msrb.gmra.mxu2 %v7366_v43  ;;  %3023 = vmatmul.bf16.vlgmr.msrb.gmra.mxu3 %v7368_v44  ;;  %v5791_v54 = vor.u32 %v6507_v39, %v5790_v37  ;;  %v5836_v39 = vld [vmem:[#allocation7 + $0x6c] sm:$0xf]  ;;  %v6534_v46 = vld [vmem:[#allocation7 + $0x278] sm:$0xf0] }
 0x1aa   : > { %3291 = vmatpush.bf16.msra.mxu0 %v5719_v22  ;;  %3305 = vmatpush.bf16.msra.mxu1 %v5751_v23  ;;  %v6492_v22 = vld [vmem:[#allocation10 + $0x134] sm:$0xf0]  ;;  %v5762_v23 = vld [vmem:[#allocation10 + $0x228] sm:$0xf]  ;;  %v1712_v24 = vpop.f32.mrf.mxu0  ;;  %v1726_v25 = vpop.f32.mrf.mxu1 }
 0x1ab   : > { %3319 = vmatpush.bf16.msra.mxu2 %v5783_v26  ;;  %3333 = vmatpush.bf16.msra.mxu3 %v5815_v27  ;;  %v1738_v4 = vpop.f32.mrf.mxu2  ;;  %v1752_v5 = vpop.f32.mrf.mxu3  ;;  %v6500_v26 = vld [vmem:[#allocation10 + $0x234] sm:$0xf0]  ;;  %v5794_v27 = vld [vmem:[#allocation10 + $0x328] sm:$0xf]  ;;  %v5731_v0 = vor.u32 %v6492_v22, %v5730_v19  ;;  %v1727_v34 = vadd.f32 %v1726_v25, %v1712_v24  ;;  %v5945_v19 = vor.u32 %v6545_v11, %v5944_v10  ;;  %v6528_v22 = vld [vmem:[#allocation7 + $0x1b8] sm:$0xf0] }
 0x1ac   : > { %v1739_v29 = vadd.f32 %v1738_v4, %v1725_v17  ;;  %v5763_v2 = vor.u32 %v6500_v26, %v5762_v23  ;;  %v5949_v4 = vor.u32 %v6546_v51, %v5948_v50  ;;  %v6520_v17 = vld [vmem:[#allocation7 + $0xb8] sm:$0xf0]  ;;  %v5908_v23 = vld [vmem:[#allocation7 + $0x2ac] sm:$0xf] }
 0x1ad   : > { %v6536_v24 = vld [vmem:[#allocation7 + $0x2b8] sm:$0xf0]  ;;  %v5940_v25 = vld [vmem:[#allocation7 + $0x3ac] sm:$0xf] }
 0x1ae   : > { %3292 = vmatpush.bf16.msra.mxu0 %v5715_v33  ;;  %3306 = vmatpush.bf16.msra.mxu1 %v5747_v1  ;;  %v5726_v33 = vld [vmem:[#allocation10 + $0x108] sm:$0xf]  ;;  %v6491_v1 = vld [vmem:[#allocation10 + $0x114] sm:$0xf0]  ;;  %v1753_v41 = vadd.f32 %v1752_v5, %v1739_v29  ;;  %v5912_v5 = vld [vmem:[#allocation7 + $0x2cc] sm:$0xf] }
 0x1af   : > { %3320 = vmatpush.bf16.msra.mxu2 %v5779_v35  ;;  %3334 = vmatpush.bf16.msra.mxu3 %v5811_v3  ;;  %v5795_v35 = vor.u32 %v6508_v28, %v5794_v27  ;;  %v5758_v3 = vld [vmem:[#allocation10 + $0x208] sm:$0xf]  ;;  %v6544_v26 = vld [vmem:[#allocation7 + $0x3b8] sm:$0xf0]  ;;  %v5845_v27 = vor.u32 %v6520_v17, %v5844_v16  ;;  %v5840_v29 = vld [vmem:[#allocation7 + $0x8c] sm:$0xf] }
 0x1b0   : > { %v5759_v53 = vor.u32 %v6499_v36, %v5758_v3  ;;  %v1757_v61 = vmul.f32 0.088388346, %v1753_v41  ;;  %v5832_v50 = vld [vmem:[#allocation7 + $0x4c] sm:$0xf]  ;;  %v6517_v51 = vld [vmem:[#allocation7 + $0x58] sm:$0xf0] }
 0x1b2   : > { %3293 = vmatpush.bf16.msra.mxu0 %v5711_v42  ;;  %3307 = vmatpush.bf16.msra.mxu1 %v5743_v45  ;;  %v5884_v42 = vld [vmem:[#allocation7 + $0x1ec] sm:$0xf]  ;;  %v6530_v45 = vld [vmem:[#allocation7 + $0x1f8] sm:$0xf0] }
 0x1b3   : > { %3321 = vmatpush.bf16.msra.mxu2 %v5775_v47  ;;  %3335 = vmatpush.bf16.msra.mxu3 %v5807_v48  ;;  %v1740_v38 = vpop.f32.mrf.mxu2  ;;  %v1754_v15 = vpop.f32.mrf.mxu3  ;;  %v5695_v47 = vor.u32 %v6483_v32, %v5694_v30  ;;  %v5727_v48 = vor.u32 %v6491_v1, %v5726_v33  ;;  %v5885_v57 = vor.u32 %v6530_v45, %v5884_v42  ;;  %v6519_v30 = vld [vmem:[#allocation7 + $0x98] sm:$0xf0]  ;;  %v5872_v32 = vld [vmem:[#allocation7 + $0x18c] sm:$0xf] }
 0x1b4   : > { %v1741_v8 = vadd.f32 %v1740_v38, %v1727_v34  ;;  %v6527_v33 = vld [vmem:[#allocation7 + $0x198] sm:$0xf0]  ;;  %v5904_v1 = vld [vmem:[#allocation7 + $0x28c] sm:$0xf]  ;;  %v5841_v37 = vor.u32 %v6519_v30, %v5840_v29 }
 0x1b5   : > { %v6535_v34 = vld [vmem:[#allocation7 + $0x298] sm:$0xf0]  ;;  %v5873_v38 = vor.u32 %v6527_v33, %v5872_v32  ;;  %v5900_v45 = vld [vmem:[#allocation7 + $0x26c] sm:$0xf] }
 0x1b6   : > { %3294 = vmatpush.bf16.msra.mxu0 %v5707_v55  ;;  %3308 = vmatpush.bf16.msra.mxu1 %v5739_v56  ;;  %v1755_v52 = vadd.f32 %v1754_v15, %v1741_v8  ;;  %v5848_v55 = vld [vmem:[#allocation7 + $0xcc] sm:$0xf]  ;;  %v5853_v56 = vor.u32 %v6522_v7, %v5852_v40  ;;  %v6518_v40 = vld [vmem:[#allocation7 + $0x78] sm:$0xf0]  ;;  %v5905_v7 = vor.u32 %v6535_v34, %v5904_v1 }
 0x1b7   : > { %3322 = vmatpush.bf16.msra.mxu2 %v5771_v59  ;;  %3336 = vmatpush.bf16.msra.mxu3 %v5803_v60  ;;  %v5880_v59 = vld [vmem:[#allocation7 + $0x1cc] sm:$0xf]  ;;  %v6529_v60 = vld [vmem:[#allocation7 + $0x1d8] sm:$0xf0] }
 0x1b8   : > { %v1758_v62 = vmul.f32 0.088388346, %v1755_v52  ;;  %v5881_v14 = vor.u32 %v6529_v60, %v5880_v59  ;;  %v5868_v8 = vld [vmem:[#allocation7 + $0x16c] sm:$0xf]  ;;  %v6526_v42 = vld [vmem:[#allocation7 + $0x178] sm:$0xf0]  ;;  %v5901_v52 = vor.u32 %v6534_v46, %v5900_v45 }
 0x1b9   : > { %v5932_v15 = vld [vmem:[#allocation7 + $0x36c] sm:$0xf]  ;;  %v5869_v49 = vor.u32 %v6526_v42, %v5868_v8  ;;  %v6533_v59 = vld [vmem:[#allocation7 + $0x258] sm:$0xf0] }
 0x1ba   : > { %3295 = vmatpush.bf16.msra.mxu0 %v5703_v12  ;;  %3309 = vmatpush.bf16.msra.mxu1 %v5735_v13  ;;  %v6629_v12 = vpack.c.bf16 %v1758_v62, %v1757_v61  ;;  %v5849_v13 = vor.u32 %v6521_v58, %v5848_v55  ;;  %v6525_v55 = vld [vmem:[#allocation7 + $0x158] sm:$0xf0]  ;;  %v5928_v60 = vld [vmem:[#allocation7 + $0x34c] sm:$0xf]  ;;  %v5833_v62 = vor.u32 %v6517_v51, %v5832_v50 }
 0x1bb   : > { %3323 = vmatpush.bf16.msra.mxu2 %v5767_v20  ;;  %3337 = vmatpush.bf16.msra.mxu3 %v5799_v21  ;;  %v5876_v20 = vld [vmem:[#allocation7 + $0x1ac] sm:$0xf]  ;;  %v5913_v21 = vor.u32 %v6537_v6, %v5912_v5  ;;  %v6541_v61 = vld [vmem:[#allocation7 + $0x358] sm:$0xf0] }
 0x1bc   : > { %6671 = vst [vmem:[%s7402_s5 + $0x8] sm:$0xff] %v6629_v12   ;;  %v5877_v28 = vor.u32 %v6528_v22, %v5876_v20  ;;  %v6516_v5 = vld [vmem:[#allocation7 + $0x38] sm:$0xf0]  ;;  %v5860_v6 = vld [vmem:[#allocation7 + $0x12c] sm:$0xf]  ;;  %v5929_v11 = vor.u32 %v6541_v61, %v5928_v60 }
 0x1bd   : > { %v6524_v12 = vld [vmem:[#allocation7 + $0x138] sm:$0xf0]  ;;  %v5924_v20 = vld [vmem:[#allocation7 + $0x32c] sm:$0xf] }
 0x1be   : > { %3296 = vmatpush.bf16.msra.mxu0 %v5699_v31  ;;  %3310 = vmatpush.bf16.msra.mxu1 %v5731_v0  ;;  %v5909_v31 = vor.u32 %v6536_v24, %v5908_v23  ;;  %v5941_v0 = vor.u32 %v6544_v26, %v5940_v25  ;;  %v5824_v22 = vld [vmem:[#allocation7 + $0xc] sm:$0xf]  ;;  %v5861_v24 = vor.u32 %v6524_v12, %v5860_v6  ;;  %v6515_v26 = vld [vmem:[#allocation7 + $0x18] sm:$0xf0] }
 0x1bf   : > { %3324 = vmatpush.bf16.msra.mxu2 %v5763_v2  ;;  %3338 = vmatpush.bf16.msra.mxu3 %v5795_v35  ;;  %v5936_v2 = vld [vmem:[#allocation7 + $0x38c] sm:$0xf]  ;;  %v6543_v35 = vld [vmem:[#allocation7 + $0x398] sm:$0xf0] }
 0x1c0   : > { %v5937_v41 = vor.u32 %v6543_v35, %v5936_v2  ;;  %v6531_v32 = vld [vmem:[#allocation7 + $0x218] sm:$0xf0]  ;;  %v5920_v33 = vld [vmem:[#allocation7 + $0x30c] sm:$0xf] }
 0x1c1   : > { %v6539_v34 = vld [vmem:[#allocation7 + $0x318] sm:$0xf0]  ;;  %v5982_v2 = vld [vmem:[#allocation8 + $0xec] sm:$0xf] }
 0x1c2   : > { %3297 = vmatpush.bf16.msra.mxu0 %v5695_v47  ;;  %3311 = vmatpush.bf16.msra.mxu1 %v5727_v48  ;;  %v2029_v3 = vpop.f32.mrf.mxu0  ;;  %v2043_v36 = vpop.f32.mrf.mxu1  ;;  %v6542_v47 = vld [vmem:[#allocation7 + $0x378] sm:$0xf0]  ;;  %v5837_v48 = vor.u32 %v6518_v40, %v5836_v39  ;;  %v5825_v40 = vor.u32 %v6515_v26, %v5824_v22  ;;  %v6078_v42 = vld [vmem:[#allocation8 + $0x3ec] sm:$0xf] }
 0x1c3   : > { %3325 = vmatpush.bf16.msra.mxu2 %v5759_v53  ;;  %3339 = vmatpush.bf16.msra.mxu3 %v5791_v54  ;;  %v5933_v53 = vor.u32 %v6542_v47, %v5932_v15  ;;  %v5864_v54 = vld [vmem:[#allocation7 + $0x14c] sm:$0xf]  ;;  %v6554_v35 = vld [vmem:[#allocation8 + $0xf8] sm:$0xf0]  ;;  %v5921_v47 = vor.u32 %v6539_v34, %v5920_v33 }
 0x1c4   : > { %v6570_v8 = vld [vmem:[#allocation8 + $0x2f8] sm:$0xf0]  ;;  %v5978_v50 = vld [vmem:[#allocation8 + $0xcc] sm:$0xf] }
 0x1c5   : > { %3298 = vmatmul.bf16.vlgmr.msra.gmra.mxu0 %v7362_v9  ;;  %3312 = vmatmul.bf16.vlgmr.msra.gmra.mxu1 %v7364_v18  ;;  %v6578_v45 = vld [vmem:[#allocation8 + $0x3f8] sm:$0xf0]  ;;  %v6074_v60 = vld [vmem:[#allocation8 + $0x3cc] sm:$0xf] }
 0x1c6   : > { %3607 = vmatpush.bf16.msrb.mxu0 %v5853_v56  ;;  %3621 = vmatpush.bf16.msrb.mxu1 %v5885_v57  ;;  %v5896_v56 = vld [vmem:[#allocation7 + $0x24c] sm:$0xf]  ;;  %v6553_v51 = vld [vmem:[#allocation8 + $0xd8] sm:$0xf0] }
 0x1c7   : > { %3635 = vmatpush.bf16.msrb.mxu2 %v5917_v63  ;;  %3649 = vmatpush.bf16.msrb.mxu3 %v5949_v4  ;;  %v5865_v63 = vor.u32 %v6525_v55, %v5864_v54  ;;  %v5828_v4 = vld [vmem:[#allocation7 + $0x2c] sm:$0xf]  ;;  %v5897_v10 = vor.u32 %v6533_v59, %v5896_v56  ;;  %v6079_v54 = vor.u32 %v6578_v45, %v6078_v42  ;;  %v6561_v56 = vld [vmem:[#allocation8 + $0x1d8] sm:$0xf0] }
 0x1c8   : > { %3326 = vmatmul.bf16.vlgmr.msra.gmra.mxu2 %v7366_v43  ;;  %3340 = vmatmul.bf16.vlgmr.msra.gmra.mxu3 %v7368_v44  ;;  %v5829_v23 = vor.u32 %v6516_v5, %v5828_v4  ;;  %v6010_v55 = vld [vmem:[#allocation8 + $0x1cc] sm:$0xf]  ;;  %v6569_v59 = vld [vmem:[#allocation8 + $0x2d8] sm:$0xf0]  ;;  %v5979_v61 = vor.u32 %v6553_v51, %v5978_v50 }
 0x1c9   : > { %v6552_v4 = vld [vmem:[#allocation8 + $0xb8] sm:$0xf0]  ;;  %v6038_v12 = vld [vmem:[#allocation8 + $0x2ac] sm:$0xf] }
 0x1ca   : > { %3608 = vmatpush.bf16.msrb.mxu0 %v5849_v13  ;;  %3622 = vmatpush.bf16.msrb.mxu1 %v5881_v14  ;;  %v5892_v13 = vld [vmem:[#allocation7 + $0x22c] sm:$0xf]  ;;  %v6532_v14 = vld [vmem:[#allocation7 + $0x238] sm:$0xf0]  ;;  %v2031_v16 = vpop.f32.mrf.mxu0  ;;  %v2045_v17 = vpop.f32.mrf.mxu1 }
 0x1cb   : > { %3636 = vmatpush.bf16.msrb.mxu2 %v5913_v21  ;;  %3650 = vmatpush.bf16.msrb.mxu3 %v5945_v19  ;;  %v2057_v57 = vpop.f32.mrf.mxu2  ;;  %v2071_v58 = vpop.f32.mrf.mxu3  ;;  %v6540_v21 = vld [vmem:[#allocation7 + $0x338] sm:$0xf0]  ;;  %v2044_v19 = vadd.f32 %v2043_v36, %v2029_v3  ;;  %v5893_v25 = vor.u32 %v6532_v14, %v5892_v13  ;;  %v2046_v30 = vadd.f32 %v2045_v17, %v2031_v16  ;;  %v6014_v36 = vld [vmem:[#allocation8 + $0x1ec] sm:$0xf] }
 0x1cc   : > { %v6568_v13 = vld [vmem:[#allocation8 + $0x2b8] sm:$0xf0]  ;;  %v6070_v14 = vld [vmem:[#allocation8 + $0x3ac] sm:$0xf] }
 0x1cd   : > { %v2058_v29 = vadd.f32 %v2057_v57, %v2044_v19  ;;  %v6042_v57 = vld [vmem:[#allocation8 + $0x2cc] sm:$0xf]  ;;  %v6576_v16 = vld [vmem:[#allocation8 + $0x3b8] sm:$0xf0]  ;;  %v6039_v22 = vor.u32 %v6568_v13, %v6038_v12 }
 0x1ce   : > { %3609 = vmatpush.bf16.msrb.mxu0 %v5845_v27  ;;  %3623 = vmatpush.bf16.msrb.mxu1 %v5877_v28  ;;  %v5856_v27 = vld [vmem:[#allocation7 + $0x10c] sm:$0xf]  ;;  %v6523_v28 = vld [vmem:[#allocation7 + $0x118] sm:$0xf0]  ;;  %v6043_v5 = vor.u32 %v6569_v59, %v6042_v57 }
 0x1cf   : > { %3637 = vmatpush.bf16.msrb.mxu2 %v5909_v31  ;;  %3651 = vmatpush.bf16.msrb.mxu3 %v5941_v0  ;;  %v5925_v31 = vor.u32 %v6540_v21, %v5924_v20  ;;  %v5888_v0 = vld [vmem:[#allocation7 + $0x20c] sm:$0xf]  ;;  %v2072_v46 = vadd.f32 %v2071_v58, %v2058_v29  ;;  %v6577_v58 = vld [vmem:[#allocation8 + $0x3d8] sm:$0xf0] }
 0x1d0   : > { %v6075_v6 = vor.u32 %v6577_v58, %v6074_v60  ;;  %v5970_v21 = vld [vmem:[#allocation8 + $0x8c] sm:$0xf]  ;;  %v6551_v19 = vld [vmem:[#allocation8 + $0x98] sm:$0xf0] }
 0x1d1   : > { %v6034_v26 = vld [vmem:[#allocation8 + $0x28c] sm:$0xf]  ;;  %v6575_v29 = vld [vmem:[#allocation8 + $0x398] sm:$0xf0] }
 0x1d2   : > { %3610 = vmatpush.bf16.msrb.mxu0 %v5841_v37  ;;  %3624 = vmatpush.bf16.msrb.mxu1 %v5873_v38  ;;  %v6562_v37 = vld [vmem:[#allocation8 + $0x1f8] sm:$0xf0]  ;;  %v6046_v38 = vld [vmem:[#allocation8 + $0x2ec] sm:$0xf] }
 0x1d3   : > { %3638 = vmatpush.bf16.msrb.mxu2 %v5905_v7  ;;  %3652 = vmatpush.bf16.msrb.mxu3 %v5937_v41  ;;  %v2059_v1 = vpop.f32.mrf.mxu2  ;;  %v2073_v39 = vpop.f32.mrf.mxu3  ;;  %v5857_v7 = vor.u32 %v6523_v28, %v5856_v27  ;;  %v5889_v41 = vor.u32 %v6531_v32, %v5888_v0  ;;  %v6567_v27 = vld [vmem:[#allocation8 + $0x298] sm:$0xf0]  ;;  %v6066_v28 = vld [vmem:[#allocation8 + $0x38c] sm:$0xf]  ;;  %v5971_v0 = vor.u32 %v6551_v19, %v5970_v21 }
 0x1d4   : > { %v2060_v3 = vadd.f32 %v2059_v1, %v2046_v30  ;;  %v5966_v33 = vld [vmem:[#allocation8 + $0x6c] sm:$0xf]  ;;  %v6550_v1 = vld [vmem:[#allocation8 + $0x78] sm:$0xf0]  ;;  %v6035_v34 = vor.u32 %v6567_v27, %v6034_v26 }
 0x1d5   : > { %v6565_v50 = vld [vmem:[#allocation8 + $0x258] sm:$0xf0]  ;;  %v6058_v51 = vld [vmem:[#allocation8 + $0x34c] sm:$0xf] }
 0x1d6   : > { %3611 = vmatpush.bf16.msrb.mxu0 %v5837_v48  ;;  %3625 = vmatpush.bf16.msrb.mxu1 %v5869_v49  ;;  %v2074_v15 = vadd.f32 %v2073_v39, %v2060_v3  ;;  %v5983_v48 = vor.u32 %v6554_v35, %v5982_v2  ;;  %v6015_v49 = vor.u32 %v6562_v37, %v6014_v36  ;;  %v5998_v35 = vld [vmem:[#allocation8 + $0x16c] sm:$0xf]  ;;  %v6558_v3 = vld [vmem:[#allocation8 + $0x178] sm:$0xf0] }
 0x1d7   : > { %3639 = vmatpush.bf16.msrb.mxu2 %v5901_v52  ;;  %3653 = vmatpush.bf16.msrb.mxu3 %v5933_v53  ;;  %v6047_v53 = vor.u32 %v6570_v8, %v6046_v38  ;;  %v6067_v2 = vor.u32 %v6575_v29, %v6066_v28  ;;  %v6030_v36 = vld [vmem:[#allocation8 + $0x26c] sm:$0xf]  ;;  %v6566_v37 = vld [vmem:[#allocation8 + $0x278] sm:$0xf0] }
 0x1d8   : > { %v6634_v52 = vpack.c.bf16 %v2074_v15, %v2072_v46  ;;  %v6062_v38 = vld [vmem:[#allocation8 + $0x36c] sm:$0xf]  ;;  %v6574_v39 = vld [vmem:[#allocation8 + $0x378] sm:$0xf0]  ;;  %v6031_v42 = vor.u32 %v6566_v37, %v6030_v36 }
 0x1d9   : > { %v6549_v8 = vld [vmem:[#allocation8 + $0x58] sm:$0xf0]  ;;  %v6063_v45 = vor.u32 %v6574_v39, %v6062_v38  ;;  %v5994_v46 = vld [vmem:[#allocation8 + $0x14c] sm:$0xf] }
 0x1da   : > { %3612 = vmatpush.bf16.msrb.mxu0 %v5833_v62  ;;  %3626 = vmatpush.bf16.msrb.mxu1 %v5865_v63  ;;  %6672 = vst [vmem:[%s7412_s6 + $0x8] sm:$0xff] %v6634_v52   ;;  %v6011_v62 = vor.u32 %v6561_v56, %v6010_v55  ;;  %v5974_v63 = vld [vmem:[#allocation8 + $0xac] sm:$0xf]  ;;  %v6557_v15 = vld [vmem:[#allocation8 + $0x158] sm:$0xf0] }
 0x1db   : > { %3640 = vmatpush.bf16.msrb.mxu2 %v5897_v10  ;;  %3654 = vmatpush.bf16.msrb.mxu3 %v5929_v11  ;;  %v6006_v10 = vld [vmem:[#allocation8 + $0x1ac] sm:$0xf]  ;;  %v6560_v11 = vld [vmem:[#allocation8 + $0x1b8] sm:$0xf0]  ;;  %v5975_v17 = vor.u32 %v6552_v4, %v5974_v63 }
 0x1dc   : > { %v6007_v20 = vor.u32 %v6560_v11, %v6006_v10  ;;  %v6573_v52 = vld [vmem:[#allocation8 + $0x358] sm:$0xf0]  ;;  %v5958_v55 = vld [vmem:[#allocation8 + $0x2c] sm:$0xf] }
 0x1dd   : > { %v6548_v56 = vld [vmem:[#allocation8 + $0x38] sm:$0xf0]  ;;  %v5990_v57 = vld [vmem:[#allocation8 + $0x12c] sm:$0xf]  ;;  %v6059_v60 = vor.u32 %v6573_v52, %v6058_v51 }
 0x1de   : > { %3613 = vmatpush.bf16.msrb.mxu0 %v5829_v23  ;;  %3627 = vmatpush.bf16.msrb.mxu1 %v5861_v24  ;;  %v6071_v23 = vor.u32 %v6576_v16, %v6070_v14  ;;  %v6002_v24 = vld [vmem:[#allocation8 + $0x18c] sm:$0xf]  ;;  %v6556_v58 = vld [vmem:[#allocation8 + $0x138] sm:$0xf0]  ;;  %v5959_v12 = vor.u32 %v6548_v56, %v5958_v55 }
 0x1df   : > { %3641 = vmatpush.bf16.msrb.mxu2 %v5893_v25  ;;  %3655 = vmatpush.bf16.msrb.mxu3 %v5925_v31  ;;  %v6559_v25 = vld [vmem:[#allocation8 + $0x198] sm:$0xf0]  ;;  %v5954_v11 = vld [vmem:[#allocation8 + $0xc] sm:$0xf]  ;;  %v5991_v13 = vor.u32 %v6556_v58, %v5990_v57 }
 0x1e0   : > { %v6003_v32 = vor.u32 %v6559_v25, %v6002_v24  ;;  %v6547_v16 = vld [vmem:[#allocation8 + $0x18] sm:$0xf0]  ;;  %v6050_v25 = vld [vmem:[#allocation8 + $0x30c] sm:$0xf] }
 0x1e1   : > { %v6563_v24 = vld [vmem:[#allocation8 + $0x218] sm:$0xf0]  ;;  %v6112_v28 = vld [vmem:[#allocation10 + $0xec] sm:$0xf] }
 0x1e2   : > { %3614 = vmatpush.bf16.msrb.mxu0 %v5825_v40  ;;  %3628 = vmatpush.bf16.msrb.mxu1 %v5857_v7  ;;  %v2346_v30 = vpop.f32.mrf.mxu0  ;;  %v2360_v31 = vpop.f32.mrf.mxu1  ;;  %v5967_v40 = vor.u32 %v6550_v1, %v5966_v33  ;;  %v5999_v7 = vor.u32 %v6558_v3, %v5998_v35  ;;  %v6571_v27 = vld [vmem:[#allocation8 + $0x318] sm:$0xf0]  ;;  %v5955_v1 = vor.u32 %v6547_v16, %v5954_v11  ;;  %v6208_v3 = vld [vmem:[#allocation10 + $0x3ec] sm:$0xf] }
 0x1e3   : > { %3642 = vmatpush.bf16.msrb.mxu2 %v5889_v41  ;;  %3656 = vmatpush.bf16.msrb.mxu3 %v5921_v47  ;;  %v5962_v41 = vld [vmem:[#allocation8 + $0x4c] sm:$0xf]  ;;  %v2361_v10 = vadd.f32 %v2360_v31, %v2346_v30  ;;  %v6586_v29 = vld [vmem:[#allocation10 + $0xf8] sm:$0xf0]  ;;  %v6051_v39 = vor.u32 %v6571_v27, %v6050_v25 }
 0x1e4   : > { %v6026_v47 = vld [vmem:[#allocation8 + $0x24c] sm:$0xf]  ;;  %v6602_v35 = vld [vmem:[#allocation10 + $0x2f8] sm:$0xf0] }
 0x1e5   : > { %3615 = vmatmul.bf16.vlgmr.msrb.gmra.mxu0 %v7362_v9  ;;  %3629 = vmatmul.bf16.vlgmr.msrb.gmra.mxu1 %v7364_v18  ;;  %v6027_v59 = vor.u32 %v6565_v50, %v6026_v47  ;;  %v6144_v31 = vld [vmem:[#allocation10 + $0x1ec] sm:$0xf]  ;;  %v6610_v36 = vld [vmem:[#allocation10 + $0x3f8] sm:$0xf0] }
 0x1e6   : > { %3926 = vmatpush.bf16.msra.mxu0 %v5983_v48  ;;  %3940 = vmatpush.bf16.msra.mxu1 %v6015_v49  ;;  %v6593_v47 = vld [vmem:[#allocation10 + $0x1d8] sm:$0xf0]  ;;  %v6204_v51 = vld [vmem:[#allocation10 + $0x3cc] sm:$0xf] }
 0x1e7   : > { %3954 = vmatpush.bf16.msra.mxu2 %v6047_v53  ;;  %3968 = vmatpush.bf16.msra.mxu3 %v6079_v54  ;;  %v5963_v53 = vor.u32 %v6549_v8, %v5962_v41  ;;  %v5995_v54 = vor.u32 %v6557_v15, %v5994_v46  ;;  %v6108_v41 = vld [vmem:[#allocation10 + $0xcc] sm:$0xf]  ;;  %v6585_v8 = vld [vmem:[#allocation10 + $0xd8] sm:$0xf0]  ;;  %v6209_v46 = vor.u32 %v6610_v36, %v6208_v3 }
 0x1e8   : > { %3643 = vmatmul.bf16.vlgmr.msrb.gmra.mxu2 %v7366_v43  ;;  %3657 = vmatmul.bf16.vlgmr.msrb.gmra.mxu3 %v7368_v44  ;;  %v6140_v15 = vld [vmem:[#allocation10 + $0x1cc] sm:$0xf]  ;;  %v6601_v50 = vld [vmem:[#allocation10 + $0x2d8] sm:$0xf0]  ;;  %v6109_v52 = vor.u32 %v6585_v8, %v6108_v41 }
 0x1e9   : > { %v6584_v55 = vld [vmem:[#allocation10 + $0xb8] sm:$0xf0]  ;;  %v6168_v58 = vld [vmem:[#allocation10 + $0x2ac] sm:$0xf] }
 0x1ea   : > { %3927 = vmatpush.bf16.msra.mxu0 %v5979_v61  ;;  %3941 = vmatpush.bf16.msra.mxu1 %v6011_v62  ;;  %v6022_v61 = vld [vmem:[#allocation8 + $0x22c] sm:$0xf]  ;;  %v6564_v62 = vld [vmem:[#allocation8 + $0x238] sm:$0xf0]  ;;  %v2348_v63 = vpop.f32.mrf.mxu0  ;;  %v2362_v4 = vpop.f32.mrf.mxu1 }
 0x1eb   : > { %3955 = vmatpush.bf16.msra.mxu2 %v6043_v5  ;;  %3969 = vmatpush.bf16.msra.mxu3 %v6075_v6  ;;  %v2374_v48 = vpop.f32.mrf.mxu2  ;;  %v2388_v49 = vpop.f32.mrf.mxu3  ;;  %v6054_v5 = vld [vmem:[#allocation8 + $0x32c] sm:$0xf]  ;;  %v6572_v6 = vld [vmem:[#allocation8 + $0x338] sm:$0xf0]  ;;  %v6023_v14 = vor.u32 %v6564_v62, %v6022_v61  ;;  %v2363_v19 = vadd.f32 %v2362_v4, %v2348_v63 }
 0x1ec   : > { %v2375_v21 = vadd.f32 %v2374_v48, %v2361_v10  ;;  %v6172_v48 = vld [vmem:[#allocation10 + $0x2cc] sm:$0xf]  ;;  %v6600_v61 = vld [vmem:[#allocation10 + $0x2b8] sm:$0xf0] }
 0x1ed   : > { %v6173_v56 = vor.u32 %v6601_v50, %v6172_v48  ;;  %v6200_v62 = vld [vmem:[#allocation10 + $0x3ac] sm:$0xf]  ;;  %v6608_v63 = vld [vmem:[#allocation10 + $0x3b8] sm:$0xf0]  ;;  %v6169_v11 = vor.u32 %v6600_v61, %v6168_v58 }
 0x1ee   : > { %3928 = vmatpush.bf16.msra.mxu0 %v5975_v17  ;;  %3942 = vmatpush.bf16.msra.mxu1 %v6007_v20  ;;  %v5986_v17 = vld [vmem:[#allocation8 + $0x10c] sm:$0xf]  ;;  %v6555_v20 = vld [vmem:[#allocation8 + $0x118] sm:$0xf0]  ;;  %v2389_v37 = vadd.f32 %v2388_v49, %v2375_v21 }
 0x1ef   : > { %3956 = vmatpush.bf16.msra.mxu2 %v6039_v22  ;;  %3970 = vmatpush.bf16.msra.mxu3 %v6071_v23  ;;  %v6055_v22 = vor.u32 %v6572_v6, %v6054_v5  ;;  %v6018_v23 = vld [vmem:[#allocation8 + $0x20c] sm:$0xf]  ;;  %v6609_v49 = vld [vmem:[#allocation10 + $0x3d8] sm:$0xf0] }
 0x1f0   : > { %v6205_v57 = vor.u32 %v6609_v49, %v6204_v51  ;;  %v6100_v6 = vld [vmem:[#allocation10 + $0x8c] sm:$0xf]  ;;  %v6583_v10 = vld [vmem:[#allocation10 + $0x98] sm:$0xf0] }
 0x1f1   : > { %v6164_v16 = vld [vmem:[#allocation10 + $0x28c] sm:$0xf]  ;;  %v6607_v21 = vld [vmem:[#allocation10 + $0x398] sm:$0xf0] }
 0x1f2   : > { %3929 = vmatpush.bf16.msra.mxu0 %v5971_v0  ;;  %3943 = vmatpush.bf16.msra.mxu1 %v6003_v32  ;;  %v6594_v0 = vld [vmem:[#allocation10 + $0x1f8] sm:$0xf0]  ;;  %v6176_v32 = vld [vmem:[#allocation10 + $0x2ec] sm:$0xf] }
 0x1f3   : > { %3957 = vmatpush.bf16.msra.mxu2 %v6035_v34  ;;  %3971 = vmatpush.bf16.msra.mxu3 %v6067_v2  ;;  %v2376_v26 = vpop.f32.mrf.mxu2  ;;  %v2390_v33 = vpop.f32.mrf.mxu3  ;;  %v5987_v34 = vor.u32 %v6555_v20, %v5986_v17  ;;  %v6019_v2 = vor.u32 %v6563_v24, %v6018_v23  ;;  %v6599_v17 = vld [vmem:[#allocation10 + $0x298] sm:$0xf0]  ;;  %v6196_v20 = vld [vmem:[#allocation10 + $0x38c] sm:$0xf]  ;;  %v6101_v23 = vor.u32 %v6583_v10, %v6100_v6 }
 0x1f4   : > { %v2377_v30 = vadd.f32 %v2376_v26, %v2363_v19  ;;  %v6096_v25 = vld [vmem:[#allocation10 + $0x6c] sm:$0xf]  ;;  %v6582_v26 = vld [vmem:[#allocation10 + $0x78] sm:$0xf0]  ;;  %v6165_v27 = vor.u32 %v6599_v17, %v6164_v16 }
 0x1f5   : > { %v6597_v41 = vld [vmem:[#allocation10 + $0x258] sm:$0xf0]  ;;  %v6188_v8 = vld [vmem:[#allocation10 + $0x34c] sm:$0xf] }
 0x1f6   : > { %3930 = vmatpush.bf16.msra.mxu0 %v5967_v40  ;;  %3944 = vmatpush.bf16.msra.mxu1 %v5999_v7  ;;  %v2391_v38 = vadd.f32 %v2390_v33, %v2377_v30  ;;  %v6113_v40 = vor.u32 %v6586_v29, %v6112_v28  ;;  %v6145_v7 = vor.u32 %v6594_v0, %v6144_v31  ;;  %v6128_v29 = vld [vmem:[#allocation10 + $0x16c] sm:$0xf]  ;;  %v6590_v30 = vld [vmem:[#allocation10 + $0x178] sm:$0xf0] }
 0x1f7   : > { %3958 = vmatpush.bf16.msra.mxu2 %v6031_v42  ;;  %3972 = vmatpush.bf16.msra.mxu3 %v6063_v45  ;;  %v6177_v45 = vor.u32 %v6602_v35, %v6176_v32  ;;  %v6197_v28 = vor.u32 %v6607_v21, %v6196_v20  ;;  %v6160_v31 = vld [vmem:[#allocation10 + $0x26c] sm:$0xf]  ;;  %v6598_v0 = vld [vmem:[#allocation10 + $0x278] sm:$0xf0] }
 0x1f8   : > { %v6639_v42 = vpack.c.bf16 %v2391_v38, %v2389_v37  ;;  %v6192_v32 = vld [vmem:[#allocation10 + $0x36c] sm:$0xf]  ;;  %v6606_v33 = vld [vmem:[#allocation10 + $0x378] sm:$0xf0]  ;;  %v6161_v3 = vor.u32 %v6598_v0, %v6160_v31 }
 0x1f9   : > { %v6581_v35 = vld [vmem:[#allocation10 + $0x58] sm:$0xf0]  ;;  %v6193_v36 = vor.u32 %v6606_v33, %v6192_v32  ;;  %v6124_v37 = vld [vmem:[#allocation10 + $0x14c] sm:$0xf] }
 0x1fa   : > { %3931 = vmatpush.bf16.msra.mxu0 %v5963_v53  ;;  %3945 = vmatpush.bf16.msra.mxu1 %v5995_v54  ;;  %6673 = vst [vmem:[%s7416_s11 + $0x8] sm:$0xff] %v6639_v42   ;;  %v6141_v53 = vor.u32 %v6593_v47, %v6140_v15  ;;  %v6104_v54 = vld [vmem:[#allocation10 + $0xac] sm:$0xf]  ;;  %v6589_v38 = vld [vmem:[#allocation10 + $0x158] sm:$0xf0] }
 0x1fb   : > { %3959 = vmatpush.bf16.msra.mxu2 %v6027_v59  ;;  %3973 = vmatpush.bf16.msra.mxu3 %v6059_v60  ;;  %v6136_v59 = vld [vmem:[#allocation10 + $0x1ac] sm:$0xf]  ;;  %v6592_v60 = vld [vmem:[#allocation10 + $0x1b8] sm:$0xf0]  ;;  %v6105_v4 = vor.u32 %v6584_v55, %v6104_v54 }
 0x1fc   : > { %v6137_v5 = vor.u32 %v6592_v60, %v6136_v59  ;;  %v6605_v42 = vld [vmem:[#allocation10 + $0x358] sm:$0xf0]  ;;  %v6088_v15 = vld [vmem:[#allocation10 + $0x2c] sm:$0xf] }
 0x1fd   : > { %v6580_v47 = vld [vmem:[#allocation10 + $0x38] sm:$0xf0]  ;;  %v6189_v51 = vor.u32 %v6605_v42, %v6188_v8  ;;  %v6120_v49 = vld [vmem:[#allocation10 + $0x12c] sm:$0xf] }
 0x1fe   : > { %3932 = vmatpush.bf16.msra.mxu0 %v5959_v12  ;;  %3946 = vmatpush.bf16.msra.mxu1 %v5991_v13  ;;  %v6201_v12 = vor.u32 %v6608_v63, %v6200_v62  ;;  %v6132_v13 = vld [vmem:[#allocation10 + $0x18c] sm:$0xf]  ;;  %v6604_v59 = vld [vmem:[#allocation10 + $0x338] sm:$0xf0]  ;;  %v6089_v58 = vor.u32 %v6580_v47, %v6088_v15 }
 0x1ff   : > { %3960 = vmatpush.bf16.msra.mxu2 %v6023_v14  ;;  %3974 = vmatpush.bf16.msra.mxu3 %v6055_v22  ;;  %v6591_v14 = vld [vmem:[#allocation10 + $0x198] sm:$0xf0]  ;;  %v6084_v62 = vld [vmem:[#allocation10 + $0xc] sm:$0xf] }
 0x200   : > { %v6133_v24 = vor.u32 %v6591_v14, %v6132_v13  ;;  %v6579_v63 = vld [vmem:[#allocation10 + $0x18] sm:$0xf0]  ;;  %v6116_v10 = vld [vmem:[#allocation10 + $0x10c] sm:$0xf] }
 0x201   : > { %v6595_v14 = vld [vmem:[#allocation10 + $0x218] sm:$0xf0]  ;;  %v6180_v16 = vld [vmem:[#allocation10 + $0x30c] sm:$0xf] }
 0x202   : > { %3933 = vmatpush.bf16.msra.mxu0 %v5955_v1  ;;  %3947 = vmatpush.bf16.msra.mxu1 %v5987_v34  ;;  %v2663_v19 = vpop.f32.mrf.mxu0  ;;  %v2677_v22 = vpop.f32.mrf.mxu1  ;;  %v6097_v1 = vor.u32 %v6582_v26, %v6096_v25  ;;  %v6129_v34 = vor.u32 %v6590_v30, %v6128_v29  ;;  %v6603_v17 = vld [vmem:[#allocation10 + $0x318] sm:$0xf0] }
 0x203   : > { %3961 = vmatpush.bf16.msra.mxu2 %v6019_v2  ;;  %3975 = vmatpush.bf16.msra.mxu3 %v6051_v39  ;;  %v6092_v2 = vld [vmem:[#allocation10 + $0x4c] sm:$0xf]  ;;  %v2678_v48 = vadd.f32 %v2677_v22, %v2663_v19  ;;  %v6085_v22 = vor.u32 %v6579_v63, %v6084_v62  ;;  %v6181_v26 = vor.u32 %v6603_v17, %v6180_v16 }
 0x204   : > { %v6156_v39 = vld [vmem:[#allocation10 + $0x24c] sm:$0xf] }
 0x205   : > { %3934 = vmatmul.bf16.vlgmr.msra.gmra.mxu0 %v7362_v9  ;;  %3948 = vmatmul.bf16.vlgmr.msra.gmra.mxu1 %v7364_v18  ;;  %v6157_v50 = vor.u32 %v6597_v41, %v6156_v39 }
 0x206   : > { %4243 = vmatpush.bf16.msrb.mxu0 %v6113_v40  ;;  %4257 = vmatpush.bf16.msrb.mxu1 %v6145_v7 }
 0x207   : > { %4271 = vmatpush.bf16.msrb.mxu2 %v6177_v45  ;;  %4285 = vmatpush.bf16.msrb.mxu3 %v6209_v46  ;;  %v6093_v45 = vor.u32 %v6581_v35, %v6092_v2  ;;  %v6125_v46 = vor.u32 %v6589_v38, %v6124_v37 }
 0x208   : > { %3962 = vmatmul.bf16.vlgmr.msra.gmra.mxu2 %v7366_v43  ;;  %3976 = vmatmul.bf16.vlgmr.msra.gmra.mxu3 %v7368_v44 }
 0x20a   : > { %4244 = vmatpush.bf16.msrb.mxu0 %v6109_v52  ;;  %4258 = vmatpush.bf16.msrb.mxu1 %v6141_v53  ;;  %v6588_v52 = vld [vmem:[#allocation10 + $0x138] sm:$0xf0]  ;;  %v6152_v53 = vld [vmem:[#allocation10 + $0x22c] sm:$0xf]  ;;  %v2665_v54 = vpop.f32.mrf.mxu0  ;;  %v2679_v55 = vpop.f32.mrf.mxu1 }
 0x20b   : > { %4272 = vmatpush.bf16.msrb.mxu2 %v6173_v56  ;;  %4286 = vmatpush.bf16.msrb.mxu3 %v6205_v57  ;;  %v2691_v40 = vpop.f32.mrf.mxu2  ;;  %v2705_v7 = vpop.f32.mrf.mxu3  ;;  %v6596_v56 = vld [vmem:[#allocation10 + $0x238] sm:$0xf0]  ;;  %v6184_v57 = vld [vmem:[#allocation10 + $0x32c] sm:$0xf]  ;;  %v6121_v61 = vor.u32 %v6588_v52, %v6120_v49 }
 0x20c   : > { %v2692_v60 = vadd.f32 %v2691_v40, %v2678_v48  ;;  %v6185_v6 = vor.u32 %v6604_v59, %v6184_v57 }
 0x20e   : > { %4245 = vmatpush.bf16.msrb.mxu0 %v6105_v4  ;;  %4259 = vmatpush.bf16.msrb.mxu1 %v6137_v5  ;;  %v2680_v4 = vadd.f32 %v2679_v55, %v2665_v54  ;;  %v6153_v5 = vor.u32 %v6596_v56, %v6152_v53  ;;  %v2706_v20 = vadd.f32 %v2705_v7, %v2692_v60 }
 0x20f   : > { %4273 = vmatpush.bf16.msrb.mxu2 %v6169_v11  ;;  %4287 = vmatpush.bf16.msrb.mxu3 %v6201_v12  ;;  %v6587_v11 = vld [vmem:[#allocation10 + $0x118] sm:$0xf0]  ;;  %v6148_v12 = vld [vmem:[#allocation10 + $0x20c] sm:$0xf] }
 0x210   : > { %v6149_v25 = vor.u32 %v6595_v14, %v6148_v12 }
 0x212   : > { %4246 = vmatpush.bf16.msrb.mxu0 %v6101_v23  ;;  %4260 = vmatpush.bf16.msrb.mxu1 %v6133_v24  ;;  %v6117_v23 = vor.u32 %v6587_v11, %v6116_v10 }
 0x213   : > { %4274 = vmatpush.bf16.msrb.mxu2 %v6165_v27  ;;  %4288 = vmatpush.bf16.msrb.mxu3 %v6197_v28  ;;  %v2693_v13 = vpop.f32.mrf.mxu2  ;;  %v2707_v19 = vpop.f32.mrf.mxu3  ;;  %v2710_v27 = vmul.f32 0.088388346, %v2706_v20 }
 0x214   : > { %v2694_v21 = vadd.f32 %v2693_v13, %v2680_v4 }
 0x216   : > { %4247 = vmatpush.bf16.msrb.mxu0 %v6097_v1  ;;  %4261 = vmatpush.bf16.msrb.mxu1 %v6129_v34  ;;  %v2708_v24 = vadd.f32 %v2707_v19, %v2694_v21 }
 0x217   : > { %4275 = vmatpush.bf16.msrb.mxu2 %v6161_v3  ;;  %4289 = vmatpush.bf16.msrb.mxu3 %v6193_v36 }
 0x218   : > { %v2711_v28 = vmul.f32 0.088388346, %v2708_v24 }
 0x21a   : > { %4248 = vmatpush.bf16.msrb.mxu0 %v6093_v45  ;;  %4262 = vmatpush.bf16.msrb.mxu1 %v6125_v46  ;;  %v6644_v29 = vpack.c.bf16 %v2711_v28, %v2710_v27 }
 0x21b   : > { %4276 = vmatpush.bf16.msrb.mxu2 %v6157_v50  ;;  %4290 = vmatpush.bf16.msrb.mxu3 %v6189_v51 }
 0x21c   : > { %6674 = vst [vmem:[%s7402_s5 + $0x10] sm:$0xff] %v6644_v29  }
 0x21e   : > { %4249 = vmatpush.bf16.msrb.mxu0 %v6089_v58  ;;  %4263 = vmatpush.bf16.msrb.mxu1 %v6121_v61 }
 0x21f   : > { %4277 = vmatpush.bf16.msrb.mxu2 %v6153_v5  ;;  %4291 = vmatpush.bf16.msrb.mxu3 %v6185_v6 }
 0x222   : > { %4250 = vmatpush.bf16.msrb.mxu0 %v6085_v22  ;;  %4264 = vmatpush.bf16.msrb.mxu1 %v6117_v23  ;;  %v2982_v30 = vpop.f32.mrf.mxu0  ;;  %v2996_v31 = vpop.f32.mrf.mxu1 }
 0x223   : > { %4278 = vmatpush.bf16.msrb.mxu2 %v6149_v25  ;;  %4292 = vmatpush.bf16.msrb.mxu3 %v6181_v26  ;;  %v2997_v34 = vadd.f32 %v2996_v31, %v2982_v30 }
 0x225   : > { %4251 = vmatmul.bf16.vlgmr.msrb.gmra.mxu0 %v7362_v9  ;;  %4265 = vmatmul.bf16.vlgmr.msrb.gmra.mxu1 %v7364_v18 }
 0x226   : > { %4279 = vmatmul.bf16.vlgmr.msrb.gmra.mxu2 %v7366_v43  ;;  %4293 = vmatmul.bf16.vlgmr.msrb.gmra.mxu3 %v7368_v44 }
 0x22a   : > { %v2984_v33 = vpop.f32.mrf.mxu0  ;;  %v2998_v1 = vpop.f32.mrf.mxu1 }
 0x22b   : > { %v3010_v0 = vpop.f32.mrf.mxu2  ;;  %v3024_v32 = vpop.f32.mrf.mxu3  ;;  %v2999_v35 = vadd.f32 %v2998_v1, %v2984_v33 }
 0x22c   : > { %v3011_v2 = vadd.f32 %v3010_v0, %v2997_v34 }
 0x22e   : > { %v3025_v37 = vadd.f32 %v3024_v32, %v3011_v2 }
 0x233   : > { %v3012_v3 = vpop.f32.mrf.mxu2  ;;  %v3026_v9 = vpop.f32.mrf.mxu3 }
 0x234   : > { %v3013_v36 = vadd.f32 %v3012_v3, %v2999_v35 }
 0x236   : > { %v3027_v18 = vadd.f32 %v3026_v9, %v3013_v36 }
 0x238   : > { %v6649_v38 = vpack.c.bf16 %v3027_v18, %v3025_v37 }
 0x23a   : > { %6675 = vst [vmem:[%s7412_s6 + $0x10] sm:$0xff] %v6649_v38  }
 0x242   : > { %v3299_v43 = vpop.f32.mrf.mxu0  ;;  %v3313_v44 = vpop.f32.mrf.mxu1 }
 0x243   : > { %v3314_v8 = vadd.f32 %v3313_v44, %v3299_v43 }
 0x24a   : > { %v3301_v7 = vpop.f32.mrf.mxu0  ;;  %v3315_v41 = vpop.f32.mrf.mxu1 }
 0x24b   : > { %v3327_v39 = vpop.f32.mrf.mxu2  ;;  %v3341_v40 = vpop.f32.mrf.mxu3  ;;  %v3316_v45 = vadd.f32 %v3315_v41, %v3301_v7 }
 0x24c   : > { %v3328_v42 = vadd.f32 %v3327_v39, %v3314_v8 }
 0x24e   : > { %v3342_v48 = vadd.f32 %v3341_v40, %v3328_v42 }
 0x253   : > { %v3329_v46 = vpop.f32.mrf.mxu2  ;;  %v3343_v47 = vpop.f32.mrf.mxu3 }
 0x254   : > { %v3330_v15 = vadd.f32 %v3329_v46, %v3316_v45 }
 0x256   : > { %v3344_v50 = vadd.f32 %v3343_v47, %v3330_v15 }
 0x258   : > { %v6654_v51 = vpack.c.bf16 %v3344_v50, %v3342_v48 }
 0x25a   : > { %6676 = vst [vmem:[%s7416_s11 + $0x10] sm:$0xff] %v6654_v51  }
 0x262   : > { %v3616_v49 = vpop.f32.mrf.mxu0  ;;  %v3630_v52 = vpop.f32.mrf.mxu1 }
 0x263   : > { %v3631_v55 = vadd.f32 %v3630_v52, %v3616_v49 }
 0x26a   : > { %v3618_v56 = vpop.f32.mrf.mxu0  ;;  %v3632_v57 = vpop.f32.mrf.mxu1 }
 0x26b   : > { %v3644_v53 = vpop.f32.mrf.mxu2  ;;  %v3658_v54 = vpop.f32.mrf.mxu3  ;;  %v3633_v60 = vadd.f32 %v3632_v57, %v3618_v56 }
 0x26c   : > { %v3645_v59 = vadd.f32 %v3644_v53, %v3631_v55 }
 0x26e   : > { %v3659_v61 = vadd.f32 %v3658_v54, %v3645_v59 }
 0x270   : > { %v3663_v5 = vmul.f32 0.088388346, %v3659_v61 }
 0x273   : > { %v3646_v58 = vpop.f32.mrf.mxu2  ;;  %v3660_v63 = vpop.f32.mrf.mxu3 }
 0x274   : > { %v3647_v62 = vadd.f32 %v3646_v58, %v3633_v60 }
 0x276   : > { %v3661_v4 = vadd.f32 %v3660_v63, %v3647_v62 }
 0x278   : > { %v3664_v6 = vmul.f32 0.088388346, %v3661_v4 }
 0x27a   : > { %v6659_v10 = vpack.c.bf16 %v3664_v6, %v3663_v5 }
 0x27c   : > { %6677 = vst [vmem:[%s7402_s5 + $0x18] sm:$0xff] %v6659_v10  }
 0x282   : > { %v3935_v11 = vpop.f32.mrf.mxu0  ;;  %v3949_v12 = vpop.f32.mrf.mxu1 }
 0x283   : > { %v3950_v20 = vadd.f32 %v3949_v12, %v3935_v11 }
 0x28a   : > { %v3937_v16 = vpop.f32.mrf.mxu0  ;;  %v3951_v17 = vpop.f32.mrf.mxu1 }
 0x28b   : > { %v3963_v13 = vpop.f32.mrf.mxu2  ;;  %v3977_v14 = vpop.f32.mrf.mxu3  ;;  %v3952_v19 = vadd.f32 %v3951_v17, %v3937_v16 }
 0x28c   : > { %v3964_v21 = vadd.f32 %v3963_v13, %v3950_v20 }
 0x28e   : > { %v3978_v25 = vadd.f32 %v3977_v14, %v3964_v21 }
 0x293   : > { %v3965_v22 = vpop.f32.mrf.mxu2  ;;  %v3979_v24 = vpop.f32.mrf.mxu3 }
 0x294   : > { %v3966_v23 = vadd.f32 %v3965_v22, %v3952_v19 }
 0x296   : > { %v3980_v26 = vadd.f32 %v3979_v24, %v3966_v23 }
 0x298   : > { %v6664_v27 = vpack.c.bf16 %v3980_v26, %v3978_v25 }
 0x29a   : > { %6678 = vst [vmem:[%s7412_s6 + $0x18] sm:$0xff] %v6664_v27  }
 0x2a2   : > { %v4252_v28 = vpop.f32.mrf.mxu0  ;;  %v4266_v29 = vpop.f32.mrf.mxu1 }
 0x2a3   : > { %v4267_v33 = vadd.f32 %v4266_v29, %v4252_v28 }
 0x2a9   : > { %v4280_v30 = vpop.f32.mrf.mxu2  ;;  %v4294_v31 = vpop.f32.mrf.mxu3 }
 0x2aa   : > { %v4254_v0 = vpop.f32.mrf.mxu0  ;;  %v4268_v32 = vpop.f32.mrf.mxu1  ;;  %v4281_v1 = vadd.f32 %v4280_v30, %v4267_v33 }
 0x2ab   : > { %v4269_v34 = vadd.f32 %v4268_v32, %v4254_v0 }
 0x2ac   : > { %v4295_v36 = vadd.f32 %v4294_v31, %v4281_v1 }
 0x2b1   : > { %v4282_v2 = vpop.f32.mrf.mxu2  ;;  %v4296_v3 = vpop.f32.mrf.mxu3 }
 0x2b2   : > { %v4283_v35 = vadd.f32 %v4282_v2, %v4269_v34 }
 0x2b4   : > { %v4297_v9 = vadd.f32 %v4296_v3, %v4283_v35 }
 0x2b6   : > { %v6669_v37 = vpack.c.bf16 %v4297_v9, %v4295_v36 }
 0x2b8   : > { %6679 = vst [vmem:[%s7416_s11 + $0x18] sm:$0xff] %v6669_v37  }
 0x2b9   : > { %s6215_s2 = sshll.u32 %s7075_s27, 1  ;;  %s6216_s19 = sshll.u32 %s7079_s28, 4 }
 0x2ba   : > { %s4326_s23 = sadd.s32 %s6216_s19, %s6215_s2  ;;  %s4339_s14 = sshll.u32 %s7402_s5, 4  ;;  %s4340_s14 = int_to_ptr.vmem [resolvable:$true] %s4339_s14 }
 0x2bb   : > { %s7457_s17 = sshll.u32 %s4326_s23, 2  ;;  %s7579_s20 = sld [smem:[#allocation33_spill]] }
 0x2bc   : > { %s7102_s7 = smov 128   ;;  %s7103_s27 = smov 256  }
 0x2bd   : > { %6698 = sst [smem:[#allocation16]] (%p7274_p5), %s7102_s7  ;;  %s7104_s28 = smov 2  }
 0x2be   : > { %6699 = sst [smem:[#allocation16 + $0x1]] (%p7274_p5), %s7103_s27  ;;  %s7105_s24 = smov 64  }
 0x2bf   : > { %6700 = sst [smem:[#allocation16 + $0x2]] (%p7274_p5), %s7104_s28  ;;  %s7106_s12 = smov 4  }
 0x2c0   : > { %6701 = sst [smem:[#allocation16 + $0x3]] (%p7274_p5), %s7105_s24  ;;  %s7107_s4 = smov [#allocation15]  }
 0x2c1   : > { %s4328_s18 = scalar_lea.hbm %s7579_s20, %s7457_s17  ;;  %6702 = sst [smem:[#allocation16 + $0x4]] (%p7274_p5), %s7105_s24 }
 0x2c2   : > { %s4341_s3 = sshll.u32 %s4328_s18, 4  ;;  %6703 = sst [smem:[#allocation16 + $0x5]] (%p7274_p5), %s7106_s12  ;;  %s4342_s3 = int_to_ptr.hbm [resolvable:$true] %s4341_s3 }
 0x2c3   : > { %s7108_s5 = smov 0  }
 0x2c4   : > { %6704 = dma.general (%p7274_p5), %s4340_s14, 512, %s4342_s3, %s4305_s21, %s7107_s4, [#allocation16], %s7108_s5, 0  }
 0x2c5   : > { %s7580_s19 = sld [smem:[#allocation34_spill]]  ;;  %s4381_s9 = sshll.u32 %s7412_s6, 4  ;;  %s4382_s9 = int_to_ptr.vmem [resolvable:$true] %s4381_s9 }
 0x2c6   : > { %s7109_s20 = smov 128   ;;  %s7110_s21 = smov 256  }
 0x2c7   : > { %6705 = sst [smem:[#allocation18]] (%p7274_p5), %s7109_s20  ;;  %s7111_s14 = smov 2  }
 0x2c8   : > { %6706 = sst [smem:[#allocation18 + $0x1]] (%p7274_p5), %s7110_s21  ;;  %s7112_s18 = smov 64  }
 0x2c9   : > { %6707 = sst [smem:[#allocation18 + $0x2]] (%p7274_p5), %s7111_s14  ;;  %s7113_s6 = smov 4  }
 0x2ca   : > { %6708 = sst [smem:[#allocation18 + $0x3]] (%p7274_p5), %s7112_s18  ;;  %s7114_s3 = smov [#allocation17]  }
 0x2cb   : > { %s4370_s23 = scalar_lea.hbm %s7580_s19, %s7457_s17  ;;  %6709 = sst [smem:[#allocation18 + $0x4]] (%p7274_p5), %s7112_s18 }
 0x2cc   : > { %s4383_s10 = sshll.u32 %s4370_s23, 4  ;;  %6710 = sst [smem:[#allocation18 + $0x5]] (%p7274_p5), %s7113_s6  ;;  %s4384_s10 = int_to_ptr.hbm [resolvable:$true] %s4383_s10 }
 0x2cd   : > { %s7115_s7 = smov 0  }
 0x2ce   : > { %6711 = dma.general (%p7274_p5), %s4382_s9, 512, %s4384_s10, %s7452_s15, %s7114_s3, [#allocation18], %s7115_s7, 0  }
 0x2cf   : > { %s7581_s24 = sld [smem:[#allocation35_spill]]  ;;  %s4423_s4 = sshll.u32 %s7416_s11, 4  ;;  %s4424_s4 = int_to_ptr.vmem [resolvable:$true] %s4423_s4 }
 0x2d0   : > { %s7116_s16 = smov 128   ;;  %s7117_s2 = smov 256  }
 0x2d1   : > { %6712 = sst [smem:[#allocation20]] (%p7274_p5), %s7116_s16  ;;  %s7118_s19 = smov 2  }
 0x2d2   : > { %6713 = sst [smem:[#allocation20 + $0x1]] (%p7274_p5), %s7117_s2  ;;  %s7119_s23 = smov 64  }
 0x2d3   : > { %6714 = sst [smem:[#allocation20 + $0x2]] (%p7274_p5), %s7118_s19  ;;  %s7120_s11 = smov 4  }
 0x2d4   : > { %6715 = sst [smem:[#allocation20 + $0x3]] (%p7274_p5), %s7119_s23  ;;  %s7122_s9 = smov 0  }
 0x2d5   : > { %s4412_s12 = scalar_lea.hbm %s7581_s24, %s7457_s17  ;;  %6716 = sst [smem:[#allocation20 + $0x4]] (%p7274_p5), %s7119_s23 }
 0x2d6   : > { %s4425_s5 = sshll.u32 %s4412_s12, 4  ;;  %6717 = sst [smem:[#allocation20 + $0x5]] (%p7274_p5), %s7120_s11  ;;  %s4426_s5 = int_to_ptr.hbm [resolvable:$true] %s4425_s5 }
 0x2d7   : > { %s7121_s17 = smov [#allocation19]  }
 0x2d8   : > { %6718 = dma.general (%p7274_p5), %s4424_s4, 512, %s4426_s5, %s7452_s15, %s7121_s17, [#allocation20], %s7122_s9, 0  }
 0x2d9 PF: > { %s7582_s10 = sld [smem:[#allocation26_spill]]  ;;  %p6758_p1 = scmp.ge.s32.totalorder %s7091_s8, 2 }
 0x2db   : > { %p6740_p4 = pnand %p6758_p1, %p7220_p6 }
 0x2dd   : > { %p6741_p8 = pneg %p6740_p4 }
 0x2df   : > { %s4453_s21 = sand.u32 1, %s7582_s10  }
 0x2e0   : > { %s4454_s14 = scalar_lea.sflag [#allocation4], %s4453_s21 }
 0x2e1   : > { %7054 = dma.done.wait (%p6741_p8), %s4454_s14, 512  }
 0x2e2   : > { %7056 = vsyncadd (%p6741_p8), %s4454_s14, 4294966784  ;;  %s7584_s18 = sadd.s32 4294967294, %s7091_s8  }
 0x2e3   : > { %s4463_s6 = sand.u32 1, %s7584_s18  }
 0x2e4   : > { %s4464_s3 = scalar_lea.sflag [#allocation13], %s4463_s6 }
 0x2e5   : > { %7058 = dma.done.wait (%p6741_p8), %s4464_s3, 1024  }
 0x2e6   : > { %7060 = vsyncadd (%p6741_p8), %s4464_s3, 4294966272  ;;  %s29_s8 = sadd.s32 1, %s7091_s8   ;;  %s7585_s1 = sld [smem:[#allocation28_spill]] }
 0x2e7   : > { %p26_p10 = scmp.ge.s32.totalorder %s29_s8, 6   ;;  %s7586_s24 = smov %s7067_s25 }
 0x2e8   : > { %s7587_s25 = smov %s7071_s26  ;;  %s7588_s26 = smov %s7287_s22 }
 0x2e9   : > { %s7589_s27 = smov %s7083_s29  ;;  %s7590_s28 = smov %s7087_s30 }
 0x2ea   : > { %s7592_s30 = smov %s7598_s13  ;;  %28 = sbr.rel (!%p26_p10) target bundleno = 19 (0x13), region = 157 }
 0x2ec   : > { %s7591_s29 = smov %s7585_s1 }
 0x2ef   :  { %4480 = vsyncpa [#allocation3], 1 }
 0x2f0   :  { %4482 = vsyncpa [#allocation3 + $0x1], 1 }
 0x2f1   :  { %4483 = vsyncpa [#allocation6], 1 }
 0x2f2   :  { %4484 = vsyncpa [#allocation9], 1 }
 0x2f3   :  { %4485 = vsyncpa [#allocation4], 1 }
 0x2f4   :  { %4487 = vsyncpa [#allocation4 + $0x1], 1 }
 0x2f5   :  { %4488 = vsyncpa [#allocation13], 1 }
 0x2f6   :  { %4490 = vsyncpa [#allocation13 + $0x1], 1 }

</bundles_post_ra>
